<compile_context>
chip_gen: v7x
topology: tpu7x:2x2x1
jax: 0.10.0
libtpu: 0.0.40
codegen_flags: <defaults>
</compile_context>

<pallas_src>
import functools
import math

import jax
import jax.numpy as jnp
import numpy as np
from jax.experimental import pallas as pl
from jax.experimental.pallas import tpu as pltpu


# ----------------------------------------------------------------------------
# Fused kernel: downsample conv + dl residual blocks + 1x1 aggregation
# ----------------------------------------------------------------------------
def _downsample_fused_kernel(patches_ref, w_ds_ref, w1s_ref, w2s_ref, w_agg_ref,
                             biases_ref, masks_ref, alphas_ref, out_ref,
                             *, Ho, Wo, Cout, dl):
    """One image per grid step; every intermediate stays in vregs/VMEM.

    patches_ref : (1, M, 9*Cin)      im2col of the stride-2 conv input, M = Ho*Wo
    w_ds_ref    : (9*Cin, Cout)      downsample conv weight (flattened HWIO)
    w1s_ref     : (dl, 9*Cout, Cout) per-block conv1 weights
    w2s_ref     : (dl, 9*Cout, Cout) per-block conv2 weights
    w_agg_ref   : ((dl+1)*Cout, Cout) 1x1 aggregation weight
    biases_ref  : (2+2*dl, Cout)     rows [b_ds, b1_0, b2_0, ..., b1_{dl-1}, b2_{dl-1}, b_agg]
    masks_ref   : (9, M, Cout)       per-tap validity masks (zero rows a roll wrapped)
    alphas_ref  : (dl,) in SMEM      PReLU single shared parameter per block
    out_ref     : (1, M, Cout)       lane-contiguous output slab for this image
    """
    M = Ho * Wo

    def bias_row(i):                          # (1, Cout) -> broadcasts over M rows
        return biases_ref[i:i + 1, :]

    # ---- stride-2 downsample conv: one im2col matmul (M x 9*Cin @ 9*Cin x Cout) ----
    f0 = jnp.dot(patches_ref[0], w_ds_ref[...],
                 preferred_element_type=jnp.float32) + bias_row(0)

    # Tap (dh, dw) of a 3x3 "same" conv on the flattened row index m = h*Wo + w is
    # roll(feat, -(dh*Wo + dw)) with out-of-image (wrapped) rows zeroed.
    # Shifts are static; masks were precomputed in the wrapper and are loaded once
    # here, then reused by all 2*dl convs (nothing rebuilt inside the dl loop).
    shifts = [(-(dh * Wo + dw)) % M for dh in (-1, 0, 1) for dw in (-1, 0, 1)]
    masks = [masks_ref[t] for t in range(9)]

    def conv3x3_same(feat, w_ref, blk, b):
        # feat: (M, Cout); w_ref[blk]: (9*Cout, Cout) with rows ordered (kh, kw, cin).
        acc = None
        for t in range(9):
            if shifts[t] == 0:
                tap = feat                                   # center tap: no roll/mask
            else:
                tap = pltpu.roll(feat, shifts[t], axis=0) * masks[t]
            part = jnp.dot(tap, w_ref[blk, t * Cout:(t + 1) * Cout, :],
                           preferred_element_type=jnp.float32)
            acc = part if acc is None else acc + part
        return acc + b

    # ---- dl residual blocks with dense feature aggregation ----
    features = [f0]
    running = f0                                             # f0 + x1 + ... + x_i
    for i in range(dl):
        fa = running
        r = conv3x3_same(fa, w1s_ref, i, bias_row(1 + 2 * i))
        a = alphas_ref[i]                                    # SMEM scalar
        r = jnp.where(r > 0, r, a * r)                       # PReLU (single shared param)
        r = conv3x3_same(r, w2s_ref, i, bias_row(2 + 2 * i))
        x_new = fa + r                                       # residual add
        features.append(x_new)
        running = running + x_new

    # ---- 1x1 aggregation: (dl+1) K=Cout matmuls; channel concat never materializes ----
    agg = None
    for j, f in enumerate(features):
        part = jnp.dot(f, w_agg_ref[j * Cout:(j + 1) * Cout, :],
                       preferred_element_type=jnp.float32)
        agg = part if agg is None else agg + part
    out_ref[0] = (agg + bias_row(1 + 2 * dl)).astype(out_ref.dtype)


# ----------------------------------------------------------------------------
# Wrapper: one-time input pre-gather + single fused pallas_call (grid over batch)
# ----------------------------------------------------------------------------
def downsample_forward(params, x):
    """x: (B, H, W, inplanes) NHWC -> (B, H//2, W//2, outplanes) NHWC."""
    B, H, W, Cin = x.shape
    ds_convs = params["downsample"]
    # TODO(synk): factor > 2 (chained stride-2 convs) would need a second pre-gather
    # stage or in-kernel stride handling; module default is factor=2.
    assert len(ds_convs) == 1, "fused kernel supports factor=2 (one stride-2 conv)"
    w_ds, b_ds = ds_convs[0]
    Cout = w_ds.shape[-1]
    blocks = params["blocks"]
    dl = len(blocks)
    Ho = (H + 2 - 3) // 2 + 1
    Wo = (W + 2 - 3) // 2 + 1
    M = Ho * Wo

    # One-time XLA-side pre-gather for the stride-2 conv: pad + im2col so the kernel
    # only ever does unit-stride / roll accesses.  Tap order (kh, kw, cin) matches the
    # flattened HWIO weight.
    xp = jnp.pad(x, ((0, 0), (1, 1), (1, 1), (0, 0)))
    tap_slabs = [xp[:, kh:kh + 2 * Ho:2, kw:kw + 2 * Wo:2, :]
                 for kh in range(3) for kw in range(3)]
    patches = jnp.concatenate(tap_slabs, axis=-1).reshape(B, M, 9 * Cin)

    # Weight / bias packing (constant-folded under jit).
    w_ds_f = w_ds.reshape(9 * Cin, Cout)
    w1s = jnp.stack([blk["w1"].reshape(9 * Cout, Cout) for blk in blocks])
    w2s = jnp.stack([blk["w2"].reshape(9 * Cout, Cout) for blk in blocks])
    biases = jnp.stack([b_ds]
                       + [b for blk in blocks for b in (blk["b1"], blk["b2"])]
                       + [params["agg_b"]])
    alphas = jnp.stack([blk["alpha"] for blk in blocks]).astype(jnp.float32)
    w_agg = params["agg_w"]                                   # ((dl+1)*Cout, Cout)

    # Per-tap validity masks for the roll-based 3x3 conv, built once at trace time.
    mm = np.arange(M)
    hh, ww = mm // Wo, mm % Wo
    masks_np = np.stack([
        (((hh + dh) >= 0) & ((hh + dh) < Ho) & ((ww + dw) >= 0) & ((ww + dw) < Wo))
        for dh in (-1, 0, 1) for dw in (-1, 0, 1)
    ]).astype(np.float32)                                      # (9, M)
    masks = jnp.asarray(np.broadcast_to(masks_np[:, :, None], (9, M, Cout)).copy())

    kernel = functools.partial(_downsample_fused_kernel,
                               Ho=Ho, Wo=Wo, Cout=Cout, dl=dl)
    out = pl.pallas_call(
        kernel,
        out_shape=jax.ShapeDtypeStruct((B, M, Cout), x.dtype),
        grid=(B,),
        in_specs=[
            pl.BlockSpec((1, M, 9 * Cin), lambda b: (b, 0, 0)),        # per-image patches
            pl.BlockSpec((9 * Cin, Cout), lambda b: (0, 0)),           # resident weights
            pl.BlockSpec((dl, 9 * Cout, Cout), lambda b: (0, 0, 0)),
            pl.BlockSpec((dl, 9 * Cout, Cout), lambda b: (0, 0, 0)),
            pl.BlockSpec(((dl + 1) * Cout, Cout), lambda b: (0, 0)),
            pl.BlockSpec((2 + 2 * dl, Cout), lambda b: (0, 0)),
            pl.BlockSpec((9, M, Cout), lambda b: (0, 0, 0)),           # border masks
            pl.BlockSpec(memory_space=pltpu.MemorySpace.SMEM),         # PReLU alphas
        ],
        out_specs=pl.BlockSpec((1, M, Cout), lambda b: (b, 0, 0)),
        compiler_params=pltpu.CompilerParams(
            dimension_semantics=("parallel",)),                        # v7x: 2 TCs
    )(patches, w_ds_f, w1s, w2s, w_agg, biases, masks, alphas)
    return out.reshape(B, Ho, Wo, Cout)


# ----------------------------------------------------------------------------
# Parameters (deterministic synthetic init; shapes match the PyTorch module)
# ----------------------------------------------------------------------------
def init_params(key, inplanes=16, outplanes=32, dl=3, factor=2):
    con_num = int(math.log2(factor))
    keys = iter(jax.random.split(key, 64))

    def conv_w(k, kh, kw, cin, cout):
        scale = 1.0 / math.sqrt(kh * kw * cin)
        return jax.random.uniform(k, (kh, kw, cin, cout), jnp.float32, -scale, scale)

    def bias(k, cout):
        return jax.random.uniform(k, (cout,), jnp.float32, -0.1, 0.1)

    params = {"downsample": [], "blocks": []}
    cin = inplanes
    for _ in range(con_num):
        params["downsample"].append((conv_w(next(keys), 3, 3, cin, outplanes),
                                     bias(next(keys), outplanes)))
        cin = outplanes
    for _ in range(dl):
        params["blocks"].append({
            "w1": conv_w(next(keys), 3, 3, outplanes, outplanes),
            "b1": bias(next(keys), outplanes),
            "alpha": jnp.float32(0.25),          # nn.PReLU() default single param
            "w2": conv_w(next(keys), 3, 3, outplanes, outplanes),
            "b2": bias(next(keys), outplanes),
        })
    agg_cin = (dl + 1) * outplanes
    params["agg_w"] = conv_w(next(keys), 1, 1, agg_cin, outplanes).reshape(agg_cin, outplanes)
    params["agg_b"] = bias(next(keys), outplanes)
    return params


# ----------------------------------------------------------------------------
# Pure-JAX reference for correctness check
# ----------------------------------------------------------------------------
def ref_forward(params, x):
    def conv(x, w, b, stride, pad):
        y = jax.lax.conv_general_dilated(x, w, (stride, stride), pad,
                                         dimension_numbers=("NHWC", "HWIO", "NHWC"))
        return y + b

    for (w, b) in params["downsample"]:
        x = conv(x, w, b, 2, ((1, 1), (1, 1)))
    features = [x]
    for blk in params["blocks"]:
        fa = features[0]
        for f in features[1:]:
            fa = fa + f
        r = conv(fa, blk["w1"], blk["b1"], 1, ((1, 1), (1, 1)))
        r = jnp.where(r > 0, r, blk["alpha"] * r)
        r = conv(r, blk["w2"], blk["b2"], 1, ((1, 1), (1, 1)))
        features.append(fa + r)
    feat = jnp.concatenate(features, axis=-1)
    cin = feat.shape[-1]
    return conv(feat, params["agg_w"].reshape(1, 1, cin, -1), params["agg_b"],
                1, ((0, 0), (0, 0)))


if __name__ == "__main__":
    key = jax.random.PRNGKey(0)
    kx, kp = jax.random.split(key)

    B, C, H, W = 2, 16, 16, 16                    # NCHW, inplanes=16 per module default
    x_nchw = jax.random.normal(kx, (B, C, H, W), jnp.float32)
    x = jnp.transpose(x_nchw, (0, 2, 3, 1))       # NCHW -> NHWC

    params = init_params(kp, inplanes=16, outplanes=32, dl=3, factor=2)

    out = jax.jit(downsample_forward)(params, x)
    out = jax.block_until_ready(out)
    assert out.shape == (B, H // 2, W // 2, 32), out.shape

    ref = jax.block_until_ready(ref_forward(params, x))
    np.testing.assert_allclose(np.asarray(out), np.asarray(ref), atol=2e-3, rtol=2e-3)

    print("KERNEL_OK")
</pallas_src>

<mosaic_0001>
module attributes {stable_mosaic.version = 11 : i64} {
  func.func @_downsample_fused_kernel(%arg0: i32, %arg1: memref<1x64x144xf32, #tpu.memory_space<vmem>>, %arg2: memref<144x32xf32, #tpu.memory_space<vmem>>, %arg3: memref<3x288x32xf32, #tpu.memory_space<vmem>>, %arg4: memref<3x288x32xf32, #tpu.memory_space<vmem>>, %arg5: memref<128x32xf32, #tpu.memory_space<vmem>>, %arg6: memref<8x32xf32, #tpu.memory_space<vmem>>, %arg7: memref<9x64x32xf32, #tpu.memory_space<vmem>>, %arg8: memref<3xf32, #tpu.memory_space<smem>>, %arg9: memref<1x64x32xf32, #tpu.memory_space<vmem>>) attributes {dimension_semantics = [#tpu.dimension_semantics<parallel>], iteration_bounds = array<i64: 2>, scalar_prefetch = 0 : i64, scratch_operands = 0 : i64, tpu.core_type = #tpu.core_type<tc>, window_params = [{transform_indices = @transform_0, window_bounds = array<i64: 1, 64, 144>}, {pipeline_mode = #tpu.pipeline_mode<synchronous>, transform_indices = @transform_1, window_bounds = array<i64: 144, 32>}, {pipeline_mode = #tpu.pipeline_mode<synchronous>, transform_indices = @transform_2, window_bounds = array<i64: 3, 288, 32>}, {pipeline_mode = #tpu.pipeline_mode<synchronous>, transform_indices = @transform_3, window_bounds = array<i64: 3, 288, 32>}, {pipeline_mode = #tpu.pipeline_mode<synchronous>, transform_indices = @transform_4, window_bounds = array<i64: 128, 32>}, {pipeline_mode = #tpu.pipeline_mode<synchronous>, transform_indices = @transform_5, window_bounds = array<i64: 8, 32>}, {pipeline_mode = #tpu.pipeline_mode<synchronous>, transform_indices = @transform_6, window_bounds = array<i64: 9, 64, 32>}, {transform_indices = @transform_7, window_bounds = array<i64: 3>}, {transform_indices = @transform_8, window_bounds = array<i64: 1, 64, 32>}]} {
    %c0 = arith.constant 0 : index
    %c0_0 = arith.constant 0 : index
    %c0_1 = arith.constant 0 : index
    %0 = vector.load %arg1[%c0, %c0_0, %c0_1] : memref<1x64x144xf32, #tpu.memory_space<vmem>>, vector<1x64x144xf32>
    %1 = vector.shape_cast %0 : vector<1x64x144xf32> to vector<64x144xf32>
    %c0_2 = arith.constant 0 : index
    %c0_3 = arith.constant 0 : index
    %2 = vector.load %arg2[%c0_2, %c0_3] : memref<144x32xf32, #tpu.memory_space<vmem>>, vector<144x32xf32>
    %cst = arith.constant dense<0.000000e+00> : vector<64x32xf32>
    %3 = tpu.matmul %1, %2, %cst {dimension_numbers = #tpu.dot_dimension_numbers<[1], [0], [0], [1], [0, 0, 1, 1], [], []>} : vector<64x144xf32>, vector<144x32xf32>, vector<64x32xf32> -> vector<64x32xf32>
    %c0_4 = arith.constant 0 : index
    %c0_5 = arith.constant 0 : index
    %4 = vector.load %arg6[%c0_4, %c0_5] : memref<8x32xf32, #tpu.memory_space<vmem>>, vector<1x32xf32>
    %5 = vector.broadcast %4 : vector<1x32xf32> to vector<64x32xf32>
    %6 = arith.addf %3, %5 : vector<64x32xf32>
    %c0_6 = arith.constant 0 : index
    %c0_7 = arith.constant 0 : index
    %c0_8 = arith.constant 0 : index
    %7 = vector.load %arg7[%c0_6, %c0_7, %c0_8] : memref<9x64x32xf32, #tpu.memory_space<vmem>>, vector<1x64x32xf32>
    %8 = vector.shape_cast %7 : vector<1x64x32xf32> to vector<64x32xf32>
    %c1 = arith.constant 1 : index
    %c0_9 = arith.constant 0 : index
    %c0_10 = arith.constant 0 : index
    %9 = vector.load %arg7[%c1, %c0_9, %c0_10] : memref<9x64x32xf32, #tpu.memory_space<vmem>>, vector<1x64x32xf32>
    %10 = vector.shape_cast %9 : vector<1x64x32xf32> to vector<64x32xf32>
    %c2 = arith.constant 2 : index
    %c0_11 = arith.constant 0 : index
    %c0_12 = arith.constant 0 : index
    %11 = vector.load %arg7[%c2, %c0_11, %c0_12] : memref<9x64x32xf32, #tpu.memory_space<vmem>>, vector<1x64x32xf32>
    %12 = vector.shape_cast %11 : vector<1x64x32xf32> to vector<64x32xf32>
    %c3 = arith.constant 3 : index
    %c0_13 = arith.constant 0 : index
    %c0_14 = arith.constant 0 : index
    %13 = vector.load %arg7[%c3, %c0_13, %c0_14] : memref<9x64x32xf32, #tpu.memory_space<vmem>>, vector<1x64x32xf32>
    %14 = vector.shape_cast %13 : vector<1x64x32xf32> to vector<64x32xf32>
    %c5 = arith.constant 5 : index
    %c0_15 = arith.constant 0 : index
    %c0_16 = arith.constant 0 : index
    %15 = vector.load %arg7[%c5, %c0_15, %c0_16] : memref<9x64x32xf32, #tpu.memory_space<vmem>>, vector<1x64x32xf32>
    %16 = vector.shape_cast %15 : vector<1x64x32xf32> to vector<64x32xf32>
    %c6 = arith.constant 6 : index
    %c0_17 = arith.constant 0 : index
    %c0_18 = arith.constant 0 : index
    %17 = vector.load %arg7[%c6, %c0_17, %c0_18] : memref<9x64x32xf32, #tpu.memory_space<vmem>>, vector<1x64x32xf32>
    %18 = vector.shape_cast %17 : vector<1x64x32xf32> to vector<64x32xf32>
    %c7 = arith.constant 7 : index
    %c0_19 = arith.constant 0 : index
    %c0_20 = arith.constant 0 : index
    %19 = vector.load %arg7[%c7, %c0_19, %c0_20] : memref<9x64x32xf32, #tpu.memory_space<vmem>>, vector<1x64x32xf32>
    %20 = vector.shape_cast %19 : vector<1x64x32xf32> to vector<64x32xf32>
    %c8 = arith.constant 8 : index
    %c0_21 = arith.constant 0 : index
    %c0_22 = arith.constant 0 : index
    %21 = vector.load %arg7[%c8, %c0_21, %c0_22] : memref<9x64x32xf32, #tpu.memory_space<vmem>>, vector<1x64x32xf32>
    %22 = vector.shape_cast %21 : vector<1x64x32xf32> to vector<64x32xf32>
    %c1_23 = arith.constant 1 : index
    %c0_24 = arith.constant 0 : index
    %23 = vector.load %arg6[%c1_23, %c0_24] : memref<8x32xf32, #tpu.memory_space<vmem>>, vector<1x32xf32>
    %c9_i32 = arith.constant 9 : i32
    %24 = tpu.dynamic_rotate %6 by %c9_i32 dim 0 : vector<64x32xf32>, i32 -> vector<64x32xf32>
    %25 = arith.mulf %24, %8 : vector<64x32xf32>
    %c0_25 = arith.constant 0 : index
    %c0_26 = arith.constant 0 : index
    %c0_27 = arith.constant 0 : index
    %26 = vector.load %arg3[%c0_25, %c0_26, %c0_27] : memref<3x288x32xf32, #tpu.memory_space<vmem>>, vector<1x32x32xf32>
    %27 = vector.shape_cast %26 : vector<1x32x32xf32> to vector<32x32xf32>
    %cst_28 = arith.constant dense<0.000000e+00> : vector<64x32xf32>
    %28 = tpu.matmul %25, %27, %cst_28 {dimension_numbers = #tpu.dot_dimension_numbers<[1], [0], [0], [1], [0, 0, 1, 1], [], []>} : vector<64x32xf32>, vector<32x32xf32>, vector<64x32xf32> -> vector<64x32xf32>
    %c8_i32 = arith.constant 8 : i32
    %29 = tpu.dynamic_rotate %6 by %c8_i32 dim 0 : vector<64x32xf32>, i32 -> vector<64x32xf32>
    %30 = arith.mulf %29, %10 : vector<64x32xf32>
    %c0_29 = arith.constant 0 : index
    %c32 = arith.constant 32 : index
    %c0_30 = arith.constant 0 : index
    %31 = vector.load %arg3[%c0_29, %c32, %c0_30] : memref<3x288x32xf32, #tpu.memory_space<vmem>>, vector<1x32x32xf32>
    %32 = vector.shape_cast %31 : vector<1x32x32xf32> to vector<32x32xf32>
    %cst_31 = arith.constant dense<0.000000e+00> : vector<64x32xf32>
    %33 = tpu.matmul %30, %32, %cst_31 {dimension_numbers = #tpu.dot_dimension_numbers<[1], [0], [0], [1], [0, 0, 1, 1], [], []>} : vector<64x32xf32>, vector<32x32xf32>, vector<64x32xf32> -> vector<64x32xf32>
    %34 = arith.addf %28, %33 : vector<64x32xf32>
    %c7_i32 = arith.constant 7 : i32
    %35 = tpu.dynamic_rotate %6 by %c7_i32 dim 0 : vector<64x32xf32>, i32 -> vector<64x32xf32>
    %36 = arith.mulf %35, %12 : vector<64x32xf32>
    %c0_32 = arith.constant 0 : index
    %c64 = arith.constant 64 : index
    %c0_33 = arith.constant 0 : index
    %37 = vector.load %arg3[%c0_32, %c64, %c0_33] : memref<3x288x32xf32, #tpu.memory_space<vmem>>, vector<1x32x32xf32>
    %38 = vector.shape_cast %37 : vector<1x32x32xf32> to vector<32x32xf32>
    %cst_34 = arith.constant dense<0.000000e+00> : vector<64x32xf32>
    %39 = tpu.matmul %36, %38, %cst_34 {dimension_numbers = #tpu.dot_dimension_numbers<[1], [0], [0], [1], [0, 0, 1, 1], [], []>} : vector<64x32xf32>, vector<32x32xf32>, vector<64x32xf32> -> vector<64x32xf32>
    %40 = arith.addf %34, %39 : vector<64x32xf32>
    %c1_i32 = arith.constant 1 : i32
    %41 = tpu.dynamic_rotate %6 by %c1_i32 dim 0 : vector<64x32xf32>, i32 -> vector<64x32xf32>
    %42 = arith.mulf %41, %14 : vector<64x32xf32>
    %c0_35 = arith.constant 0 : index
    %c96 = arith.constant 96 : index
    %c0_36 = arith.constant 0 : index
    %43 = vector.load %arg3[%c0_35, %c96, %c0_36] : memref<3x288x32xf32, #tpu.memory_space<vmem>>, vector<1x32x32xf32>
    %44 = vector.shape_cast %43 : vector<1x32x32xf32> to vector<32x32xf32>
    %cst_37 = arith.constant dense<0.000000e+00> : vector<64x32xf32>
    %45 = tpu.matmul %42, %44, %cst_37 {dimension_numbers = #tpu.dot_dimension_numbers<[1], [0], [0], [1], [0, 0, 1, 1], [], []>} : vector<64x32xf32>, vector<32x32xf32>, vector<64x32xf32> -> vector<64x32xf32>
    %46 = arith.addf %40, %45 : vector<64x32xf32>
    %c0_38 = arith.constant 0 : index
    %c128 = arith.constant 128 : index
    %c0_39 = arith.constant 0 : index
    %47 = vector.load %arg3[%c0_38, %c128, %c0_39] : memref<3x288x32xf32, #tpu.memory_space<vmem>>, vector<1x32x32xf32>
    %48 = vector.shape_cast %47 : vector<1x32x32xf32> to vector<32x32xf32>
    %cst_40 = arith.constant dense<0.000000e+00> : vector<64x32xf32>
    %49 = tpu.matmul %6, %48, %cst_40 {dimension_numbers = #tpu.dot_dimension_numbers<[1], [0], [0], [1], [0, 0, 1, 1], [], []>} : vector<64x32xf32>, vector<32x32xf32>, vector<64x32xf32> -> vector<64x32xf32>
    %50 = arith.addf %46, %49 : vector<64x32xf32>
    %c63_i32 = arith.constant 63 : i32
    %51 = tpu.dynamic_rotate %6 by %c63_i32 dim 0 : vector<64x32xf32>, i32 -> vector<64x32xf32>
    %52 = arith.mulf %51, %16 : vector<64x32xf32>
    %c0_41 = arith.constant 0 : index
    %c160 = arith.constant 160 : index
    %c0_42 = arith.constant 0 : index
    %53 = vector.load %arg3[%c0_41, %c160, %c0_42] : memref<3x288x32xf32, #tpu.memory_space<vmem>>, vector<1x32x32xf32>
    %54 = vector.shape_cast %53 : vector<1x32x32xf32> to vector<32x32xf32>
    %cst_43 = arith.constant dense<0.000000e+00> : vector<64x32xf32>
    %55 = tpu.matmul %52, %54, %cst_43 {dimension_numbers = #tpu.dot_dimension_numbers<[1], [0], [0], [1], [0, 0, 1, 1], [], []>} : vector<64x32xf32>, vector<32x32xf32>, vector<64x32xf32> -> vector<64x32xf32>
    %56 = arith.addf %50, %55 : vector<64x32xf32>
    %c57_i32 = arith.constant 57 : i32
    %57 = tpu.dynamic_rotate %6 by %c57_i32 dim 0 : vector<64x32xf32>, i32 -> vector<64x32xf32>
    %58 = arith.mulf %57, %18 : vector<64x32xf32>
    %c0_44 = arith.constant 0 : index
    %c192 = arith.constant 192 : index
    %c0_45 = arith.constant 0 : index
    %59 = vector.load %arg3[%c0_44, %c192, %c0_45] : memref<3x288x32xf32, #tpu.memory_space<vmem>>, vector<1x32x32xf32>
    %60 = vector.shape_cast %59 : vector<1x32x32xf32> to vector<32x32xf32>
    %cst_46 = arith.constant dense<0.000000e+00> : vector<64x32xf32>
    %61 = tpu.matmul %58, %60, %cst_46 {dimension_numbers = #tpu.dot_dimension_numbers<[1], [0], [0], [1], [0, 0, 1, 1], [], []>} : vector<64x32xf32>, vector<32x32xf32>, vector<64x32xf32> -> vector<64x32xf32>
    %62 = arith.addf %56, %61 : vector<64x32xf32>
    %c56_i32 = arith.constant 56 : i32
    %63 = tpu.dynamic_rotate %6 by %c56_i32 dim 0 : vector<64x32xf32>, i32 -> vector<64x32xf32>
    %64 = arith.mulf %63, %20 : vector<64x32xf32>
    %c0_47 = arith.constant 0 : index
    %c224 = arith.constant 224 : index
    %c0_48 = arith.constant 0 : index
    %65 = vector.load %arg3[%c0_47, %c224, %c0_48] : memref<3x288x32xf32, #tpu.memory_space<vmem>>, vector<1x32x32xf32>
    %66 = vector.shape_cast %65 : vector<1x32x32xf32> to vector<32x32xf32>
    %cst_49 = arith.constant dense<0.000000e+00> : vector<64x32xf32>
    %67 = tpu.matmul %64, %66, %cst_49 {dimension_numbers = #tpu.dot_dimension_numbers<[1], [0], [0], [1], [0, 0, 1, 1], [], []>} : vector<64x32xf32>, vector<32x32xf32>, vector<64x32xf32> -> vector<64x32xf32>
    %68 = arith.addf %62, %67 : vector<64x32xf32>
    %c55_i32 = arith.constant 55 : i32
    %69 = tpu.dynamic_rotate %6 by %c55_i32 dim 0 : vector<64x32xf32>, i32 -> vector<64x32xf32>
    %70 = arith.mulf %69, %22 : vector<64x32xf32>
    %c0_50 = arith.constant 0 : index
    %c256 = arith.constant 256 : index
    %c0_51 = arith.constant 0 : index
    %71 = vector.load %arg3[%c0_50, %c256, %c0_51] : memref<3x288x32xf32, #tpu.memory_space<vmem>>, vector<1x32x32xf32>
    %72 = vector.shape_cast %71 : vector<1x32x32xf32> to vector<32x32xf32>
    %cst_52 = arith.constant dense<0.000000e+00> : vector<64x32xf32>
    %73 = tpu.matmul %70, %72, %cst_52 {dimension_numbers = #tpu.dot_dimension_numbers<[1], [0], [0], [1], [0, 0, 1, 1], [], []>} : vector<64x32xf32>, vector<32x32xf32>, vector<64x32xf32> -> vector<64x32xf32>
    %74 = arith.addf %68, %73 : vector<64x32xf32>
    %75 = vector.broadcast %23 : vector<1x32xf32> to vector<64x32xf32>
    %76 = arith.addf %74, %75 : vector<64x32xf32>
    %c0_53 = arith.constant 0 : index
    %77 = memref.load %arg8[%c0_53] : memref<3xf32, #tpu.memory_space<smem>>
    %cst_54 = arith.constant 0.000000e+00 : f32
    %78 = vector.broadcast %cst_54 : f32 to vector<64x32xf32>
    %79 = arith.cmpf ogt, %76, %78 : vector<64x32xf32>
    %80 = vector.broadcast %77 : f32 to vector<64x32xf32>
    %81 = arith.mulf %80, %76 : vector<64x32xf32>
    %82 = arith.select %79, %76, %81 : vector<64x32xi1>, vector<64x32xf32>
    %c2_55 = arith.constant 2 : index
    %c0_56 = arith.constant 0 : index
    %83 = vector.load %arg6[%c2_55, %c0_56] : memref<8x32xf32, #tpu.memory_space<vmem>>, vector<1x32xf32>
    %c9_i32_57 = arith.constant 9 : i32
    %84 = tpu.dynamic_rotate %82 by %c9_i32_57 dim 0 : vector<64x32xf32>, i32 -> vector<64x32xf32>
    %85 = arith.mulf %84, %8 : vector<64x32xf32>
    %c0_58 = arith.constant 0 : index
    %c0_59 = arith.constant 0 : index
    %c0_60 = arith.constant 0 : index
    %86 = vector.load %arg4[%c0_58, %c0_59, %c0_60] : memref<3x288x32xf32, #tpu.memory_space<vmem>>, vector<1x32x32xf32>
    %87 = vector.shape_cast %86 : vector<1x32x32xf32> to vector<32x32xf32>
    %cst_61 = arith.constant dense<0.000000e+00> : vector<64x32xf32>
    %88 = tpu.matmul %85, %87, %cst_61 {dimension_numbers = #tpu.dot_dimension_numbers<[1], [0], [0], [1], [0, 0, 1, 1], [], []>} : vector<64x32xf32>, vector<32x32xf32>, vector<64x32xf32> -> vector<64x32xf32>
    %c8_i32_62 = arith.constant 8 : i32
    %89 = tpu.dynamic_rotate %82 by %c8_i32_62 dim 0 : vector<64x32xf32>, i32 -> vector<64x32xf32>
    %90 = arith.mulf %89, %10 : vector<64x32xf32>
    %c0_63 = arith.constant 0 : index
    %c32_64 = arith.constant 32 : index
    %c0_65 = arith.constant 0 : index
    %91 = vector.load %arg4[%c0_63, %c32_64, %c0_65] : memref<3x288x32xf32, #tpu.memory_space<vmem>>, vector<1x32x32xf32>
    %92 = vector.shape_cast %91 : vector<1x32x32xf32> to vector<32x32xf32>
    %cst_66 = arith.constant dense<0.000000e+00> : vector<64x32xf32>
    %93 = tpu.matmul %90, %92, %cst_66 {dimension_numbers = #tpu.dot_dimension_numbers<[1], [0], [0], [1], [0, 0, 1, 1], [], []>} : vector<64x32xf32>, vector<32x32xf32>, vector<64x32xf32> -> vector<64x32xf32>
    %94 = arith.addf %88, %93 : vector<64x32xf32>
    %c7_i32_67 = arith.constant 7 : i32
    %95 = tpu.dynamic_rotate %82 by %c7_i32_67 dim 0 : vector<64x32xf32>, i32 -> vector<64x32xf32>
    %96 = arith.mulf %95, %12 : vector<64x32xf32>
    %c0_68 = arith.constant 0 : index
    %c64_69 = arith.constant 64 : index
    %c0_70 = arith.constant 0 : index
    %97 = vector.load %arg4[%c0_68, %c64_69, %c0_70] : memref<3x288x32xf32, #tpu.memory_space<vmem>>, vector<1x32x32xf32>
    %98 = vector.shape_cast %97 : vector<1x32x32xf32> to vector<32x32xf32>
    %cst_71 = arith.constant dense<0.000000e+00> : vector<64x32xf32>
    %99 = tpu.matmul %96, %98, %cst_71 {dimension_numbers = #tpu.dot_dimension_numbers<[1], [0], [0], [1], [0, 0, 1, 1], [], []>} : vector<64x32xf32>, vector<32x32xf32>, vector<64x32xf32> -> vector<64x32xf32>
    %100 = arith.addf %94, %99 : vector<64x32xf32>
    %c1_i32_72 = arith.constant 1 : i32
    %101 = tpu.dynamic_rotate %82 by %c1_i32_72 dim 0 : vector<64x32xf32>, i32 -> vector<64x32xf32>
    %102 = arith.mulf %101, %14 : vector<64x32xf32>
    %c0_73 = arith.constant 0 : index
    %c96_74 = arith.constant 96 : index
    %c0_75 = arith.constant 0 : index
    %103 = vector.load %arg4[%c0_73, %c96_74, %c0_75] : memref<3x288x32xf32, #tpu.memory_space<vmem>>, vector<1x32x32xf32>
    %104 = vector.shape_cast %103 : vector<1x32x32xf32> to vector<32x32xf32>
    %cst_76 = arith.constant dense<0.000000e+00> : vector<64x32xf32>
    %105 = tpu.matmul %102, %104, %cst_76 {dimension_numbers = #tpu.dot_dimension_numbers<[1], [0], [0], [1], [0, 0, 1, 1], [], []>} : vector<64x32xf32>, vector<32x32xf32>, vector<64x32xf32> -> vector<64x32xf32>
    %106 = arith.addf %100, %105 : vector<64x32xf32>
    %c0_77 = arith.constant 0 : index
    %c128_78 = arith.constant 128 : index
    %c0_79 = arith.constant 0 : index
    %107 = vector.load %arg4[%c0_77, %c128_78, %c0_79] : memref<3x288x32xf32, #tpu.memory_space<vmem>>, vector<1x32x32xf32>
    %108 = vector.shape_cast %107 : vector<1x32x32xf32> to vector<32x32xf32>
    %cst_80 = arith.constant dense<0.000000e+00> : vector<64x32xf32>
    %109 = tpu.matmul %82, %108, %cst_80 {dimension_numbers = #tpu.dot_dimension_numbers<[1], [0], [0], [1], [0, 0, 1, 1], [], []>} : vector<64x32xf32>, vector<32x32xf32>, vector<64x32xf32> -> vector<64x32xf32>
    %110 = arith.addf %106, %109 : vector<64x32xf32>
    %c63_i32_81 = arith.constant 63 : i32
    %111 = tpu.dynamic_rotate %82 by %c63_i32_81 dim 0 : vector<64x32xf32>, i32 -> vector<64x32xf32>
    %112 = arith.mulf %111, %16 : vector<64x32xf32>
    %c0_82 = arith.constant 0 : index
    %c160_83 = arith.constant 160 : index
    %c0_84 = arith.constant 0 : index
    %113 = vector.load %arg4[%c0_82, %c160_83, %c0_84] : memref<3x288x32xf32, #tpu.memory_space<vmem>>, vector<1x32x32xf32>
    %114 = vector.shape_cast %113 : vector<1x32x32xf32> to vector<32x32xf32>
    %cst_85 = arith.constant dense<0.000000e+00> : vector<64x32xf32>
    %115 = tpu.matmul %112, %114, %cst_85 {dimension_numbers = #tpu.dot_dimension_numbers<[1], [0], [0], [1], [0, 0, 1, 1], [], []>} : vector<64x32xf32>, vector<32x32xf32>, vector<64x32xf32> -> vector<64x32xf32>
    %116 = arith.addf %110, %115 : vector<64x32xf32>
    %c57_i32_86 = arith.constant 57 : i32
    %117 = tpu.dynamic_rotate %82 by %c57_i32_86 dim 0 : vector<64x32xf32>, i32 -> vector<64x32xf32>
    %118 = arith.mulf %117, %18 : vector<64x32xf32>
    %c0_87 = arith.constant 0 : index
    %c192_88 = arith.constant 192 : index
    %c0_89 = arith.constant 0 : index
    %119 = vector.load %arg4[%c0_87, %c192_88, %c0_89] : memref<3x288x32xf32, #tpu.memory_space<vmem>>, vector<1x32x32xf32>
    %120 = vector.shape_cast %119 : vector<1x32x32xf32> to vector<32x32xf32>
    %cst_90 = arith.constant dense<0.000000e+00> : vector<64x32xf32>
    %121 = tpu.matmul %118, %120, %cst_90 {dimension_numbers = #tpu.dot_dimension_numbers<[1], [0], [0], [1], [0, 0, 1, 1], [], []>} : vector<64x32xf32>, vector<32x32xf32>, vector<64x32xf32> -> vector<64x32xf32>
    %122 = arith.addf %116, %121 : vector<64x32xf32>
    %c56_i32_91 = arith.constant 56 : i32
    %123 = tpu.dynamic_rotate %82 by %c56_i32_91 dim 0 : vector<64x32xf32>, i32 -> vector<64x32xf32>
    %124 = arith.mulf %123, %20 : vector<64x32xf32>
    %c0_92 = arith.constant 0 : index
    %c224_93 = arith.constant 224 : index
    %c0_94 = arith.constant 0 : index
    %125 = vector.load %arg4[%c0_92, %c224_93, %c0_94] : memref<3x288x32xf32, #tpu.memory_space<vmem>>, vector<1x32x32xf32>
    %126 = vector.shape_cast %125 : vector<1x32x32xf32> to vector<32x32xf32>
    %cst_95 = arith.constant dense<0.000000e+00> : vector<64x32xf32>
    %127 = tpu.matmul %124, %126, %cst_95 {dimension_numbers = #tpu.dot_dimension_numbers<[1], [0], [0], [1], [0, 0, 1, 1], [], []>} : vector<64x32xf32>, vector<32x32xf32>, vector<64x32xf32> -> vector<64x32xf32>
    %128 = arith.addf %122, %127 : vector<64x32xf32>
    %c55_i32_96 = arith.constant 55 : i32
    %129 = tpu.dynamic_rotate %82 by %c55_i32_96 dim 0 : vector<64x32xf32>, i32 -> vector<64x32xf32>
    %130 = arith.mulf %129, %22 : vector<64x32xf32>
    %c0_97 = arith.constant 0 : index
    %c256_98 = arith.constant 256 : index
    %c0_99 = arith.constant 0 : index
    %131 = vector.load %arg4[%c0_97, %c256_98, %c0_99] : memref<3x288x32xf32, #tpu.memory_space<vmem>>, vector<1x32x32xf32>
    %132 = vector.shape_cast %131 : vector<1x32x32xf32> to vector<32x32xf32>
    %cst_100 = arith.constant dense<0.000000e+00> : vector<64x32xf32>
    %133 = tpu.matmul %130, %132, %cst_100 {dimension_numbers = #tpu.dot_dimension_numbers<[1], [0], [0], [1], [0, 0, 1, 1], [], []>} : vector<64x32xf32>, vector<32x32xf32>, vector<64x32xf32> -> vector<64x32xf32>
    %134 = arith.addf %128, %133 : vector<64x32xf32>
    %135 = vector.broadcast %83 : vector<1x32xf32> to vector<64x32xf32>
    %136 = arith.addf %134, %135 : vector<64x32xf32>
    %137 = arith.addf %6, %136 : vector<64x32xf32>
    %138 = arith.addf %6, %137 : vector<64x32xf32>
    %c3_101 = arith.constant 3 : index
    %c0_102 = arith.constant 0 : index
    %139 = vector.load %arg6[%c3_101, %c0_102] : memref<8x32xf32, #tpu.memory_space<vmem>>, vector<1x32xf32>
    %c9_i32_103 = arith.constant 9 : i32
    %140 = tpu.dynamic_rotate %138 by %c9_i32_103 dim 0 : vector<64x32xf32>, i32 -> vector<64x32xf32>
    %141 = arith.mulf %140, %8 : vector<64x32xf32>
    %c1_104 = arith.constant 1 : index
    %c0_105 = arith.constant 0 : index
    %c0_106 = arith.constant 0 : index
    %142 = vector.load %arg3[%c1_104, %c0_105, %c0_106] : memref<3x288x32xf32, #tpu.memory_space<vmem>>, vector<1x32x32xf32>
    %143 = vector.shape_cast %142 : vector<1x32x32xf32> to vector<32x32xf32>
    %cst_107 = arith.constant dense<0.000000e+00> : vector<64x32xf32>
    %144 = tpu.matmul %141, %143, %cst_107 {dimension_numbers = #tpu.dot_dimension_numbers<[1], [0], [0], [1], [0, 0, 1, 1], [], []>} : vector<64x32xf32>, vector<32x32xf32>, vector<64x32xf32> -> vector<64x32xf32>
    %c8_i32_108 = arith.constant 8 : i32
    %145 = tpu.dynamic_rotate %138 by %c8_i32_108 dim 0 : vector<64x32xf32>, i32 -> vector<64x32xf32>
    %146 = arith.mulf %145, %10 : vector<64x32xf32>
    %c1_109 = arith.constant 1 : index
    %c32_110 = arith.constant 32 : index
    %c0_111 = arith.constant 0 : index
    %147 = vector.load %arg3[%c1_109, %c32_110, %c0_111] : memref<3x288x32xf32, #tpu.memory_space<vmem>>, vector<1x32x32xf32>
    %148 = vector.shape_cast %147 : vector<1x32x32xf32> to vector<32x32xf32>
    %cst_112 = arith.constant dense<0.000000e+00> : vector<64x32xf32>
    %149 = tpu.matmul %146, %148, %cst_112 {dimension_numbers = #tpu.dot_dimension_numbers<[1], [0], [0], [1], [0, 0, 1, 1], [], []>} : vector<64x32xf32>, vector<32x32xf32>, vector<64x32xf32> -> vector<64x32xf32>
    %150 = arith.addf %144, %149 : vector<64x32xf32>
    %c7_i32_113 = arith.constant 7 : i32
    %151 = tpu.dynamic_rotate %138 by %c7_i32_113 dim 0 : vector<64x32xf32>, i32 -> vector<64x32xf32>
    %152 = arith.mulf %151, %12 : vector<64x32xf32>
    %c1_114 = arith.constant 1 : index
    %c64_115 = arith.constant 64 : index
    %c0_116 = arith.constant 0 : index
    %153 = vector.load %arg3[%c1_114, %c64_115, %c0_116] : memref<3x288x32xf32, #tpu.memory_space<vmem>>, vector<1x32x32xf32>
    %154 = vector.shape_cast %153 : vector<1x32x32xf32> to vector<32x32xf32>
    %cst_117 = arith.constant dense<0.000000e+00> : vector<64x32xf32>
    %155 = tpu.matmul %152, %154, %cst_117 {dimension_numbers = #tpu.dot_dimension_numbers<[1], [0], [0], [1], [0, 0, 1, 1], [], []>} : vector<64x32xf32>, vector<32x32xf32>, vector<64x32xf32> -> vector<64x32xf32>
    %156 = arith.addf %150, %155 : vector<64x32xf32>
    %c1_i32_118 = arith.constant 1 : i32
    %157 = tpu.dynamic_rotate %138 by %c1_i32_118 dim 0 : vector<64x32xf32>, i32 -> vector<64x32xf32>
    %158 = arith.mulf %157, %14 : vector<64x32xf32>
    %c1_119 = arith.constant 1 : index
    %c96_120 = arith.constant 96 : index
    %c0_121 = arith.constant 0 : index
    %159 = vector.load %arg3[%c1_119, %c96_120, %c0_121] : memref<3x288x32xf32, #tpu.memory_space<vmem>>, vector<1x32x32xf32>
    %160 = vector.shape_cast %159 : vector<1x32x32xf32> to vector<32x32xf32>
    %cst_122 = arith.constant dense<0.000000e+00> : vector<64x32xf32>
    %161 = tpu.matmul %158, %160, %cst_122 {dimension_numbers = #tpu.dot_dimension_numbers<[1], [0], [0], [1], [0, 0, 1, 1], [], []>} : vector<64x32xf32>, vector<32x32xf32>, vector<64x32xf32> -> vector<64x32xf32>
    %162 = arith.addf %156, %161 : vector<64x32xf32>
    %c1_123 = arith.constant 1 : index
    %c128_124 = arith.constant 128 : index
    %c0_125 = arith.constant 0 : index
    %163 = vector.load %arg3[%c1_123, %c128_124, %c0_125] : memref<3x288x32xf32, #tpu.memory_space<vmem>>, vector<1x32x32xf32>
    %164 = vector.shape_cast %163 : vector<1x32x32xf32> to vector<32x32xf32>
    %cst_126 = arith.constant dense<0.000000e+00> : vector<64x32xf32>
    %165 = tpu.matmul %138, %164, %cst_126 {dimension_numbers = #tpu.dot_dimension_numbers<[1], [0], [0], [1], [0, 0, 1, 1], [], []>} : vector<64x32xf32>, vector<32x32xf32>, vector<64x32xf32> -> vector<64x32xf32>
    %166 = arith.addf %162, %165 : vector<64x32xf32>
    %c63_i32_127 = arith.constant 63 : i32
    %167 = tpu.dynamic_rotate %138 by %c63_i32_127 dim 0 : vector<64x32xf32>, i32 -> vector<64x32xf32>
    %168 = arith.mulf %167, %16 : vector<64x32xf32>
    %c1_128 = arith.constant 1 : index
    %c160_129 = arith.constant 160 : index
    %c0_130 = arith.constant 0 : index
    %169 = vector.load %arg3[%c1_128, %c160_129, %c0_130] : memref<3x288x32xf32, #tpu.memory_space<vmem>>, vector<1x32x32xf32>
    %170 = vector.shape_cast %169 : vector<1x32x32xf32> to vector<32x32xf32>
    %cst_131 = arith.constant dense<0.000000e+00> : vector<64x32xf32>
    %171 = tpu.matmul %168, %170, %cst_131 {dimension_numbers = #tpu.dot_dimension_numbers<[1], [0], [0], [1], [0, 0, 1, 1], [], []>} : vector<64x32xf32>, vector<32x32xf32>, vector<64x32xf32> -> vector<64x32xf32>
    %172 = arith.addf %166, %171 : vector<64x32xf32>
    %c57_i32_132 = arith.constant 57 : i32
    %173 = tpu.dynamic_rotate %138 by %c57_i32_132 dim 0 : vector<64x32xf32>, i32 -> vector<64x32xf32>
    %174 = arith.mulf %173, %18 : vector<64x32xf32>
    %c1_133 = arith.constant 1 : index
    %c192_134 = arith.constant 192 : index
    %c0_135 = arith.constant 0 : index
    %175 = vector.load %arg3[%c1_133, %c192_134, %c0_135] : memref<3x288x32xf32, #tpu.memory_space<vmem>>, vector<1x32x32xf32>
    %176 = vector.shape_cast %175 : vector<1x32x32xf32> to vector<32x32xf32>
    %cst_136 = arith.constant dense<0.000000e+00> : vector<64x32xf32>
    %177 = tpu.matmul %174, %176, %cst_136 {dimension_numbers = #tpu.dot_dimension_numbers<[1], [0], [0], [1], [0, 0, 1, 1], [], []>} : vector<64x32xf32>, vector<32x32xf32>, vector<64x32xf32> -> vector<64x32xf32>
    %178 = arith.addf %172, %177 : vector<64x32xf32>
    %c56_i32_137 = arith.constant 56 : i32
    %179 = tpu.dynamic_rotate %138 by %c56_i32_137 dim 0 : vector<64x32xf32>, i32 -> vector<64x32xf32>
    %180 = arith.mulf %179, %20 : vector<64x32xf32>
    %c1_138 = arith.constant 1 : index
    %c224_139 = arith.constant 224 : index
    %c0_140 = arith.constant 0 : index
    %181 = vector.load %arg3[%c1_138, %c224_139, %c0_140] : memref<3x288x32xf32, #tpu.memory_space<vmem>>, vector<1x32x32xf32>
    %182 = vector.shape_cast %181 : vector<1x32x32xf32> to vector<32x32xf32>
    %cst_141 = arith.constant dense<0.000000e+00> : vector<64x32xf32>
    %183 = tpu.matmul %180, %182, %cst_141 {dimension_numbers = #tpu.dot_dimension_numbers<[1], [0], [0], [1], [0, 0, 1, 1], [], []>} : vector<64x32xf32>, vector<32x32xf32>, vector<64x32xf32> -> vector<64x32xf32>
    %184 = arith.addf %178, %183 : vector<64x32xf32>
    %c55_i32_142 = arith.constant 55 : i32
    %185 = tpu.dynamic_rotate %138 by %c55_i32_142 dim 0 : vector<64x32xf32>, i32 -> vector<64x32xf32>
    %186 = arith.mulf %185, %22 : vector<64x32xf32>
    %c1_143 = arith.constant 1 : index
    %c256_144 = arith.constant 256 : index
    %c0_145 = arith.constant 0 : index
    %187 = vector.load %arg3[%c1_143, %c256_144, %c0_145] : memref<3x288x32xf32, #tpu.memory_space<vmem>>, vector<1x32x32xf32>
    %188 = vector.shape_cast %187 : vector<1x32x32xf32> to vector<32x32xf32>
    %cst_146 = arith.constant dense<0.000000e+00> : vector<64x32xf32>
    %189 = tpu.matmul %186, %188, %cst_146 {dimension_numbers = #tpu.dot_dimension_numbers<[1], [0], [0], [1], [0, 0, 1, 1], [], []>} : vector<64x32xf32>, vector<32x32xf32>, vector<64x32xf32> -> vector<64x32xf32>
    %190 = arith.addf %184, %189 : vector<64x32xf32>
    %191 = vector.broadcast %139 : vector<1x32xf32> to vector<64x32xf32>
    %192 = arith.addf %190, %191 : vector<64x32xf32>
    %c1_147 = arith.constant 1 : index
    %193 = memref.load %arg8[%c1_147] : memref<3xf32, #tpu.memory_space<smem>>
    %cst_148 = arith.constant 0.000000e+00 : f32
    %194 = vector.broadcast %cst_148 : f32 to vector<64x32xf32>
    %195 = arith.cmpf ogt, %192, %194 : vector<64x32xf32>
    %196 = vector.broadcast %193 : f32 to vector<64x32xf32>
    %197 = arith.mulf %196, %192 : vector<64x32xf32>
    %198 = arith.select %195, %192, %197 : vector<64x32xi1>, vector<64x32xf32>
    %c4 = arith.constant 4 : index
    %c0_149 = arith.constant 0 : index
    %199 = vector.load %arg6[%c4, %c0_149] : memref<8x32xf32, #tpu.memory_space<vmem>>, vector<1x32xf32>
    %c9_i32_150 = arith.constant 9 : i32
    %200 = tpu.dynamic_rotate %198 by %c9_i32_150 dim 0 : vector<64x32xf32>, i32 -> vector<64x32xf32>
    %201 = arith.mulf %200, %8 : vector<64x32xf32>
    %c1_151 = arith.constant 1 : index
    %c0_152 = arith.constant 0 : index
    %c0_153 = arith.constant 0 : index
    %202 = vector.load %arg4[%c1_151, %c0_152, %c0_153] : memref<3x288x32xf32, #tpu.memory_space<vmem>>, vector<1x32x32xf32>
    %203 = vector.shape_cast %202 : vector<1x32x32xf32> to vector<32x32xf32>
    %cst_154 = arith.constant dense<0.000000e+00> : vector<64x32xf32>
    %204 = tpu.matmul %201, %203, %cst_154 {dimension_numbers = #tpu.dot_dimension_numbers<[1], [0], [0], [1], [0, 0, 1, 1], [], []>} : vector<64x32xf32>, vector<32x32xf32>, vector<64x32xf32> -> vector<64x32xf32>
    %c8_i32_155 = arith.constant 8 : i32
    %205 = tpu.dynamic_rotate %198 by %c8_i32_155 dim 0 : vector<64x32xf32>, i32 -> vector<64x32xf32>
    %206 = arith.mulf %205, %10 : vector<64x32xf32>
    %c1_156 = arith.constant 1 : index
    %c32_157 = arith.constant 32 : index
    %c0_158 = arith.constant 0 : index
    %207 = vector.load %arg4[%c1_156, %c32_157, %c0_158] : memref<3x288x32xf32, #tpu.memory_space<vmem>>, vector<1x32x32xf32>
    %208 = vector.shape_cast %207 : vector<1x32x32xf32> to vector<32x32xf32>
    %cst_159 = arith.constant dense<0.000000e+00> : vector<64x32xf32>
    %209 = tpu.matmul %206, %208, %cst_159 {dimension_numbers = #tpu.dot_dimension_numbers<[1], [0], [0], [1], [0, 0, 1, 1], [], []>} : vector<64x32xf32>, vector<32x32xf32>, vector<64x32xf32> -> vector<64x32xf32>
    %210 = arith.addf %204, %209 : vector<64x32xf32>
    %c7_i32_160 = arith.constant 7 : i32
    %211 = tpu.dynamic_rotate %198 by %c7_i32_160 dim 0 : vector<64x32xf32>, i32 -> vector<64x32xf32>
    %212 = arith.mulf %211, %12 : vector<64x32xf32>
    %c1_161 = arith.constant 1 : index
    %c64_162 = arith.constant 64 : index
    %c0_163 = arith.constant 0 : index
    %213 = vector.load %arg4[%c1_161, %c64_162, %c0_163] : memref<3x288x32xf32, #tpu.memory_space<vmem>>, vector<1x32x32xf32>
    %214 = vector.shape_cast %213 : vector<1x32x32xf32> to vector<32x32xf32>
    %cst_164 = arith.constant dense<0.000000e+00> : vector<64x32xf32>
    %215 = tpu.matmul %212, %214, %cst_164 {dimension_numbers = #tpu.dot_dimension_numbers<[1], [0], [0], [1], [0, 0, 1, 1], [], []>} : vector<64x32xf32>, vector<32x32xf32>, vector<64x32xf32> -> vector<64x32xf32>
    %216 = arith.addf %210, %215 : vector<64x32xf32>
    %c1_i32_165 = arith.constant 1 : i32
    %217 = tpu.dynamic_rotate %198 by %c1_i32_165 dim 0 : vector<64x32xf32>, i32 -> vector<64x32xf32>
    %218 = arith.mulf %217, %14 : vector<64x32xf32>
    %c1_166 = arith.constant 1 : index
    %c96_167 = arith.constant 96 : index
    %c0_168 = arith.constant 0 : index
    %219 = vector.load %arg4[%c1_166, %c96_167, %c0_168] : memref<3x288x32xf32, #tpu.memory_space<vmem>>, vector<1x32x32xf32>
    %220 = vector.shape_cast %219 : vector<1x32x32xf32> to vector<32x32xf32>
    %cst_169 = arith.constant dense<0.000000e+00> : vector<64x32xf32>
    %221 = tpu.matmul %218, %220, %cst_169 {dimension_numbers = #tpu.dot_dimension_numbers<[1], [0], [0], [1], [0, 0, 1, 1], [], []>} : vector<64x32xf32>, vector<32x32xf32>, vector<64x32xf32> -> vector<64x32xf32>
    %222 = arith.addf %216, %221 : vector<64x32xf32>
    %c1_170 = arith.constant 1 : index
    %c128_171 = arith.constant 128 : index
    %c0_172 = arith.constant 0 : index
    %223 = vector.load %arg4[%c1_170, %c128_171, %c0_172] : memref<3x288x32xf32, #tpu.memory_space<vmem>>, vector<1x32x32xf32>
    %224 = vector.shape_cast %223 : vector<1x32x32xf32> to vector<32x32xf32>
    %cst_173 = arith.constant dense<0.000000e+00> : vector<64x32xf32>
    %225 = tpu.matmul %198, %224, %cst_173 {dimension_numbers = #tpu.dot_dimension_numbers<[1], [0], [0], [1], [0, 0, 1, 1], [], []>} : vector<64x32xf32>, vector<32x32xf32>, vector<64x32xf32> -> vector<64x32xf32>
    %226 = arith.addf %222, %225 : vector<64x32xf32>
    %c63_i32_174 = arith.constant 63 : i32
    %227 = tpu.dynamic_rotate %198 by %c63_i32_174 dim 0 : vector<64x32xf32>, i32 -> vector<64x32xf32>
    %228 = arith.mulf %227, %16 : vector<64x32xf32>
    %c1_175 = arith.constant 1 : index
    %c160_176 = arith.constant 160 : index
    %c0_177 = arith.constant 0 : index
    %229 = vector.load %arg4[%c1_175, %c160_176, %c0_177] : memref<3x288x32xf32, #tpu.memory_space<vmem>>, vector<1x32x32xf32>
    %230 = vector.shape_cast %229 : vector<1x32x32xf32> to vector<32x32xf32>
    %cst_178 = arith.constant dense<0.000000e+00> : vector<64x32xf32>
    %231 = tpu.matmul %228, %230, %cst_178 {dimension_numbers = #tpu.dot_dimension_numbers<[1], [0], [0], [1], [0, 0, 1, 1], [], []>} : vector<64x32xf32>, vector<32x32xf32>, vector<64x32xf32> -> vector<64x32xf32>
    %232 = arith.addf %226, %231 : vector<64x32xf32>
    %c57_i32_179 = arith.constant 57 : i32
    %233 = tpu.dynamic_rotate %198 by %c57_i32_179 dim 0 : vector<64x32xf32>, i32 -> vector<64x32xf32>
    %234 = arith.mulf %233, %18 : vector<64x32xf32>
    %c1_180 = arith.constant 1 : index
    %c192_181 = arith.constant 192 : index
    %c0_182 = arith.constant 0 : index
    %235 = vector.load %arg4[%c1_180, %c192_181, %c0_182] : memref<3x288x32xf32, #tpu.memory_space<vmem>>, vector<1x32x32xf32>
    %236 = vector.shape_cast %235 : vector<1x32x32xf32> to vector<32x32xf32>
    %cst_183 = arith.constant dense<0.000000e+00> : vector<64x32xf32>
    %237 = tpu.matmul %234, %236, %cst_183 {dimension_numbers = #tpu.dot_dimension_numbers<[1], [0], [0], [1], [0, 0, 1, 1], [], []>} : vector<64x32xf32>, vector<32x32xf32>, vector<64x32xf32> -> vector<64x32xf32>
    %238 = arith.addf %232, %237 : vector<64x32xf32>
    %c56_i32_184 = arith.constant 56 : i32
    %239 = tpu.dynamic_rotate %198 by %c56_i32_184 dim 0 : vector<64x32xf32>, i32 -> vector<64x32xf32>
    %240 = arith.mulf %239, %20 : vector<64x32xf32>
    %c1_185 = arith.constant 1 : index
    %c224_186 = arith.constant 224 : index
    %c0_187 = arith.constant 0 : index
    %241 = vector.load %arg4[%c1_185, %c224_186, %c0_187] : memref<3x288x32xf32, #tpu.memory_space<vmem>>, vector<1x32x32xf32>
    %242 = vector.shape_cast %241 : vector<1x32x32xf32> to vector<32x32xf32>
    %cst_188 = arith.constant dense<0.000000e+00> : vector<64x32xf32>
    %243 = tpu.matmul %240, %242, %cst_188 {dimension_numbers = #tpu.dot_dimension_numbers<[1], [0], [0], [1], [0, 0, 1, 1], [], []>} : vector<64x32xf32>, vector<32x32xf32>, vector<64x32xf32> -> vector<64x32xf32>
    %244 = arith.addf %238, %243 : vector<64x32xf32>
    %c55_i32_189 = arith.constant 55 : i32
    %245 = tpu.dynamic_rotate %198 by %c55_i32_189 dim 0 : vector<64x32xf32>, i32 -> vector<64x32xf32>
    %246 = arith.mulf %245, %22 : vector<64x32xf32>
    %c1_190 = arith.constant 1 : index
    %c256_191 = arith.constant 256 : index
    %c0_192 = arith.constant 0 : index
    %247 = vector.load %arg4[%c1_190, %c256_191, %c0_192] : memref<3x288x32xf32, #tpu.memory_space<vmem>>, vector<1x32x32xf32>
    %248 = vector.shape_cast %247 : vector<1x32x32xf32> to vector<32x32xf32>
    %cst_193 = arith.constant dense<0.000000e+00> : vector<64x32xf32>
    %249 = tpu.matmul %246, %248, %cst_193 {dimension_numbers = #tpu.dot_dimension_numbers<[1], [0], [0], [1], [0, 0, 1, 1], [], []>} : vector<64x32xf32>, vector<32x32xf32>, vector<64x32xf32> -> vector<64x32xf32>
    %250 = arith.addf %244, %249 : vector<64x32xf32>
    %251 = vector.broadcast %199 : vector<1x32xf32> to vector<64x32xf32>
    %252 = arith.addf %250, %251 : vector<64x32xf32>
    %253 = arith.addf %138, %252 : vector<64x32xf32>
    %254 = arith.addf %138, %253 : vector<64x32xf32>
    %c5_194 = arith.constant 5 : index
    %c0_195 = arith.constant 0 : index
    %255 = vector.load %arg6[%c5_194, %c0_195] : memref<8x32xf32, #tpu.memory_space<vmem>>, vector<1x32xf32>
    %c9_i32_196 = arith.constant 9 : i32
    %256 = tpu.dynamic_rotate %254 by %c9_i32_196 dim 0 : vector<64x32xf32>, i32 -> vector<64x32xf32>
    %257 = arith.mulf %256, %8 : vector<64x32xf32>
    %c2_197 = arith.constant 2 : index
    %c0_198 = arith.constant 0 : index
    %c0_199 = arith.constant 0 : index
    %258 = vector.load %arg3[%c2_197, %c0_198, %c0_199] : memref<3x288x32xf32, #tpu.memory_space<vmem>>, vector<1x32x32xf32>
    %259 = vector.shape_cast %258 : vector<1x32x32xf32> to vector<32x32xf32>
    %cst_200 = arith.constant dense<0.000000e+00> : vector<64x32xf32>
    %260 = tpu.matmul %257, %259, %cst_200 {dimension_numbers = #tpu.dot_dimension_numbers<[1], [0], [0], [1], [0, 0, 1, 1], [], []>} : vector<64x32xf32>, vector<32x32xf32>, vector<64x32xf32> -> vector<64x32xf32>
    %c8_i32_201 = arith.constant 8 : i32
    %261 = tpu.dynamic_rotate %254 by %c8_i32_201 dim 0 : vector<64x32xf32>, i32 -> vector<64x32xf32>
    %262 = arith.mulf %261, %10 : vector<64x32xf32>
    %c2_202 = arith.constant 2 : index
    %c32_203 = arith.constant 32 : index
    %c0_204 = arith.constant 0 : index
    %263 = vector.load %arg3[%c2_202, %c32_203, %c0_204] : memref<3x288x32xf32, #tpu.memory_space<vmem>>, vector<1x32x32xf32>
    %264 = vector.shape_cast %263 : vector<1x32x32xf32> to vector<32x32xf32>
    %cst_205 = arith.constant dense<0.000000e+00> : vector<64x32xf32>
    %265 = tpu.matmul %262, %264, %cst_205 {dimension_numbers = #tpu.dot_dimension_numbers<[1], [0], [0], [1], [0, 0, 1, 1], [], []>} : vector<64x32xf32>, vector<32x32xf32>, vector<64x32xf32> -> vector<64x32xf32>
    %266 = arith.addf %260, %265 : vector<64x32xf32>
    %c7_i32_206 = arith.constant 7 : i32
    %267 = tpu.dynamic_rotate %254 by %c7_i32_206 dim 0 : vector<64x32xf32>, i32 -> vector<64x32xf32>
    %268 = arith.mulf %267, %12 : vector<64x32xf32>
    %c2_207 = arith.constant 2 : index
    %c64_208 = arith.constant 64 : index
    %c0_209 = arith.constant 0 : index
    %269 = vector.load %arg3[%c2_207, %c64_208, %c0_209] : memref<3x288x32xf32, #tpu.memory_space<vmem>>, vector<1x32x32xf32>
    %270 = vector.shape_cast %269 : vector<1x32x32xf32> to vector<32x32xf32>
    %cst_210 = arith.constant dense<0.000000e+00> : vector<64x32xf32>
    %271 = tpu.matmul %268, %270, %cst_210 {dimension_numbers = #tpu.dot_dimension_numbers<[1], [0], [0], [1], [0, 0, 1, 1], [], []>} : vector<64x32xf32>, vector<32x32xf32>, vector<64x32xf32> -> vector<64x32xf32>
    %272 = arith.addf %266, %271 : vector<64x32xf32>
    %c1_i32_211 = arith.constant 1 : i32
    %273 = tpu.dynamic_rotate %254 by %c1_i32_211 dim 0 : vector<64x32xf32>, i32 -> vector<64x32xf32>
    %274 = arith.mulf %273, %14 : vector<64x32xf32>
    %c2_212 = arith.constant 2 : index
    %c96_213 = arith.constant 96 : index
    %c0_214 = arith.constant 0 : index
    %275 = vector.load %arg3[%c2_212, %c96_213, %c0_214] : memref<3x288x32xf32, #tpu.memory_space<vmem>>, vector<1x32x32xf32>
    %276 = vector.shape_cast %275 : vector<1x32x32xf32> to vector<32x32xf32>
    %cst_215 = arith.constant dense<0.000000e+00> : vector<64x32xf32>
    %277 = tpu.matmul %274, %276, %cst_215 {dimension_numbers = #tpu.dot_dimension_numbers<[1], [0], [0], [1], [0, 0, 1, 1], [], []>} : vector<64x32xf32>, vector<32x32xf32>, vector<64x32xf32> -> vector<64x32xf32>
    %278 = arith.addf %272, %277 : vector<64x32xf32>
    %c2_216 = arith.constant 2 : index
    %c128_217 = arith.constant 128 : index
    %c0_218 = arith.constant 0 : index
    %279 = vector.load %arg3[%c2_216, %c128_217, %c0_218] : memref<3x288x32xf32, #tpu.memory_space<vmem>>, vector<1x32x32xf32>
    %280 = vector.shape_cast %279 : vector<1x32x32xf32> to vector<32x32xf32>
    %cst_219 = arith.constant dense<0.000000e+00> : vector<64x32xf32>
    %281 = tpu.matmul %254, %280, %cst_219 {dimension_numbers = #tpu.dot_dimension_numbers<[1], [0], [0], [1], [0, 0, 1, 1], [], []>} : vector<64x32xf32>, vector<32x32xf32>, vector<64x32xf32> -> vector<64x32xf32>
    %282 = arith.addf %278, %281 : vector<64x32xf32>
    %c63_i32_220 = arith.constant 63 : i32
    %283 = tpu.dynamic_rotate %254 by %c63_i32_220 dim 0 : vector<64x32xf32>, i32 -> vector<64x32xf32>
    %284 = arith.mulf %283, %16 : vector<64x32xf32>
    %c2_221 = arith.constant 2 : index
    %c160_222 = arith.constant 160 : index
    %c0_223 = arith.constant 0 : index
    %285 = vector.load %arg3[%c2_221, %c160_222, %c0_223] : memref<3x288x32xf32, #tpu.memory_space<vmem>>, vector<1x32x32xf32>
    %286 = vector.shape_cast %285 : vector<1x32x32xf32> to vector<32x32xf32>
    %cst_224 = arith.constant dense<0.000000e+00> : vector<64x32xf32>
    %287 = tpu.matmul %284, %286, %cst_224 {dimension_numbers = #tpu.dot_dimension_numbers<[1], [0], [0], [1], [0, 0, 1, 1], [], []>} : vector<64x32xf32>, vector<32x32xf32>, vector<64x32xf32> -> vector<64x32xf32>
    %288 = arith.addf %282, %287 : vector<64x32xf32>
    %c57_i32_225 = arith.constant 57 : i32
    %289 = tpu.dynamic_rotate %254 by %c57_i32_225 dim 0 : vector<64x32xf32>, i32 -> vector<64x32xf32>
    %290 = arith.mulf %289, %18 : vector<64x32xf32>
    %c2_226 = arith.constant 2 : index
    %c192_227 = arith.constant 192 : index
    %c0_228 = arith.constant 0 : index
    %291 = vector.load %arg3[%c2_226, %c192_227, %c0_228] : memref<3x288x32xf32, #tpu.memory_space<vmem>>, vector<1x32x32xf32>
    %292 = vector.shape_cast %291 : vector<1x32x32xf32> to vector<32x32xf32>
    %cst_229 = arith.constant dense<0.000000e+00> : vector<64x32xf32>
    %293 = tpu.matmul %290, %292, %cst_229 {dimension_numbers = #tpu.dot_dimension_numbers<[1], [0], [0], [1], [0, 0, 1, 1], [], []>} : vector<64x32xf32>, vector<32x32xf32>, vector<64x32xf32> -> vector<64x32xf32>
    %294 = arith.addf %288, %293 : vector<64x32xf32>
    %c56_i32_230 = arith.constant 56 : i32
    %295 = tpu.dynamic_rotate %254 by %c56_i32_230 dim 0 : vector<64x32xf32>, i32 -> vector<64x32xf32>
    %296 = arith.mulf %295, %20 : vector<64x32xf32>
    %c2_231 = arith.constant 2 : index
    %c224_232 = arith.constant 224 : index
    %c0_233 = arith.constant 0 : index
    %297 = vector.load %arg3[%c2_231, %c224_232, %c0_233] : memref<3x288x32xf32, #tpu.memory_space<vmem>>, vector<1x32x32xf32>
    %298 = vector.shape_cast %297 : vector<1x32x32xf32> to vector<32x32xf32>
    %cst_234 = arith.constant dense<0.000000e+00> : vector<64x32xf32>
    %299 = tpu.matmul %296, %298, %cst_234 {dimension_numbers = #tpu.dot_dimension_numbers<[1], [0], [0], [1], [0, 0, 1, 1], [], []>} : vector<64x32xf32>, vector<32x32xf32>, vector<64x32xf32> -> vector<64x32xf32>
    %300 = arith.addf %294, %299 : vector<64x32xf32>
    %c55_i32_235 = arith.constant 55 : i32
    %301 = tpu.dynamic_rotate %254 by %c55_i32_235 dim 0 : vector<64x32xf32>, i32 -> vector<64x32xf32>
    %302 = arith.mulf %301, %22 : vector<64x32xf32>
    %c2_236 = arith.constant 2 : index
    %c256_237 = arith.constant 256 : index
    %c0_238 = arith.constant 0 : index
    %303 = vector.load %arg3[%c2_236, %c256_237, %c0_238] : memref<3x288x32xf32, #tpu.memory_space<vmem>>, vector<1x32x32xf32>
    %304 = vector.shape_cast %303 : vector<1x32x32xf32> to vector<32x32xf32>
    %cst_239 = arith.constant dense<0.000000e+00> : vector<64x32xf32>
    %305 = tpu.matmul %302, %304, %cst_239 {dimension_numbers = #tpu.dot_dimension_numbers<[1], [0], [0], [1], [0, 0, 1, 1], [], []>} : vector<64x32xf32>, vector<32x32xf32>, vector<64x32xf32> -> vector<64x32xf32>
    %306 = arith.addf %300, %305 : vector<64x32xf32>
    %307 = vector.broadcast %255 : vector<1x32xf32> to vector<64x32xf32>
    %308 = arith.addf %306, %307 : vector<64x32xf32>
    %c2_240 = arith.constant 2 : index
    %309 = memref.load %arg8[%c2_240] : memref<3xf32, #tpu.memory_space<smem>>
    %cst_241 = arith.constant 0.000000e+00 : f32
    %310 = vector.broadcast %cst_241 : f32 to vector<64x32xf32>
    %311 = arith.cmpf ogt, %308, %310 : vector<64x32xf32>
    %312 = vector.broadcast %309 : f32 to vector<64x32xf32>
    %313 = arith.mulf %312, %308 : vector<64x32xf32>
    %314 = arith.select %311, %308, %313 : vector<64x32xi1>, vector<64x32xf32>
    %c6_242 = arith.constant 6 : index
    %c0_243 = arith.constant 0 : index
    %315 = vector.load %arg6[%c6_242, %c0_243] : memref<8x32xf32, #tpu.memory_space<vmem>>, vector<1x32xf32>
    %c9_i32_244 = arith.constant 9 : i32
    %316 = tpu.dynamic_rotate %314 by %c9_i32_244 dim 0 : vector<64x32xf32>, i32 -> vector<64x32xf32>
    %317 = arith.mulf %316, %8 : vector<64x32xf32>
    %c2_245 = arith.constant 2 : index
    %c0_246 = arith.constant 0 : index
    %c0_247 = arith.constant 0 : index
    %318 = vector.load %arg4[%c2_245, %c0_246, %c0_247] : memref<3x288x32xf32, #tpu.memory_space<vmem>>, vector<1x32x32xf32>
    %319 = vector.shape_cast %318 : vector<1x32x32xf32> to vector<32x32xf32>
    %cst_248 = arith.constant dense<0.000000e+00> : vector<64x32xf32>
    %320 = tpu.matmul %317, %319, %cst_248 {dimension_numbers = #tpu.dot_dimension_numbers<[1], [0], [0], [1], [0, 0, 1, 1], [], []>} : vector<64x32xf32>, vector<32x32xf32>, vector<64x32xf32> -> vector<64x32xf32>
    %c8_i32_249 = arith.constant 8 : i32
    %321 = tpu.dynamic_rotate %314 by %c8_i32_249 dim 0 : vector<64x32xf32>, i32 -> vector<64x32xf32>
    %322 = arith.mulf %321, %10 : vector<64x32xf32>
    %c2_250 = arith.constant 2 : index
    %c32_251 = arith.constant 32 : index
    %c0_252 = arith.constant 0 : index
    %323 = vector.load %arg4[%c2_250, %c32_251, %c0_252] : memref<3x288x32xf32, #tpu.memory_space<vmem>>, vector<1x32x32xf32>
    %324 = vector.shape_cast %323 : vector<1x32x32xf32> to vector<32x32xf32>
    %cst_253 = arith.constant dense<0.000000e+00> : vector<64x32xf32>
    %325 = tpu.matmul %322, %324, %cst_253 {dimension_numbers = #tpu.dot_dimension_numbers<[1], [0], [0], [1], [0, 0, 1, 1], [], []>} : vector<64x32xf32>, vector<32x32xf32>, vector<64x32xf32> -> vector<64x32xf32>
    %326 = arith.addf %320, %325 : vector<64x32xf32>
    %c7_i32_254 = arith.constant 7 : i32
    %327 = tpu.dynamic_rotate %314 by %c7_i32_254 dim 0 : vector<64x32xf32>, i32 -> vector<64x32xf32>
    %328 = arith.mulf %327, %12 : vector<64x32xf32>
    %c2_255 = arith.constant 2 : index
    %c64_256 = arith.constant 64 : index
    %c0_257 = arith.constant 0 : index
    %329 = vector.load %arg4[%c2_255, %c64_256, %c0_257] : memref<3x288x32xf32, #tpu.memory_space<vmem>>, vector<1x32x32xf32>
    %330 = vector.shape_cast %329 : vector<1x32x32xf32> to vector<32x32xf32>
    %cst_258 = arith.constant dense<0.000000e+00> : vector<64x32xf32>
    %331 = tpu.matmul %328, %330, %cst_258 {dimension_numbers = #tpu.dot_dimension_numbers<[1], [0], [0], [1], [0, 0, 1, 1], [], []>} : vector<64x32xf32>, vector<32x32xf32>, vector<64x32xf32> -> vector<64x32xf32>
    %332 = arith.addf %326, %331 : vector<64x32xf32>
    %c1_i32_259 = arith.constant 1 : i32
    %333 = tpu.dynamic_rotate %314 by %c1_i32_259 dim 0 : vector<64x32xf32>, i32 -> vector<64x32xf32>
    %334 = arith.mulf %333, %14 : vector<64x32xf32>
    %c2_260 = arith.constant 2 : index
    %c96_261 = arith.constant 96 : index
    %c0_262 = arith.constant 0 : index
    %335 = vector.load %arg4[%c2_260, %c96_261, %c0_262] : memref<3x288x32xf32, #tpu.memory_space<vmem>>, vector<1x32x32xf32>
    %336 = vector.shape_cast %335 : vector<1x32x32xf32> to vector<32x32xf32>
    %cst_263 = arith.constant dense<0.000000e+00> : vector<64x32xf32>
    %337 = tpu.matmul %334, %336, %cst_263 {dimension_numbers = #tpu.dot_dimension_numbers<[1], [0], [0], [1], [0, 0, 1, 1], [], []>} : vector<64x32xf32>, vector<32x32xf32>, vector<64x32xf32> -> vector<64x32xf32>
    %338 = arith.addf %332, %337 : vector<64x32xf32>
    %c2_264 = arith.constant 2 : index
    %c128_265 = arith.constant 128 : index
    %c0_266 = arith.constant 0 : index
    %339 = vector.load %arg4[%c2_264, %c128_265, %c0_266] : memref<3x288x32xf32, #tpu.memory_space<vmem>>, vector<1x32x32xf32>
    %340 = vector.shape_cast %339 : vector<1x32x32xf32> to vector<32x32xf32>
    %cst_267 = arith.constant dense<0.000000e+00> : vector<64x32xf32>
    %341 = tpu.matmul %314, %340, %cst_267 {dimension_numbers = #tpu.dot_dimension_numbers<[1], [0], [0], [1], [0, 0, 1, 1], [], []>} : vector<64x32xf32>, vector<32x32xf32>, vector<64x32xf32> -> vector<64x32xf32>
    %342 = arith.addf %338, %341 : vector<64x32xf32>
    %c63_i32_268 = arith.constant 63 : i32
    %343 = tpu.dynamic_rotate %314 by %c63_i32_268 dim 0 : vector<64x32xf32>, i32 -> vector<64x32xf32>
    %344 = arith.mulf %343, %16 : vector<64x32xf32>
    %c2_269 = arith.constant 2 : index
    %c160_270 = arith.constant 160 : index
    %c0_271 = arith.constant 0 : index
    %345 = vector.load %arg4[%c2_269, %c160_270, %c0_271] : memref<3x288x32xf32, #tpu.memory_space<vmem>>, vector<1x32x32xf32>
    %346 = vector.shape_cast %345 : vector<1x32x32xf32> to vector<32x32xf32>
    %cst_272 = arith.constant dense<0.000000e+00> : vector<64x32xf32>
    %347 = tpu.matmul %344, %346, %cst_272 {dimension_numbers = #tpu.dot_dimension_numbers<[1], [0], [0], [1], [0, 0, 1, 1], [], []>} : vector<64x32xf32>, vector<32x32xf32>, vector<64x32xf32> -> vector<64x32xf32>
    %348 = arith.addf %342, %347 : vector<64x32xf32>
    %c57_i32_273 = arith.constant 57 : i32
    %349 = tpu.dynamic_rotate %314 by %c57_i32_273 dim 0 : vector<64x32xf32>, i32 -> vector<64x32xf32>
    %350 = arith.mulf %349, %18 : vector<64x32xf32>
    %c2_274 = arith.constant 2 : index
    %c192_275 = arith.constant 192 : index
    %c0_276 = arith.constant 0 : index
    %351 = vector.load %arg4[%c2_274, %c192_275, %c0_276] : memref<3x288x32xf32, #tpu.memory_space<vmem>>, vector<1x32x32xf32>
    %352 = vector.shape_cast %351 : vector<1x32x32xf32> to vector<32x32xf32>
    %cst_277 = arith.constant dense<0.000000e+00> : vector<64x32xf32>
    %353 = tpu.matmul %350, %352, %cst_277 {dimension_numbers = #tpu.dot_dimension_numbers<[1], [0], [0], [1], [0, 0, 1, 1], [], []>} : vector<64x32xf32>, vector<32x32xf32>, vector<64x32xf32> -> vector<64x32xf32>
    %354 = arith.addf %348, %353 : vector<64x32xf32>
    %c56_i32_278 = arith.constant 56 : i32
    %355 = tpu.dynamic_rotate %314 by %c56_i32_278 dim 0 : vector<64x32xf32>, i32 -> vector<64x32xf32>
    %356 = arith.mulf %355, %20 : vector<64x32xf32>
    %c2_279 = arith.constant 2 : index
    %c224_280 = arith.constant 224 : index
    %c0_281 = arith.constant 0 : index
    %357 = vector.load %arg4[%c2_279, %c224_280, %c0_281] : memref<3x288x32xf32, #tpu.memory_space<vmem>>, vector<1x32x32xf32>
    %358 = vector.shape_cast %357 : vector<1x32x32xf32> to vector<32x32xf32>
    %cst_282 = arith.constant dense<0.000000e+00> : vector<64x32xf32>
    %359 = tpu.matmul %356, %358, %cst_282 {dimension_numbers = #tpu.dot_dimension_numbers<[1], [0], [0], [1], [0, 0, 1, 1], [], []>} : vector<64x32xf32>, vector<32x32xf32>, vector<64x32xf32> -> vector<64x32xf32>
    %360 = arith.addf %354, %359 : vector<64x32xf32>
    %c55_i32_283 = arith.constant 55 : i32
    %361 = tpu.dynamic_rotate %314 by %c55_i32_283 dim 0 : vector<64x32xf32>, i32 -> vector<64x32xf32>
    %362 = arith.mulf %361, %22 : vector<64x32xf32>
    %c2_284 = arith.constant 2 : index
    %c256_285 = arith.constant 256 : index
    %c0_286 = arith.constant 0 : index
    %363 = vector.load %arg4[%c2_284, %c256_285, %c0_286] : memref<3x288x32xf32, #tpu.memory_space<vmem>>, vector<1x32x32xf32>
    %364 = vector.shape_cast %363 : vector<1x32x32xf32> to vector<32x32xf32>
    %cst_287 = arith.constant dense<0.000000e+00> : vector<64x32xf32>
    %365 = tpu.matmul %362, %364, %cst_287 {dimension_numbers = #tpu.dot_dimension_numbers<[1], [0], [0], [1], [0, 0, 1, 1], [], []>} : vector<64x32xf32>, vector<32x32xf32>, vector<64x32xf32> -> vector<64x32xf32>
    %366 = arith.addf %360, %365 : vector<64x32xf32>
    %367 = vector.broadcast %315 : vector<1x32xf32> to vector<64x32xf32>
    %368 = arith.addf %366, %367 : vector<64x32xf32>
    %369 = arith.addf %254, %368 : vector<64x32xf32>
    %c0_288 = arith.constant 0 : index
    %c0_289 = arith.constant 0 : index
    %370 = vector.load %arg5[%c0_288, %c0_289] : memref<128x32xf32, #tpu.memory_space<vmem>>, vector<32x32xf32>
    %cst_290 = arith.constant dense<0.000000e+00> : vector<64x32xf32>
    %371 = tpu.matmul %6, %370, %cst_290 {dimension_numbers = #tpu.dot_dimension_numbers<[1], [0], [0], [1], [0, 0, 1, 1], [], []>} : vector<64x32xf32>, vector<32x32xf32>, vector<64x32xf32> -> vector<64x32xf32>
    %c32_291 = arith.constant 32 : index
    %c0_292 = arith.constant 0 : index
    %372 = vector.load %arg5[%c32_291, %c0_292] : memref<128x32xf32, #tpu.memory_space<vmem>>, vector<32x32xf32>
    %cst_293 = arith.constant dense<0.000000e+00> : vector<64x32xf32>
    %373 = tpu.matmul %137, %372, %cst_293 {dimension_numbers = #tpu.dot_dimension_numbers<[1], [0], [0], [1], [0, 0, 1, 1], [], []>} : vector<64x32xf32>, vector<32x32xf32>, vector<64x32xf32> -> vector<64x32xf32>
    %374 = arith.addf %371, %373 : vector<64x32xf32>
    %c64_294 = arith.constant 64 : index
    %c0_295 = arith.constant 0 : index
    %375 = vector.load %arg5[%c64_294, %c0_295] : memref<128x32xf32, #tpu.memory_space<vmem>>, vector<32x32xf32>
    %cst_296 = arith.constant dense<0.000000e+00> : vector<64x32xf32>
    %376 = tpu.matmul %253, %375, %cst_296 {dimension_numbers = #tpu.dot_dimension_numbers<[1], [0], [0], [1], [0, 0, 1, 1], [], []>} : vector<64x32xf32>, vector<32x32xf32>, vector<64x32xf32> -> vector<64x32xf32>
    %377 = arith.addf %374, %376 : vector<64x32xf32>
    %c96_297 = arith.constant 96 : index
    %c0_298 = arith.constant 0 : index
    %378 = vector.load %arg5[%c96_297, %c0_298] : memref<128x32xf32, #tpu.memory_space<vmem>>, vector<32x32xf32>
    %cst_299 = arith.constant dense<0.000000e+00> : vector<64x32xf32>
    %379 = tpu.matmul %369, %378, %cst_299 {dimension_numbers = #tpu.dot_dimension_numbers<[1], [0], [0], [1], [0, 0, 1, 1], [], []>} : vector<64x32xf32>, vector<32x32xf32>, vector<64x32xf32> -> vector<64x32xf32>
    %380 = arith.addf %377, %379 : vector<64x32xf32>
    %c7_300 = arith.constant 7 : index
    %c0_301 = arith.constant 0 : index
    %381 = vector.load %arg6[%c7_300, %c0_301] : memref<8x32xf32, #tpu.memory_space<vmem>>, vector<1x32xf32>
    %382 = vector.broadcast %381 : vector<1x32xf32> to vector<64x32xf32>
    %383 = arith.addf %380, %382 : vector<64x32xf32>
    %c0_302 = arith.constant 0 : index
    %c0_303 = arith.constant 0 : index
    %c0_304 = arith.constant 0 : index
    %384 = vector.load %arg9[%c0_302, %c0_303, %c0_304] : memref<1x64x32xf32, #tpu.memory_space<vmem>>, vector<1x64x32xf32>
    %385 = vector.shape_cast %384 : vector<1x64x32xf32> to vector<64x32xf32>
    %386 = vector.shape_cast %383 : vector<64x32xf32> to vector<1x64x32xf32>
    tpu.vector_store %arg9[%c0_302, %c0_303, %c0_304], %386 {strides = array<i32>} : memref<1x64x32xf32, #tpu.memory_space<vmem>>, vector<1x64x32xf32>,
    return
  }
  func.func @transform_0(%arg0: i32) -> (i32, i32, i32) {
    %c0_i32 = arith.constant 0 : i32
    %c0_i32_0 = arith.constant 0 : i32
    %c0_i32_1 = arith.constant 0 : i32
    return %arg0, %c0_i32, %c0_i32_0 : i32, i32, i32
  }
  func.func @transform_1(%arg0: i32) -> (i32, i32) {
    %c0_i32 = arith.constant 0 : i32
    %c0_i32_0 = arith.constant 0 : i32
    %c0_i32_1 = arith.constant 0 : i32
    return %c0_i32, %c0_i32_0 : i32, i32
  }
  func.func @transform_2(%arg0: i32) -> (i32, i32, i32) {
    %c0_i32 = arith.constant 0 : i32
    %c0_i32_0 = arith.constant 0 : i32
    %c0_i32_1 = arith.constant 0 : i32
    %c0_i32_2 = arith.constant 0 : i32
    return %c0_i32, %c0_i32_0, %c0_i32_1 : i32, i32, i32
  }
  func.func @transform_3(%arg0: i32) -> (i32, i32, i32) {
    %c0_i32 = arith.constant 0 : i32
    %c0_i32_0 = arith.constant 0 : i32
    %c0_i32_1 = arith.constant 0 : i32
    %c0_i32_2 = arith.constant 0 : i32
    return %c0_i32, %c0_i32_0, %c0_i32_1 : i32, i32, i32
  }
  func.func @transform_4(%arg0: i32) -> (i32, i32) {
    %c0_i32 = arith.constant 0 : i32
    %c0_i32_0 = arith.constant 0 : i32
    %c0_i32_1 = arith.constant 0 : i32
    return %c0_i32, %c0_i32_0 : i32, i32
  }
  func.func @transform_5(%arg0: i32) -> (i32, i32) {
    %c0_i32 = arith.constant 0 : i32
    %c0_i32_0 = arith.constant 0 : i32
    %c0_i32_1 = arith.constant 0 : i32
    return %c0_i32, %c0_i32_0 : i32, i32
  }
  func.func @transform_6(%arg0: i32) -> (i32, i32, i32) {
    %c0_i32 = arith.constant 0 : i32
    %c0_i32_0 = arith.constant 0 : i32
    %c0_i32_1 = arith.constant 0 : i32
    %c0_i32_2 = arith.constant 0 : i32
    return %c0_i32, %c0_i32_0, %c0_i32_1 : i32, i32, i32
  }
  func.func @transform_7(%arg0: i32) -> i32 {
    %c0_i32 = arith.constant 0 : i32
    %c0_i32_0 = arith.constant 0 : i32
    return %c0_i32 : i32
  }
  func.func @transform_8(%arg0: i32) -> (i32, i32, i32) {
    %c0_i32 = arith.constant 0 : i32
    %c0_i32_0 = arith.constant 0 : i32
    %c0_i32_1 = arith.constant 0 : i32
    return %arg0, %c0_i32, %c0_i32_0 : i32, i32, i32
  }
}

</mosaic_0001>

<bundles_post_ra>
// kernel: downsample_forward.1
= control target key start
LH: loop header
LB: loop body
LE: loop exit
PB: predicated region body
PF: predicated region fallthrough
CT: control target
= control target key end

     0   :  { %13 = vsyncpa [#allocation4], 0  ;;  %s17122_s0 = inlined_call_operand.vmem [shape: f32[2,64,144], index: 0, kind: input, shape index: {}]   ;;  %s17123_s1 = inlined_call_operand.vmem [shape: f32[144,32], index: 1, kind: input, shape index: {}]   ;;  %s17124_s2 = inlined_call_operand.vmem [shape: f32[3,288,32], index: 2, kind: input, shape index: {}]   ;;  %s17125_s3 = inlined_call_operand.vmem [shape: f32[3,288,32], index: 3, kind: input, shape index: {}]   ;;  %s17126_s4 = inlined_call_operand.vmem [shape: f32[128,32], index: 4, kind: input, shape index: {}]   ;;  %s17127_s5 = inlined_call_operand.vmem [shape: f32[8,32], index: 5, kind: input, shape index: {}]   ;;  %s17128_s6 = inlined_call_operand.vmem [shape: f32[9,64,32], index: 6, kind: input, shape index: {}]   ;;  %s17129_s7 = inlined_call_operand.vmem [shape: f32[3], index: 7, kind: input, shape index: {}]   ;;  %s17130_s8 = inlined_call_operand.hbm [shape: f32[2,64,32], index: 8, kind: output, shape index: {}]  }
   0x1   :  { %14 = vsyncpa [#allocation3], 0 }
   0x2   :  { %16 = vsyncpa [#allocation3 + $0x1], 0  ;;  %s13257_s27 = smov 0   ;;  %s13259_s28 = smov 0  }
   0x3   :  { %s13261_s29 = smov 0   ;;  %s13263_s30 = smov 0  }
   0x4 LB: > { %s13278_s9 = sadd.s32 4294967295, %s13205_s30   ;;  %s9490_s10 = sadd.s32 4294967294, %s13205_s30   ;;  %s13205_s30 = sphi %s13263_s30, %s17490_s30   ;;  %s13201_s29 = sphi %s13261_s29, %s17489_s29   ;;  %s13197_s28 = sphi %s13259_s28, %s17488_s28   ;;  %s13193_s27 = sphi %s13257_s27, %s17487_s27  }
   0x5   : > { %s13282_s11 = sadd.s32 1, %s13205_s30   ;;  %s202_s12 = sadd.s32 1, %s13201_s29 }
   0x6   : > { %s199_s13 = ssub.s32 %s13205_s30, %s13282_s11  ;;  %p212_p0 = scmp.ne.s32.totalorder %s13201_s29, %s13197_s28 }
   0x7   : > { %p200_p1 = scmp.eq.s32.totalorder %s199_s13, 0  ;;  %p213_p2 = scmp.eq.s32.totalorder %s13278_s9, 1 }
   0x8   : > { %p218_p3 = scmp.ne.s32.totalorder %s13197_s28, %s13193_s27  ;;  %p219_p4 = scmp.eq.s32.totalorder %s9490_s10, 1 }
   0x9   : > { %s13293_s14 = scalar_select %p200_p1, %s13201_s29, %s202_s12  }
   0xa   : > { %p13295_p5 = por %p213_p2, %p212_p0  ;;  %p13299_p6 = por %p219_p4, %p218_p3 }
   0xb   : > { %p9491_p7 = scmp.ge.s32.totalorder %s13205_s30, 1  ;;  %p226_p8 = scmp.lt.s32.totalorder %s13205_s30, 3 }
   0xc   : > { %p12957_p9 = scmp.eq.s32.totalorder %s13278_s9, 0  ;;  %s257_s20 = sshll.u32 %s17129_s7, 4  ;;  %s258_s20 = int_to_ptr.vmem [resolvable:$true] %s257_s20 }
   0xd   : > { %p13306_p10 = pnand %p9491_p7, %p226_p8  ;;  %s13124_s21 = scalar_lea.vmem %s258_s20, 16 }
   0xe   : > { %p13125_p13 = scmp.ne.s32.totalorder %s258_s20, %s13124_s21  ;;  %p13132_p3 = scmp.lt.s32.totalorder %s258_s20, %s258_s20 }
   0xf   : > { %p12949_p11 = pneg %p13306_p10  ;;  %p13133_p4 = scmp.lt.s32.totalorder %s13124_s21, %s13124_s21 }
  0x11   : > { %p12950_p12 = pnand %p12957_p9, %p12949_p11  ;;  %p13134_p7 = por %p13133_p4, %p13132_p3 }
  0x13   : > { %p13126_p0 = pneg %p12950_p12 }
  0x15   : > { %p13127_p1 = pnand %p13126_p0, %p13125_p13 }
  0x17   : > { %p13128_p2 = pneg %p13127_p1 }
  0x19   : > { %p13135_p8 = pnand %p13134_p7, %p13128_p2 }
  0x1b   : > { %13138 = shalt.err (!%p13135_p8)
}
  0x1c   : > { %s13207_s22 = smov [#allocation2]   ;;  %278 = sbr.rel (%p13306_p10) target bundleno = 2711 (0xa97), region = 52 }
  0x1d   : > { %12952 = dma.vmem_to_smem (!%p12950_p12), %s258_s20, 16, %s13207_s22, [#allocation4]  }
  0x23   : > { %13184 = dma.done.wait (%p12957_p9), [#allocation4], 16  }
  0x24   : > { %13186 = vsyncadd (%p12957_p9), [#allocation4], 4294967280 }
  0x25   : > { %284 = sfence }
  0x26   : > { %v334_v0 = vld [vmem:[%s17123_s1] sm:$0xff]  ;;  %v335_v1 = vld [vmem:[%s17123_s1 + $0x8] sm:$0xff]  ;;  %v336_v2 = vld [vmem:[%s17123_s1 + $0x10] sm:$0xff]  ;;  %p313_p10 = scmp.lt.s32.totalorder %s13278_s9, 1  ;;  %v13208_v3 = vmov 0.0|0.0   ;;  %vm357_vm0 = vcmask 130048  }
  0x27   : > { %12044 = vmatprep.subr.bf16.mxu0 %v13208_v3  ;;  %v12045_v4 = vpack.c.bf16 %v335_v1, %v334_v0  ;;  %v337_v5 = vld [vmem:[%s17123_s1 + $0x18] sm:$0xff]  ;;  %v338_v7 = vld [vmem:[%s17123_s1 + $0x20] sm:$0xff]  ;;  %v339_v8 = vld [vmem:[%s17123_s1 + $0x28] sm:$0xff]  ;;  %vm602_vm1 = vcmask 261120   ;;  %s1925_s20 = sld [smem:[#allocation2]]  ;;  %s10038_s25 = sld [smem:[#allocation2 + $0x2]] }
  0x28   : > { %s314_s18 = scalar_select %p313_p10, %s13278_s9, 1  ;;  %v12048_v6 = vpack.c.bf16 %v337_v5, %v336_v2  ;;  %v12051_v10 = vpack.c.bf16 %v339_v8, %v338_v7  ;;  %v340_v11 = vld [vmem:[%s17123_s1 + $0x30] sm:$0xff]  ;;  %v341_v12 = vld [vmem:[%s17123_s1 + $0x38] sm:$0xff]  ;;  %v342_v14 = vld [vmem:[%s17123_s1 + $0x40] sm:$0xff] }
  0x29   : > { %12046 = vmatpush1.bf16.msra.mxu0 %v12045_v4  ;;  %v12054_v13 = vpack.c.bf16 %v341_v12, %v340_v11  ;;  %v343_v15 = vld [vmem:[%s17123_s1 + $0x48] sm:$0xff]  ;;  %v344_v17 = vld [vmem:[%s17123_s1 + $0x50] sm:$0xff]  ;;  %v345_v18 = vld [vmem:[%s17123_s1 + $0x58] sm:$0xff]  ;;  %s310_s21 = sand.u32 1, %s13197_s28   ;;  %s13209_s19 = smov [#allocation5]  }
  0x2a   : > { %12047 = vmatprep.subr.bf16.mxu0 %v13208_v3  ;;  %s10186_s23 = sshll.u32 %s314_s18, 7  ;;  %v12057_v16 = vpack.c.bf16 %v343_v15, %v342_v14  ;;  %v12060_v19 = vpack.c.bf16 %v345_v18, %v344_v17  ;;  %v346_v20 = vld [vmem:[%s17123_s1 + $0x60] sm:$0xff]  ;;  %v347_v21 = vld [vmem:[%s17123_s1 + $0x68] sm:$0xff]  ;;  %v348_v23 = vld [vmem:[%s17123_s1 + $0x70] sm:$0xff] }
  0x2b   : > { %s13346_s26 = scalar_lea.vmem %s17122_s0, %s10186_s23  ;;  %v12063_v22 = vpack.c.bf16 %v347_v21, %v346_v20  ;;  %v349_v24 = vld [vmem:[%s17123_s1 + $0x78] sm:$0xff]  ;;  %v350_v26 = vld [vmem:[%s17123_s1 + $0x80] sm:$0xff]  ;;  %v351_v27 = vld [vmem:[%s17123_s1 + $0x88] sm:$0xff]  ;;  %v567_v21 = vlaneseq  ;;  %s9819_s23 = sld [smem:[#allocation2 + $0x1]] }
  0x2c   : > { %v319_v9 = vld [vmem:[%s13346_s26 + $0x8] sm:$0xff]  ;;  %v12066_v25 = vpack.c.bf16 %v349_v24, %v348_v23  ;;  %v12069_v28 = vpack.c.bf16 %v351_v27, %v350_v26  ;;  %v318_v29 = vld [vmem:[%s13346_s26] sm:$0xff]  ;;  %v321_v30 = vld [vmem:[%s13346_s26 + $0x18] sm:$0xff] }
  0x2d   : > { %12049 = vmatpush1.bf16.msra.mxu0 %v12048_v6  ;;  %9500 = vmatprep.mubr.msk.f32.mxu0 %vm357_vm0, %v319_v9  ;;  %v320_v31 = vld [vmem:[%s13346_s26 + $0x10] sm:$0xff]  ;;  %v323_v32 = vld [vmem:[%s13346_s26 + $0x28] sm:$0xff]  ;;  %v322_v33 = vld [vmem:[%s13346_s26 + $0x20] sm:$0xff] }
  0x2e   : > { %12050 = vmatprep.subr.bf16.mxu0 %v13208_v3  ;;  %v325_v34 = vld [vmem:[%s13346_s26 + $0x38] sm:$0xff]  ;;  %v324_v35 = vld [vmem:[%s13346_s26 + $0x30] sm:$0xff]  ;;  %v327_v36 = vld [vmem:[%s13346_s26 + $0x48] sm:$0xff] }
  0x2f   : > { %v326_v37 = vld [vmem:[%s13346_s26 + $0x40] sm:$0xff]  ;;  %v329_v38 = vld [vmem:[%s13346_s26 + $0x58] sm:$0xff]  ;;  %v328_v39 = vld [vmem:[%s13346_s26 + $0x50] sm:$0xff] }
  0x30   : > { %v331_v40 = vld [vmem:[%s13346_s26 + $0x68] sm:$0xff]  ;;  %v330_v41 = vld [vmem:[%s13346_s26 + $0x60] sm:$0xff]  ;;  %v333_v42 = vld [vmem:[%s13346_s26 + $0x78] sm:$0xff] }
  0x31   : > { %12052 = vmatpush1.bf16.msra.mxu0 %v12051_v10  ;;  %v332_v43 = vld [vmem:[%s13346_s26 + $0x70] sm:$0xff]  ;;  %v598_v44 = vld [vmem:[%s17124_s2 + $0x20] sm:$0xff]  ;;  %v599_v45 = vld [vmem:[%s17124_s2 + $0x28] sm:$0xff]  ;;  %s9496_s26 = sshll.u32 %s310_s21, 6 }
  0x32   : > { %12053 = vmatprep.subr.bf16.mxu0 %v13208_v3  ;;  %v12071_v46 = vpack.c.bf16 %v599_v45, %v598_v44  ;;  %v600_v47 = vld [vmem:[%s17124_s2 + $0x30] sm:$0xff]  ;;  %v601_v48 = vld [vmem:[%s17124_s2 + $0x38] sm:$0xff]  ;;  %v586_v50 = vld [vmem:[%s17124_s2] sm:$0xff]  ;;  %s312_s24 = scalar_lea.vmem [#allocation5], %s9496_s26 }
  0x33   : > { %v12075_v49 = vpack.c.bf16 %v601_v48, %v600_v47  ;;  %v587_v51 = vld [vmem:[%s17124_s2 + $0x8] sm:$0xff]  ;;  %v9499_v2 = vld [vmem:[%s17127_s5] ss:$0 sm:$0xff]  ;;  %v588_v11 = vld [vmem:[%s17124_s2 + $0x10] sm:$0xff]  ;;  %s9416_s10 = sshll.u32 %s312_s24, 4  ;;  %s17075_s10 = int_to_ptr.vmem [resolvable:$true] %s9416_s10 }
  0x34   : > { %12072 = vmatprep.subr.bf16.mxu1 %v12071_v46  ;;  %v12079_v52 = vpack.c.bf16 %v587_v51, %v586_v50  ;;  %v13434_v6 = vld [vmem:[%s17128_s6 + $0x40] sm:$0xff]  ;;  %v13443_v10 = vld [vmem:[%s17128_s6 + $0x48] sm:$0xff]  ;;  %v589_v12 = vld [vmem:[%s17124_s2 + $0x18] sm:$0xff]  ;;  %s13139_s18 = scalar_lea.vmem %s17075_s10, 1024 }
  0x35   : > { %12055 = vmatpush1.bf16.msra.mxu0 %v12054_v13  ;;  %12074 = vmatpush3.bf16.msra.mxu1 %v12071_v46  ;;  %v13454_v13 = vld [vmem:[%s17128_s6 + $0x50] sm:$0xff]  ;;  %v12083_v17 = vpack.c.bf16 %v589_v12, %v588_v11  ;;  %v13470_v20 = vld [vmem:[%s17128_s6 + $0x58] sm:$0xff]  ;;  %v887_v23 = vld [vmem:[%s17124_s2 + $0x48] sm:$0xff]  ;;  %p13140_p9 = scmp.ne.s32.totalorder %s17075_s10, %s13139_s18 }
  0x36   : > { %12056 = vmatprep.subr.bf16.mxu0 %v13208_v3  ;;  %12076 = vmatprep.subr.bf16.mxu1 %v12075_v49  ;;  %v13482_v24 = vld [vmem:[%s17128_s6 + $0x60] sm:$0xff]  ;;  %v13545_v46 = vld [vmem:[%s17128_s6 + $0x8] sm:$0xff]  ;;  %v888_v48 = vld [vmem:[%s17124_s2 + $0x50] sm:$0xff] }
  0x37   : > { %v13558_v50 = vld [vmem:[%s17128_s6 + $0x10] sm:$0xff]  ;;  %v13611_v11 = vld [vmem:[%s17128_s6 + $0x28] sm:$0xff]  ;;  %p13141_p11 = pnand %p13140_p9, %p13295_p5 }
  0x39   : > { %12058 = vmatpush1.bf16.msra.mxu0 %v12057_v16  ;;  %12078 = vmatpush3.bf16.msra.mxu1 %v12075_v49  ;;  %v889_v49 = vld [vmem:[%s17124_s2 + $0x58] sm:$0xff]  ;;  %p13142_p12 = pneg %p13141_p11 }
  0x3a   : > { %12059 = vmatprep.subr.bf16.mxu0 %v13208_v3  ;;  %12080 = vmatprep.subr.bf16.mxu1 %v12079_v52 }
  0x3d   : > { %12061 = vmatpush1.bf16.msra.mxu0 %v12060_v19 }
  0x3e   : > { %12062 = vmatprep.subr.bf16.mxu0 %v13208_v3 }
  0x41   : > { %12064 = vmatpush1.bf16.msra.mxu0 %v12063_v22  ;;  %v886_v22 = vld [vmem:[%s17124_s2 + $0x40] sm:$0xff] }
  0x42   : > { %12065 = vmatprep.subr.bf16.mxu0 %v13208_v3 }
  0x45   : > { %12067 = vmatpush1.bf16.msra.mxu0 %v12066_v25 }
  0x46   : > { %12068 = vmatprep.subr.bf16.mxu0 %v13208_v3 }
  0x49   : > { %12070 = vmatpush1.bf16.msra.mxu0 %v12069_v28  ;;  %v12087_v28 = vpack.c.bf16 %v887_v23, %v886_v22  ;;  %v13637_v23 = vld [vmem:[%s17128_s6 + $0x38] sm:$0xff] }
  0x4c   : > { %447 = vmatmul.mubr.f32.vlgmr.msra.gmra.mrb[0].mxu0 %v318_v29 }
  0x4d   : > { %9501 = vmatprep.mubr.msk.f32.mxu0 %vm357_vm0, %v321_v30 }
  0x50   : > { %452 = vmatmul.mubr.f32.gmra.mrb[2].mxu0 %v320_v31  ;;  %v13498_v31 = vld [vmem:[%s17128_s6 + $0x68] sm:$0xff] }
  0x51   : > { %9502 = vmatprep.mubr.msk.f32.mxu0 %vm357_vm0, %v323_v32  ;;  %v13500_v32 = vshrl.u32 %v567_v21, 7 }
  0x53   : > { %vm569_vm2 = vcmp.lt.s32.totalorder %v13500_v32, 1  ;;  %vm869_vm3 = vcmp.lt.s32.totalorder %v13500_v32, 7  ;;  %v10090_v32 = vld [vmem:[%s17125_s3 + $0x2d8] sm:$0xff] }
  0x54   : > { %457 = vmatmul.mubr.f32.gmra.mrb[4].mxu0 %v322_v33  ;;  %v13506_v33 = vld [vmem:[%s17128_s6 + $0x70] sm:$0xff] }
  0x55   : > { %9503 = vmatprep.mubr.msk.f32.mxu0 %vm357_vm0, %v325_v34 }
  0x58   : > { %462 = vmatmul.mubr.f32.gmra.mrb[6].mxu0 %v324_v35 }
  0x59   : > { %9504 = vmatprep.mubr.msk.f32.mxu0 %vm357_vm0, %v327_v36 }
  0x5c   : > { %467 = vmatmul.mubr.f32.gmra.mrb[8].mxu0 %v326_v37 }
  0x5d   : > { %9505 = vmatprep.mubr.msk.f32.mxu0 %vm357_vm0, %v329_v38  ;;  %v13518_v38 = vld [vmem:[%s17128_s6 + $0x78] sm:$0xff] }
  0x60   : > { %472 = vmatmul.mubr.f32.gmra.mrb[10].mxu0 %v328_v39  ;;  %v13525_v39 = vld [vmem:[%s17128_s6] sm:$0xff] }
  0x61   : > { %9506 = vmatprep.mubr.msk.f32.mxu0 %vm357_vm0, %v331_v40 }
  0x64   : > { %477 = vmatmul.mubr.f32.gmra.mrb[12].mxu0 %v330_v41 }
  0x65   : > { %9507 = vmatprep.mubr.msk.f32.mxu0 %vm357_vm0, %v333_v42 }
  0x68   : > { %482 = vmatmul.mubr.f32.gmra.mrb[14].mxu0 %v332_v43 }
 0x11f   : > { %v448_v53 = vpop.f32.mrb[0].mxu0 }
 0x120   : > { %v450_v54 = vpop.f32.mrb[1].mxu0  ;;  %v13429_v4 = vadd.f32 %v9499_v2, %v448_v53  ;;  %v1988_v53 = vld [vmem:[%s17125_s3 + $0x20] sm:$0xff] }
 0x121   : > { %v1989_v54 = vld [vmem:[%s17125_s3 + $0x28] sm:$0xff] }
 0x122   : > { %17265 = vst [vmem:[#allocation8_spill] sm:$0xff] %v13429_v4  ;;  %v591_v16 = vmul.f32 %v13443_v10, %v13429_v4  ;;  %v559_v42 = vrot.slane %v13429_v4, 7  ;;  %v861_v21 = vrot.slane %v13429_v4, 1 }
 0x123   : > { %v453_v55 = vpop.f32.mrb[2].mxu0 }
 0x124   : > { %v455_v56 = vpop.f32.mrb[3].mxu0  ;;  %v13436_v7 = vadd.f32 %v9499_v2, %v453_v55  ;;  %v12143_v55 = vpack.c.bf16 %v1989_v54, %v1988_v53 }
 0x126   : > { %17266 = vst [vmem:[#allocation9_spill] sm:$0xff] %v13436_v7  ;;  %v592_v19 = vmul.f32 %v13454_v13, %v13436_v7  ;;  %v560_v41 = vrot.slane %v13436_v7, 7  ;;  %12144 = vmatprep.subr.bf16.mxu0 %v12143_v55 }
 0x127   : > { %v458_v57 = vpop.f32.mrb[4].mxu0  ;;  %12146 = vmatpush3.bf16.msra.mxu0 %v12143_v55 }
 0x128   : > { %v460_v58 = vpop.f32.mrb[5].mxu0  ;;  %v13458_v15 = vadd.f32 %v9499_v2, %v458_v57  ;;  %v13562_v51 = vsel %vm569_vm2, %v559_v42, %v560_v41  ;;  %v12091_v57 = vpack.c.bf16 %v889_v49, %v888_v48  ;;  %v13681_v48 = vld [vmem:[%s17128_s6 + $0x90] sm:$0xff] }
 0x129   : > { %v580_v58 = vmul.f32 %v13562_v51, %v13558_v50 }
 0x12a   : > { %17268 = vst [vmem:[#allocation11_spill] sm:$0xff] %v13458_v15  ;;  %v593_v27 = vmul.f32 %v13470_v20, %v13458_v15  ;;  %v561_v47 = vrot.slane %v13458_v15, 7 }
 0x12b   : > { %v463_v59 = vpop.f32.mrb[6].mxu0 }
 0x12c   : > { %v465_v60 = vpop.f32.mrb[7].mxu0  ;;  %v13462_v18 = vadd.f32 %v9499_v2, %v463_v59  ;;  %v13579_v59 = vld [vmem:[%s17128_s6 + $0x18] sm:$0xff] }
 0x12d   : > { %v13583_v60 = vsel %vm569_vm2, %v560_v41, %v561_v47 }
 0x12e   : > { %17269 = vst [vmem:[#allocation12_spill] sm:$0xff] %v13462_v18  ;;  %v594_v30 = vmul.f32 %v13482_v24, %v13462_v18 }
 0x12f   : > { %v468_v61 = vpop.f32.mrb[8].mxu0 }
 0x130   : > { %v470_v62 = vpop.f32.mrb[9].mxu0  ;;  %v13485_v25 = vadd.f32 %v9499_v2, %v468_v61 }
 0x131   : > { %v1035_v62 = vld [vmem:[%s17124_s2 + $0x60] sm:$0xff] }
 0x132   : > { %17270 = vst [vmem:[#allocation13_spill] sm:$0xff] %v13485_v25  ;;  %v595_v35 = vmul.f32 %v13498_v31, %v13485_v25  ;;  %v563_v61 = vrot.slane %v13485_v25, 7 }
 0x133   : > { %v473_v63 = vpop.f32.mrb[10].mxu0 }
 0x134   : > { %v475_v0 = vpop.f32.mrb[11].mxu0  ;;  %v13491_v29 = vadd.f32 %v9499_v2, %v473_v63  ;;  %v1036_v63 = vld [vmem:[%s17124_s2 + $0x68] sm:$0xff] }
 0x135   : > { %v13596_v0 = vld [vmem:[%s17128_s6 + $0x20] sm:$0xff] }
 0x136   : > { %17272 = vst [vmem:[#allocation15_spill] sm:$0xff] %v13491_v29  ;;  %v596_v37 = vmul.f32 %v13506_v33, %v13491_v29 }
 0x137   : > { %v478_v1 = vpop.f32.mrb[12].mxu0 }
 0x138   : > { %v480_v3 = vpop.f32.mrb[13].mxu0  ;;  %v13487_v26 = vadd.f32 %v9499_v2, %v478_v1 }
 0x139   : > { %v581_v3 = vmul.f32 %v13583_v60, %v13579_v59 }
 0x13a   : > { %17271 = vst [vmem:[#allocation14_spill] sm:$0xff] %v13487_v26  ;;  %v565_v36 = vrot.slane %v13487_v26, 7  ;;  %v597_v43 = vmul.f32 %v13518_v38, %v13487_v26 }
 0x13b   : > { %v483_v5 = vpop.f32.mrb[14].mxu0 }
 0x13c   : > { %v13438_v8 = vadd.f32 %v9499_v2, %v483_v5  ;;  %v485_v9 = vpop.f32.mrb[15].mxu0  ;;  %v564_v2 = vrot.slane %v13491_v29, 7  ;;  %v12095_v5 = vpack.c.bf16 %v1036_v63, %v1035_v62  ;;  %v1177_v62 = vld [vmem:[%s17124_s2 + $0x88] sm:$0xff]  ;;  %v13713_v63 = vld [vmem:[%s17128_s6 + $0xa0] sm:$0xff] }
 0x13e   : > { %17267 = vst [vmem:[#allocation10_spill] sm:$0xff] %v13438_v8  ;;  %v590_v14 = vmul.f32 %v13434_v6, %v13438_v8  ;;  %v566_v34 = vrot.slane %v13438_v8, 7 }
 0x140   : > { %10892 = vmatprep.mubr.msk.f32.mxu1 %vm602_vm1, %v590_v14  ;;  %v13529_v40 = vsel %vm569_vm2, %v565_v36, %v566_v34  ;;  %v13538_v44 = vsel %vm569_vm2, %v566_v34, %v559_v42  ;;  %v13621_v14 = vld [vmem:[%s17128_s6 + $0x30] sm:$0xff]  ;;  %v13668_v42 = vld [vmem:[%s17128_s6 + $0x88] sm:$0xff] }
 0x141   : > { %10893 = vmatmul.mubr.msk.f32.vlgmr.msra.gmra.mrb[0].mxu1 %vm602_vm1, %v591_v16  ;;  %v578_v45 = vmul.f32 %v13529_v40, %v13525_v39  ;;  %v579_v56 = vmul.f32 %v13538_v44, %v13545_v46  ;;  %v13625_v16 = vsel %vm569_vm2, %v563_v61, %v564_v2 }
 0x142   : > { %12082 = vmatpush3.bf16.msra.mxu1 %v12079_v52  ;;  %10895 = vmatprep.mubr.msk.f32.mxu1 %vm602_vm1, %v592_v19  ;;  %v562_v52 = vrot.slane %v13462_v18, 7  ;;  %v584_v22 = vmul.f32 %v13625_v16, %v13621_v14 }
 0x143   : > { %12084 = vmatprep.subr.bf16.mxu1 %v12083_v17 }
 0x144   : > { %v13600_v1 = vsel %vm569_vm2, %v561_v47, %v562_v52  ;;  %v13615_v12 = vsel %vm569_vm2, %v562_v52, %v563_v61  ;;  %v1038_v47 = vld [vmem:[%s17124_s2 + $0x78] sm:$0xff]  ;;  %v865_v52 = vrot.slane %v13485_v25, 1  ;;  %v1176_v61 = vld [vmem:[%s17124_s2 + $0x80] sm:$0xff] }
 0x145   : > { %10896 = vmatmul.mubr.msk.f32.gmra.mrb[2].mxu1 %vm602_vm1, %v593_v27  ;;  %v582_v9 = vmul.f32 %v13600_v1, %v13596_v0  ;;  %v583_v19 = vmul.f32 %v13615_v12, %v13611_v11  ;;  %v13641_v27 = vsel %vm569_vm2, %v564_v2, %v565_v36 }
 0x146   : > { %10898 = vmatprep.mubr.msk.f32.mxu1 %vm602_vm1, %v594_v30  ;;  %12086 = vmatpush3.bf16.msra.mxu1 %v12083_v17  ;;  %v868_v17 = vrot.slane %v13438_v8, 1  ;;  %v13649_v30 = vld [vmem:[%s17128_s6 + $0x80] sm:$0xff]  ;;  %v585_v36 = vmul.f32 %v13641_v27, %v13637_v23 }
 0x147   : > { %12088 = vmatprep.subr.bf16.mxu1 %v12087_v28 }
 0x148   : > { %v13653_v34 = vsel %vm869_vm3, %v868_v17, %v861_v21 }
 0x149   : > { %10899 = vmatmul.mubr.msk.f32.gmra.mrb[4].mxu1 %vm602_vm1, %v595_v35  ;;  %v863_v35 = vrot.slane %v13458_v15, 1  ;;  %v878_v41 = vmul.f32 %v13649_v30, %v13653_v34 }
 0x14a   : > { %10901 = vmatprep.mubr.msk.f32.mxu1 %vm602_vm1, %v596_v37 }
 0x14d   : > { %10902 = vmatmul.mubr.msk.f32.gmra.mrb[6].mxu1 %vm602_vm1, %v597_v43  ;;  %v864_v43 = vrot.slane %v13462_v18, 1 }
 0x14e   : > { %10912 = vmatprep.mubr.msk.f32.mxu1 %vm602_vm1, %v578_v45  ;;  %v1037_v45 = vld [vmem:[%s17124_s2 + $0x70] sm:$0xff] }
 0x14f   : > { %v12099_v54 = vpack.c.bf16 %v1038_v47, %v1037_v45  ;;  %v13717_v2 = vsel %vm869_vm3, %v864_v43, %v865_v52  ;;  %v13762_v47 = vld [vmem:[%s17128_s6 + $0xc0] sm:$0xff] }
 0x151   : > { %10913 = vmatmul.mubr.msk.f32.vlgmr.msra.gmra.mrb[0].mxu1 %vm602_vm1, %v579_v56  ;;  %v13696_v56 = vld [vmem:[%s17128_s6 + $0x98] sm:$0xff] }
 0x152   : > { %12090 = vmatpush3.bf16.msra.mxu1 %v12087_v28  ;;  %10915 = vmatprep.mubr.msk.f32.mxu1 %vm602_vm1, %v580_v58  ;;  %v862_v28 = vrot.slane %v13436_v7, 1  ;;  %v866_v58 = vrot.slane %v13491_v29, 1 }
 0x153   : > { %12092 = vmatprep.subr.bf16.mxu1 %v12091_v57 }
 0x154   : > { %v13661_v37 = vsel %vm869_vm3, %v861_v21, %v862_v28  ;;  %v13685_v49 = vsel %vm869_vm3, %v862_v28, %v863_v35  ;;  %v882_v21 = vmul.f32 %v13713_v63, %v13717_v2  ;;  %v13732_v28 = vsel %vm869_vm3, %v865_v52, %v866_v58 }
 0x155   : > { %10916 = vmatmul.mubr.msk.f32.gmra.mrb[2].mxu1 %vm602_vm1, %v581_v3  ;;  %v879_v53 = vmul.f32 %v13668_v42, %v13661_v37  ;;  %v880_v55 = vmul.f32 %v13681_v48, %v13685_v49  ;;  %v867_v3 = vrot.slane %v13487_v26, 1 }
 0x156   : > { %10918 = vmatprep.mubr.msk.f32.mxu1 %vm602_vm1, %v582_v9  ;;  %12094 = vmatpush3.bf16.msra.mxu1 %v12091_v57  ;;  %v13700_v57 = vsel %vm869_vm3, %v863_v35, %v864_v43  ;;  %v13752_v43 = vld [vmem:[%s17128_s6 + $0xb8] sm:$0xff] }
 0x157   : > { %12096 = vmatprep.subr.bf16.mxu1 %v12095_v5  ;;  %v881_v9 = vmul.f32 %v13696_v56, %v13700_v57  ;;  %v13742_v35 = vsel %vm869_vm3, %v866_v58, %v867_v3  ;;  %v13756_v45 = vsel %vm869_vm3, %v867_v3, %v868_v17  ;;  %v1027_v17 = vmul.f32 %v13762_v47, %v13538_v44  ;;  %v13784_v58 = vld [vmem:[%s17128_s6 + $0xd0] sm:$0xff] }
 0x158   : > { %v885_v52 = vmul.f32 %v13752_v43, %v13756_v45  ;;  %v1029_v3 = vmul.f32 %v13784_v58, %v13583_v60 }
 0x159   : > { %10919 = vmatmul.mubr.msk.f32.gmra.mrb[4].mxu1 %vm602_vm1, %v583_v19  ;;  %v12103_v19 = vpack.c.bf16 %v1177_v62, %v1176_v61 }
 0x15a   : > { %10921 = vmatprep.mubr.msk.f32.mxu1 %vm602_vm1, %v584_v22  ;;  %v13728_v22 = vld [vmem:[%s17128_s6 + $0xa8] sm:$0xff] }
 0x15d   : > { %10922 = vmatmul.mubr.msk.f32.gmra.mrb[6].mxu1 %vm602_vm1, %v585_v36  ;;  %v883_v36 = vmul.f32 %v13728_v22, %v13732_v28 }
 0x15e   : > { %10932 = vmatprep.mubr.msk.f32.mxu1 %vm602_vm1, %v878_v41 }
 0x161   : > { %10933 = vmatmul.mubr.msk.f32.vlgmr.msra.gmra.mrb[0].mxu1 %vm602_vm1, %v879_v53  ;;  %v13770_v53 = vld [vmem:[%s17128_s6 + $0xc8] sm:$0xff] }
 0x162   : > { %12098 = vmatpush3.bf16.msra.mxu1 %v12095_v5  ;;  %10935 = vmatprep.mubr.msk.f32.mxu1 %vm602_vm1, %v880_v55  ;;  %v13738_v5 = vld [vmem:[%s17128_s6 + $0xb0] sm:$0xff]  ;;  %v1179_v55 = vld [vmem:[%s17124_s2 + $0x98] sm:$0xff]  ;;  %v1028_v61 = vmul.f32 %v13770_v53, %v13562_v51 }
 0x163   : > { %12100 = vmatprep.subr.bf16.mxu1 %v12099_v54  ;;  %v884_v41 = vmul.f32 %v13738_v5, %v13742_v35 }
 0x165   : > { %10936 = vmatmul.mubr.msk.f32.gmra.mrb[2].mxu1 %vm602_vm1, %v881_v9  ;;  %v13794_v9 = vld [vmem:[%s17128_s6 + $0xd8] sm:$0xff] }
 0x166   : > { %10938 = vmatprep.mubr.msk.f32.mxu1 %vm602_vm1, %v882_v21  ;;  %12102 = vmatpush3.bf16.msra.mxu1 %v12099_v54  ;;  %v1178_v54 = vld [vmem:[%s17124_s2 + $0x90] sm:$0xff]  ;;  %v1325_v21 = vld [vmem:[%s17124_s2 + $0xa0] sm:$0xff] }
 0x167   : > { %12104 = vmatprep.subr.bf16.mxu1 %v12103_v19  ;;  %v12107_v62 = vpack.c.bf16 %v1179_v55, %v1178_v54  ;;  %v13816_v55 = vld [vmem:[%s17128_s6 + $0xe8] sm:$0xff] }
 0x168   : > { %17274 = vst [vmem:[#allocation17_spill] sm:$0xff] %v13816_v55 }
 0x169   : > { %10939 = vmatmul.mubr.msk.f32.gmra.mrb[4].mxu1 %vm602_vm1, %v883_v36  ;;  %v1326_v36 = vld [vmem:[%s17124_s2 + $0xa8] sm:$0xff] }
 0x16a   : > { %10941 = vmatprep.mubr.msk.f32.mxu1 %vm602_vm1, %v884_v41  ;;  %v13806_v41 = vld [vmem:[%s17128_s6 + $0xe0] sm:$0xff] }
 0x16b   : > { %17273 = vst [vmem:[#allocation16_spill] sm:$0xff] %v13806_v41  ;;  %v1031_v54 = vmul.f32 %v13806_v41, %v13615_v12  ;;  %v1623_v41 = vld [vmem:[%s17124_s2 + $0xe0] sm:$0xff] }
 0x16d   : > { %10942 = vmatmul.mubr.msk.f32.gmra.mrb[6].mxu1 %vm602_vm1, %v885_v52  ;;  %v1030_v52 = vmul.f32 %v13794_v9, %v13600_v1 }
 0x16e   : > { %10952 = vmatprep.mubr.msk.f32.mxu1 %vm602_vm1, %v1027_v17  ;;  %v12111_v17 = vpack.c.bf16 %v1326_v36, %v1325_v21  ;;  %v13832_v21 = vld [vmem:[%s17128_s6 + $0xf8] sm:$0xff] }
 0x16f   : > { %17276 = vst [vmem:[#allocation19_spill] sm:$0xff] %v13832_v21  ;;  %v1034_v36 = vmul.f32 %v13832_v21, %v13529_v40 }
 0x171   : > { %10953 = vmatmul.mubr.msk.f32.vlgmr.msra.gmra.mrb[0].mxu1 %vm602_vm1, %v1028_v61  ;;  %v1032_v61 = vmul.f32 %v13816_v55, %v13625_v16  ;;  %v13898_v55 = vld [vmem:[%s17128_s6 + $0x158] sm:$0xff] }
 0x172   : > { %12106 = vmatpush3.bf16.msra.mxu1 %v12103_v19  ;;  %10955 = vmatprep.mubr.msk.f32.mxu1 %vm602_vm1, %v1029_v3  ;;  %v13822_v19 = vld [vmem:[%s17128_s6 + $0xf0] sm:$0xff] }
 0x173   : > { %12108 = vmatprep.subr.bf16.mxu1 %v12107_v62  ;;  %17275 = vst [vmem:[#allocation18_spill] sm:$0xff] %v13822_v19  ;;  %v1033_v3 = vmul.f32 %v13822_v19, %v13641_v27 }
 0x175   : > { %10956 = vmatmul.mubr.msk.f32.gmra.mrb[2].mxu1 %vm602_vm1, %v1030_v52  ;;  %v1328_v52 = vld [vmem:[%s17124_s2 + $0xb8] sm:$0xff] }
 0x176   : > { %10958 = vmatprep.mubr.msk.f32.mxu1 %vm602_vm1, %v1031_v54  ;;  %12110 = vmatpush3.bf16.msra.mxu1 %v12107_v62  ;;  %v1327_v62 = vld [vmem:[%s17124_s2 + $0xb0] sm:$0xff] }
 0x177   : > { %12112 = vmatprep.subr.bf16.mxu1 %v12111_v17  ;;  %v12115_v54 = vpack.c.bf16 %v1328_v52, %v1327_v62  ;;  %v13873_v62 = vld [vmem:[%s17128_s6 + $0x148] sm:$0xff] }
 0x178   : > { %17278 = vst [vmem:[#allocation21_spill] sm:$0xff] %v13873_v62 }
 0x179   : > { %10959 = vmatmul.mubr.msk.f32.gmra.mrb[4].mxu1 %vm602_vm1, %v1032_v61  ;;  %v1474_v61 = vld [vmem:[%s17124_s2 + $0xc0] sm:$0xff] }
 0x17a   : > { %10961 = vmatprep.mubr.msk.f32.mxu1 %vm602_vm1, %v1033_v3  ;;  %v1475_v3 = vld [vmem:[%s17124_s2 + $0xc8] sm:$0xff] }
 0x17d   : > { %10962 = vmatmul.mubr.msk.f32.gmra.mrb[6].mxu1 %vm602_vm1, %v1034_v36  ;;  %v12119_v36 = vpack.c.bf16 %v1475_v3, %v1474_v61  ;;  %v1477_v61 = vld [vmem:[%s17124_s2 + $0xd8] sm:$0xff]  ;;  %v13888_v3 = vld [vmem:[%s17128_s6 + $0x150] sm:$0xff] }
 0x17e   : > { %10972 = vmatprep.mubr.msk.f32.mxu1 %vm602_vm1, %v13429_v4  ;;  %17279 = vst [vmem:[#allocation22_spill] sm:$0xff] %v13888_v3  ;;  %v1319_v19 = vmul.f32 %v13888_v3, %v13700_v57 }
 0x181   : > { %10973 = vmatmul.mubr.msk.f32.vlgmr.msra.gmra.mrb[0].mxu1 %vm602_vm1, %v13436_v7 }
 0x182   : > { %12114 = vmatpush3.bf16.msra.mxu1 %v12111_v17  ;;  %10975 = vmatprep.mubr.msk.f32.mxu1 %vm602_vm1, %v13458_v15  ;;  %v13866_v17 = vld [vmem:[%s17128_s6 + $0x140] sm:$0xff] }
 0x183   : > { %12116 = vmatprep.subr.bf16.mxu1 %v12115_v54  ;;  %17277 = vst [vmem:[#allocation20_spill] sm:$0xff] %v13866_v17  ;;  %v1317_v52 = vmul.f32 %v13866_v17, %v13661_v37  ;;  %v1318_v17 = vmul.f32 %v13873_v62, %v13685_v49 }
 0x185   : > { %10976 = vmatmul.mubr.msk.f32.gmra.mrb[2].mxu1 %vm602_vm1, %v13462_v18 }
 0x186   : > { %10978 = vmatprep.mubr.msk.f32.mxu1 %vm602_vm1, %v13485_v25  ;;  %12118 = vmatpush3.bf16.msra.mxu1 %v12115_v54  ;;  %v1476_v54 = vld [vmem:[%s17124_s2 + $0xd0] sm:$0xff] }
 0x187   : > { %12120 = vmatprep.subr.bf16.mxu1 %v12119_v36  ;;  %v12123_v21 = vpack.c.bf16 %v1477_v61, %v1476_v54  ;;  %v13910_v54 = vld [vmem:[%s17128_s6 + $0x160] sm:$0xff]  ;;  %v1320_v61 = vmul.f32 %v13898_v55, %v13717_v2 }
 0x188   : > { %17280 = vst [vmem:[#allocation23_spill] sm:$0xff] %v13910_v54  ;;  %v1321_v62 = vmul.f32 %v13910_v54, %v13732_v28  ;;  %v13974_v54 = vld [vmem:[%s17128_s6 + $0x198] sm:$0xff] }
 0x189   : > { %10979 = vmatmul.mubr.msk.f32.gmra.mrb[4].mxu1 %vm602_vm1, %v13491_v29 }
 0x18a   : > { %10981 = vmatprep.mubr.msk.f32.mxu1 %vm602_vm1, %v13487_v26 }
 0x18d   : > { %10982 = vmatmul.mubr.msk.f32.gmra.mrb[6].mxu1 %vm602_vm1, %v13438_v8 }
 0x18e   : > { %10992 = vmatprep.mubr.msk.f32.mxu1 %vm602_vm1, %v1317_v52  ;;  %v1624_v52 = vld [vmem:[%s17124_s2 + $0xe8] sm:$0xff] }
 0x18f   : > { %v12127_v3 = vpack.c.bf16 %v1624_v52, %v1623_v41  ;;  %v13936_v52 = vld [vmem:[%s17128_s6 + $0x178] sm:$0xff] }
 0x190   : > { %17283 = vst [vmem:[#allocation26_spill] sm:$0xff] %v13936_v52 }
 0x191   : > { %10993 = vmatmul.mubr.msk.f32.vlgmr.msra.gmra.mrb[0].mxu1 %vm602_vm1, %v1318_v17  ;;  %v13920_v17 = vld [vmem:[%s17128_s6 + $0x168] sm:$0xff] }
 0x192   : > { %12122 = vmatpush3.bf16.msra.mxu1 %v12119_v36  ;;  %10995 = vmatprep.mubr.msk.f32.mxu1 %vm602_vm1, %v1319_v19  ;;  %17281 = vst [vmem:[#allocation24_spill] sm:$0xff] %v13920_v17  ;;  %v13926_v36 = vld [vmem:[%s17128_s6 + $0x170] sm:$0xff]  ;;  %v1322_v41 = vmul.f32 %v13920_v17, %v13742_v35  ;;  %v1626_v17 = vld [vmem:[%s17124_s2 + $0xf8] sm:$0xff] }
 0x193   : > { %12124 = vmatprep.subr.bf16.mxu1 %v12123_v21  ;;  %17282 = vst [vmem:[#allocation25_spill] sm:$0xff] %v13926_v36  ;;  %v1323_v19 = vmul.f32 %v13926_v36, %v13756_v45 }
 0x195   : > { %10996 = vmatmul.mubr.msk.f32.gmra.mrb[2].mxu1 %vm602_vm1, %v1320_v61  ;;  %v13942_v61 = vld [vmem:[%s17128_s6 + $0x180] sm:$0xff] }
 0x196   : > { %10998 = vmatprep.mubr.msk.f32.mxu1 %vm602_vm1, %v1321_v62  ;;  %12126 = vmatpush3.bf16.msra.mxu1 %v12123_v21  ;;  %17284 = vst [vmem:[#allocation27_spill] sm:$0xff] %v13942_v61  ;;  %v1324_v21 = vmul.f32 %v13936_v52, %v13653_v34  ;;  %v13950_v62 = vld [vmem:[%s17128_s6 + $0x188] sm:$0xff]  ;;  %v1466_v36 = vmul.f32 %v13942_v61, %v13562_v51 }
 0x197   : > { %12128 = vmatprep.subr.bf16.mxu1 %v12127_v3  ;;  %v1467_v51 = vmul.f32 %v13950_v62, %v13583_v60  ;;  %v13986_v60 = vld [vmem:[%s17128_s6 + $0x1a0] sm:$0xff] }
 0x199   : > { %10999 = vmatmul.mubr.msk.f32.gmra.mrb[4].mxu1 %vm602_vm1, %v1322_v41  ;;  %v1625_v41 = vld [vmem:[%s17124_s2 + $0xf0] sm:$0xff] }
 0x19a   : > { %11001 = vmatprep.mubr.msk.f32.mxu1 %vm602_vm1, %v1323_v19  ;;  %v13964_v19 = vld [vmem:[%s17128_s6 + $0x190] sm:$0xff]  ;;  %v12131_v61 = vpack.c.bf16 %v1626_v17, %v1625_v41  ;;  %v1470_v41 = vmul.f32 %v13986_v60, %v13625_v16 }
 0x19b   : > { %v1468_v52 = vmul.f32 %v13964_v19, %v13600_v1  ;;  %v1469_v1 = vmul.f32 %v13974_v54, %v13615_v12 }
 0x19d   : > { %11002 = vmatmul.mubr.msk.f32.gmra.mrb[6].mxu1 %vm602_vm1, %v1324_v21  ;;  %v1772_v21 = vld [vmem:[%s17124_s2 + $0x100] sm:$0xff] }
 0x19e   : > { %11012 = vmatprep.mubr.msk.f32.mxu1 %vm602_vm1, %v1466_v36  ;;  %v1773_v36 = vld [vmem:[%s17124_s2 + $0x108] sm:$0xff] }
 0x19f   : > { %v12135_v17 = vpack.c.bf16 %v1773_v36, %v1772_v21  ;;  %v14018_v21 = vld [vmem:[%s17128_s6 + $0x1c0] sm:$0xff]  ;;  %v1774_v36 = vld [vmem:[%s17124_s2 + $0x110] sm:$0xff] }
 0x1a1   : > { %11013 = vmatmul.mubr.msk.f32.vlgmr.msra.gmra.mrb[0].mxu1 %vm602_vm1, %v1467_v51  ;;  %v13996_v51 = vld [vmem:[%s17128_s6 + $0x1a8] sm:$0xff] }
 0x1a2   : > { %12130 = vmatpush3.bf16.msra.mxu1 %v12127_v3  ;;  %11015 = vmatprep.mubr.msk.f32.mxu1 %vm602_vm1, %v1468_v52  ;;  %v14002_v3 = vld [vmem:[%s17128_s6 + $0x1b0] sm:$0xff]  ;;  %v1471_v12 = vmul.f32 %v13996_v51, %v13641_v27  ;;  %v14012_v52 = vld [vmem:[%s17128_s6 + $0x1b8] sm:$0xff] }
 0x1a3   : > { %12132 = vmatprep.subr.bf16.mxu1 %v12131_v61  ;;  %v1472_v16 = vmul.f32 %v14002_v3, %v13529_v40  ;;  %v1473_v27 = vmul.f32 %v14012_v52, %v13538_v44  ;;  %v1615_v40 = vmul.f32 %v14018_v21, %v13436_v7  ;;  %v14040_v44 = vld [vmem:[%s17128_s6 + $0x1d0] sm:$0xff]  ;;  %v14050_v7 = vld [vmem:[%s17128_s6 + $0x1d8] sm:$0xff] }
 0x1a4   : > { %17285 = vst [vmem:[#allocation28_spill] sm:$0xff] %v14050_v7 }
 0x1a5   : > { %11016 = vmatmul.mubr.msk.f32.gmra.mrb[2].mxu1 %vm602_vm1, %v1469_v1  ;;  %v1775_v1 = vld [vmem:[%s17124_s2 + $0x118] sm:$0xff] }
 0x1a6   : > { %11018 = vmatprep.mubr.msk.f32.mxu1 %vm602_vm1, %v1470_v41  ;;  %12134 = vmatpush3.bf16.msra.mxu1 %v12131_v61  ;;  %v14028_v61 = vld [vmem:[%s17128_s6 + $0x1c8] sm:$0xff] }
 0x1a7   : > { %12136 = vmatprep.subr.bf16.mxu1 %v12135_v17  ;;  %v1616_v41 = vmul.f32 %v14028_v61, %v13458_v15 }
 0x1a9   : > { %11019 = vmatmul.mubr.msk.f32.gmra.mrb[4].mxu1 %vm602_vm1, %v1471_v12  ;;  %v12139_v12 = vpack.c.bf16 %v1775_v1, %v1774_v36  ;;  %v14066_v1 = vld [vmem:[%s17128_s6 + $0x1e8] sm:$0xff] }
 0x1aa   : > { %11021 = vmatprep.mubr.msk.f32.mxu1 %vm602_vm1, %v1472_v16  ;;  %v1617_v16 = vmul.f32 %v14040_v44, %v13462_v18  ;;  %17287 = vst [vmem:[#allocation30_spill] sm:$0xff] %v14066_v1  ;;  %v14114_v18 = vld [vmem:[%s17128_s6 + $0x218] sm:$0xff] }
 0x1ab   : > { %17293 = vst [vmem:[#allocation36_spill] sm:$0xff] %v14114_v18 }
 0x1ad   : > { %11022 = vmatmul.mubr.msk.f32.gmra.mrb[6].mxu1 %vm602_vm1, %v1473_v27  ;;  %v14056_v27 = vld [vmem:[%s17128_s6 + $0x1e0] sm:$0xff] }
 0x1ae   : > { %11032 = vmatprep.mubr.msk.f32.mxu1 %vm602_vm1, %v1615_v40  ;;  %17286 = vst [vmem:[#allocation29_spill] sm:$0xff] %v14056_v27  ;;  %v1618_v40 = vmul.f32 %v14050_v7, %v13485_v25  ;;  %v1619_v36 = vmul.f32 %v14056_v27, %v13491_v29  ;;  %v14082_v29 = vld [vmem:[%s17128_s6 + $0x1f8] sm:$0xff]  ;;  %v1978_v27 = vld [vmem:[%s17125_s3 + $0x10] sm:$0xff] }
 0x1af   : > { %17289 = vst [vmem:[#allocation32_spill] sm:$0xff] %v14082_v29 }
 0x1b1   : > { %11033 = vmatmul.mubr.msk.f32.vlgmr.msra.gmra.mrb[0].mxu1 %vm602_vm1, %v1616_v41  ;;  %v1620_v41 = vmul.f32 %v14066_v1, %v13487_v26 }
 0x1b2   : > { %12138 = vmatpush3.bf16.msra.mxu1 %v12135_v17  ;;  %11035 = vmatprep.mubr.msk.f32.mxu1 %vm602_vm1, %v1617_v16  ;;  %v14072_v17 = vld [vmem:[%s17128_s6 + $0x1f0] sm:$0xff] }
 0x1b3   : > { %12140 = vmatprep.subr.bf16.mxu1 %v12139_v12  ;;  %17288 = vst [vmem:[#allocation31_spill] sm:$0xff] %v14072_v17  ;;  %v1621_v16 = vmul.f32 %v14072_v17, %v13438_v8 }
 0x1b5   : > { %11036 = vmatmul.mubr.msk.f32.gmra.mrb[2].mxu1 %vm602_vm1, %v1618_v40  ;;  %v14088_v40 = vld [vmem:[%s17128_s6 + $0x200] sm:$0xff] }
 0x1b6   : > { %11038 = vmatprep.mubr.msk.f32.mxu1 %vm602_vm1, %v1619_v36  ;;  %12142 = vmatpush3.bf16.msra.mxu1 %v12139_v12  ;;  %17290 = vst [vmem:[#allocation33_spill] sm:$0xff] %v14088_v40  ;;  %v1622_v12 = vmul.f32 %v14082_v29, %v13429_v4  ;;  %v14096_v36 = vld [vmem:[%s17128_s6 + $0x208] sm:$0xff]  ;;  %v1764_v25 = vmul.f32 %v14088_v40, %v13685_v49  ;;  %v14120_v49 = vld [vmem:[%s17128_s6 + $0x220] sm:$0xff] }
 0x1b7   : > { %17291 = vst [vmem:[#allocation34_spill] sm:$0xff] %v14096_v36  ;;  %17294 = vst [vmem:[#allocation37_spill] sm:$0xff] %v14120_v49 }
 0x1b9   : > { %11039 = vmatmul.mubr.msk.f32.gmra.mrb[4].mxu1 %vm602_vm1, %v1620_v41  ;;  %v14104_v41 = vld [vmem:[%s17128_s6 + $0x210] sm:$0xff] }
 0x1ba   : > { %11041 = vmatprep.mubr.msk.f32.mxu1 %vm602_vm1, %v1621_v16  ;;  %17292 = vst [vmem:[#allocation35_spill] sm:$0xff] %v14104_v41  ;;  %v1765_v16 = vmul.f32 %v14096_v36, %v13700_v57  ;;  %v1766_v26 = vmul.f32 %v14104_v41, %v13717_v2  ;;  %v1768_v57 = vmul.f32 %v14120_v49, %v13742_v35  ;;  %v14130_v2 = vld [vmem:[%s17128_s6 + $0x228] sm:$0xff]  ;;  %v14146_v35 = vld [vmem:[%s17128_s6 + $0x238] sm:$0xff] }
 0x1bb   : > { %17295 = vst [vmem:[#allocation38_spill] sm:$0xff] %v14130_v2  ;;  %17297 = vst [vmem:[#allocation40_spill] sm:$0xff] %v14146_v35 }
 0x1bd   : > { %11042 = vmatmul.mubr.msk.f32.gmra.mrb[6].mxu1 %vm602_vm1, %v1622_v12  ;;  %v14136_v12 = vld [vmem:[%s17128_s6 + $0x230] sm:$0xff] }
 0x1be   : > { %11052 = vmatprep.mubr.msk.f32.mxu1 %vm602_vm1, %v1764_v25  ;;  %v1767_v25 = vmul.f32 %v14114_v18, %v13732_v28  ;;  %17296 = vst [vmem:[#allocation39_spill] sm:$0xff] %v14136_v12  ;;  %v1770_v28 = vmul.f32 %v14136_v12, %v13653_v34  ;;  %v1991_v34 = vld [vmem:[%s17125_s3 + $0x38] sm:$0xff]  ;;  %v1934_v12 = vstv %s1925_s20  ;;  %s13143_s20 = sshll.u32 %s13209_s19, 4  ;;  %s13144_s20 = int_to_ptr.vmem [resolvable:$false] %s13143_s20 }
 0x1bf   : > { %s13145_s26 = scalar_lea.vmem %s13144_s20, 2048  ;;  %p13146_p13 = scmp.lt.s32.totalorder %s17075_s10, %s13144_s20 }
 0x1c0   : > { %p13147_p0 = scmp.lt.s32.totalorder %s13145_s26, %s13139_s18 }
 0x1c1   : > { %11053 = vmatmul.mubr.msk.f32.vlgmr.msra.gmra.mrb[0].mxu1 %vm602_vm1, %v1765_v16  ;;  %v1771_v16 = vmul.f32 %v14146_v35, %v13661_v37  ;;  %v1977_v37 = vld [vmem:[%s17125_s3 + $0x8] sm:$0xff] }
 0x1c2   : > { %11055 = vmatprep.mubr.msk.f32.mxu1 %vm602_vm1, %v1766_v26  ;;  %v1769_v26 = vmul.f32 %v14130_v2, %v13756_v45  ;;  %v1990_v45 = vld [vmem:[%s17125_s3 + $0x30] sm:$0xff]  ;;  %p13148_p1 = por %p13147_p0, %p13146_p13 }
 0x1c4   : > { %p13149_p2 = pnand %p13148_p1, %p13142_p12 }
 0x1c5   : > { %11056 = vmatmul.mubr.msk.f32.gmra.mrb[2].mxu1 %vm602_vm1, %v1767_v25  ;;  %v12147_v25 = vpack.c.bf16 %v1991_v34, %v1990_v45  ;;  %v9636_v45 = vld [vmem:[%s17127_s5 + $0x1] ss:$0 sm:$0xff] }
 0x1c6   : > { %11058 = vmatprep.mubr.msk.f32.mxu1 %vm602_vm1, %v1768_v57  ;;  %v1976_v57 = vld [vmem:[%s17125_s3] sm:$0xff] }
 0x1c7   : > { %12148 = vmatprep.subr.bf16.mxu0 %v12147_v25 }
 0x1c8   : > { %12150 = vmatpush3.bf16.msra.mxu0 %v12147_v25 }
 0x1c9   : > { %11059 = vmatmul.mubr.msk.f32.gmra.mrb[4].mxu1 %vm602_vm1, %v1769_v26  ;;  %v12151_v26 = vpack.c.bf16 %v1977_v37, %v1976_v57 }
 0x1ca   : > { %11061 = vmatprep.mubr.msk.f32.mxu1 %vm602_vm1, %v1770_v28 }
 0x1cb   : > { %12152 = vmatprep.subr.bf16.mxu0 %v12151_v26 }
 0x1cd   : > { %11062 = vmatmul.mubr.msk.f32.gmra.mrb[6].mxu1 %vm602_vm1, %v1771_v16 }
 0x294   : > { %v11054_v28 = vpop.f32.mrb[0].mxu1 }
 0x295   : > { %v1866_v16 = vpop.f32.mrb[1].mxu1  ;;  %v1918_v25 = vadd.f32 %v11054_v28, %v9636_v45 }
 0x296   : > { %v1917_v4 = vadd.f32 %v9636_v45, %v1866_v16 }
 0x297   : > { %v1936_v49 = vmul.f32 %v1934_v12, %v1918_v25  ;;  %vm1927_vm4 = vcmp.gt.f32.partialorder %v1918_v25, 0.0 }
 0x298   : > { %v11057_v15 = vpop.f32.mrb[2].mxu1  ;;  %v1935_v18 = vmul.f32 %v1934_v12, %v1917_v4  ;;  %vm1926_vm5 = vcmp.gt.f32.partialorder %v1917_v4, 0.0 }
 0x299   : > { %v1876_v8 = vpop.f32.mrb[3].mxu1  ;;  %v1920_v36 = vadd.f32 %v11057_v15, %v9636_v45  ;;  %v14168_v17 = vsel %vm1927_vm4, %v1918_v25, %v1936_v49 }
 0x29a   : > { %v1919_v41 = vadd.f32 %v9636_v45, %v1876_v8  ;;  %v14170_v1 = vsel %vm1926_vm5, %v1917_v4, %v1935_v18  ;;  %v1979_v8 = vld [vmem:[%s17125_s3 + $0x18] sm:$0xff] }
 0x29b   : > { %vm1929_vm8 = vcmp.gt.f32.partialorder %v1920_v36, 0.0  ;;  %v1981_v18 = vmul.f32 %v13443_v10, %v14170_v1 }
 0x29c   : > { %v11060_v34 = vpop.f32.mrb[4].mxu1  ;;  %v1937_v28 = vmul.f32 %v1934_v12, %v1919_v41  ;;  %vm1928_vm7 = vcmp.gt.f32.partialorder %v1919_v41, 0.0 }
 0x29d   : > { %v1886_v35 = vpop.f32.mrb[5].mxu1  ;;  %v1922_v15 = vadd.f32 %v11060_v34, %v9636_v45 }
 0x29e   : > { %v1921_v16 = vadd.f32 %v9636_v45, %v1886_v35  ;;  %v12155_v35 = vpack.c.bf16 %v1979_v8, %v1978_v27  ;;  %v14184_v25 = vsel %vm1928_vm7, %v1919_v41, %v1937_v28 }
 0x29f   : > { %v1940_v10 = vmul.f32 %v1934_v12, %v1922_v15  ;;  %vm1931_vm11 = vcmp.gt.f32.partialorder %v1922_v15, 0.0 }
 0x2a0   : > { %v11063_v2 = vpop.f32.mrb[6].mxu1  ;;  %vm1930_vm10 = vcmp.gt.f32.partialorder %v1921_v16, 0.0 }
 0x2a1   : > { %v1924_v57 = vadd.f32 %v11063_v2, %v9636_v45  ;;  %v1896_v37 = vpop.f32.mrb[7].mxu1  ;;  %v1938_v2 = vmul.f32 %v1934_v12, %v1920_v36 }
 0x2a2   : > { %v1923_v40 = vadd.f32 %v9636_v45, %v1896_v37  ;;  %v1939_v37 = vmul.f32 %v1934_v12, %v1921_v16  ;;  %v1982_v45 = vmul.f32 %v13454_v13, %v14168_v17  ;;  %v1983_v13 = vmul.f32 %v13470_v20, %v14184_v25 }
 0x2a3   : > { %vm1933_vm6 = vcmp.gt.f32.partialorder %v1924_v57, 0.0  ;;  %v1942_v29 = vmul.f32 %v1934_v12, %v1924_v57  ;;  %v14195_v34 = vsel %vm1929_vm8, %v1920_v36, %v1938_v2 }
 0x2a4   : > { %v1941_v49 = vmul.f32 %v1934_v12, %v1923_v40  ;;  %vm1932_vm9 = vcmp.gt.f32.partialorder %v1923_v40, 0.0  ;;  %v1984_v36 = vmul.f32 %v13482_v24, %v14195_v34  ;;  %v14207_v12 = vsel %vm1931_vm11, %v1922_v15, %v1940_v10  ;;  %v2424_v10 = vld [vmem:[%s17125_s3 + $0x68] sm:$0xff] }
 0x2a5   : > { %v14178_v7 = vsel %vm1933_vm6, %v1924_v57, %v1942_v29  ;;  %v2274_v29 = vld [vmem:[%s17125_s3 + $0x40] sm:$0xff]  ;;  %v14203_v57 = vsel %vm1930_vm10, %v1921_v16, %v1939_v37  ;;  %v1953_v24 = vrot.slane %v14168_v17, 7  ;;  %v1952_v16 = vrot.slane %v14170_v1, 7 }
 0x2a6   : > { %v1980_v4 = vmul.f32 %v13434_v6, %v14178_v7  ;;  %v2275_v6 = vld [vmem:[%s17125_s3 + $0x48] sm:$0xff]  ;;  %v14198_v27 = vsel %vm1932_vm9, %v1923_v40, %v1941_v49  ;;  %v1959_v28 = vrot.slane %v14178_v7, 7  ;;  %v1985_v20 = vmul.f32 %v13498_v31, %v14203_v57  ;;  %v2276_v49 = vld [vmem:[%s17125_s3 + $0x50] sm:$0xff] }
 0x2a7   : > { %v12159_v41 = vpack.c.bf16 %v2275_v6, %v2274_v29  ;;  %v1958_v40 = vrot.slane %v14198_v27, 7  ;;  %v1987_v2 = vmul.f32 %v13518_v38, %v14198_v27  ;;  %v1954_v31 = vrot.slane %v14184_v25, 7  ;;  %v2423_v6 = vld [vmem:[%s17125_s3 + $0x60] sm:$0xff] }
 0x2a8   : > { %11072 = vmatprep.mubr.msk.f32.mxu0 %vm602_vm1, %v1980_v4  ;;  %v2277_v4 = vld [vmem:[%s17125_s3 + $0x58] sm:$0xff]  ;;  %v14244_v38 = vsel %vm569_vm2, %v1952_v16, %v1953_v24  ;;  %v1956_v37 = vrot.slane %v14203_v57, 7 }
 0x2a9   : > { %11073 = vmatmul.mubr.msk.f32.vlgmr.msra.gmra.mrb[16].mxu0 %vm602_vm1, %v1981_v18  ;;  %v14222_v8 = vsel %vm569_vm2, %v1958_v40, %v1959_v28  ;;  %v1955_v18 = vrot.slane %v14195_v34, 7  ;;  %v14254_v29 = vsel %vm569_vm2, %v1953_v24, %v1954_v31  ;;  %v2251_v24 = vrot.slane %v14168_v17, 1 }
 0x2aa   : > { %12154 = vmatpush3.bf16.msra.mxu0 %v12151_v26  ;;  %11075 = vmatprep.mubr.msk.f32.mxu0 %vm602_vm1, %v1982_v45  ;;  %v1986_v26 = vmul.f32 %v13506_v33, %v14207_v12  ;;  %v14230_v33 = vsel %vm569_vm2, %v1959_v28, %v1952_v16  ;;  %v1968_v15 = vmul.f32 %v14222_v8, %v13525_v39 }
 0x2ab   : > { %12156 = vmatprep.subr.bf16.mxu0 %v12155_v35  ;;  %v1969_v39 = vmul.f32 %v14230_v33, %v13545_v46  ;;  %v1970_v45 = vmul.f32 %v14244_v38, %v13558_v50  ;;  %v1957_v46 = vrot.slane %v14207_v12, 7  ;;  %v1971_v50 = vmul.f32 %v14254_v29, %v13579_v59 }
 0x2ac   : > { %v2250_v59 = vrot.slane %v14170_v1, 1 }
 0x2ad   : > { %11076 = vmatmul.mubr.msk.f32.gmra.mrb[18].mxu0 %vm602_vm1, %v1983_v13  ;;  %v14266_v13 = vsel %vm569_vm2, %v1954_v31, %v1955_v18  ;;  %v2252_v31 = vrot.slane %v14184_v25, 1 }
 0x2ae   : > { %11078 = vmatprep.mubr.msk.f32.mxu0 %vm602_vm1, %v1984_v36  ;;  %12158 = vmatpush3.bf16.msra.mxu0 %v12155_v35  ;;  %v12163_v35 = vpack.c.bf16 %v2277_v4, %v2276_v49  ;;  %v12167_v36 = vpack.c.bf16 %v2424_v10, %v2423_v6  ;;  %v1972_v28 = vmul.f32 %v14266_v13, %v13596_v0  ;;  %v2425_v4 = vld [vmem:[%s17125_s3 + $0x70] sm:$0xff]  ;;  %v2564_v10 = vld [vmem:[%s17125_s3 + $0x80] sm:$0xff] }
 0x2af   : > { %12160 = vmatprep.subr.bf16.mxu0 %v12159_v41 }
 0x2b1   : > { %11079 = vmatmul.mubr.msk.f32.gmra.mrb[20].mxu0 %vm602_vm1, %v1985_v20  ;;  %v14275_v20 = vsel %vm569_vm2, %v1955_v18, %v1956_v37  ;;  %v2426_v18 = vld [vmem:[%s17125_s3 + $0x78] sm:$0xff] }
 0x2b2   : > { %11081 = vmatprep.mubr.msk.f32.mxu0 %vm602_vm1, %v1986_v26  ;;  %v2257_v26 = vrot.slane %v14178_v7, 1  ;;  %v1973_v0 = vmul.f32 %v14275_v20, %v13611_v11 }
 0x2b5   : > { %11082 = vmatmul.mubr.msk.f32.gmra.mrb[22].mxu0 %vm602_vm1, %v1987_v2  ;;  %v14292_v2 = vsel %vm569_vm2, %v1957_v46, %v1958_v40  ;;  %v2253_v40 = vrot.slane %v14195_v34, 1 }
 0x2b6   : > { %11092 = vmatprep.mubr.msk.f32.mxu0 %vm602_vm1, %v1968_v15  ;;  %v14298_v15 = vsel %vm869_vm3, %v2257_v26, %v2250_v59  ;;  %v1975_v11 = vmul.f32 %v14292_v2, %v13637_v23  ;;  %v14320_v23 = vsel %vm869_vm3, %v2251_v24, %v2252_v31 }
 0x2b7   : > { %v2266_v49 = vmul.f32 %v13649_v30, %v14298_v15  ;;  %v14330_v6 = vsel %vm869_vm3, %v2252_v31, %v2253_v40  ;;  %v2415_v31 = vmul.f32 %v13762_v47, %v14230_v33  ;;  %v2713_v47 = vld [vmem:[%s17125_s3 + $0xa0] sm:$0xff] }
 0x2b9   : > { %11093 = vmatmul.mubr.msk.f32.vlgmr.msra.gmra.mrb[16].mxu0 %vm602_vm1, %v1969_v39  ;;  %v2254_v39 = vrot.slane %v14203_v57, 1 }
 0x2ba   : > { %12162 = vmatpush3.bf16.msra.mxu0 %v12159_v41  ;;  %11095 = vmatprep.mubr.msk.f32.mxu0 %vm602_vm1, %v1970_v45  ;;  %v14281_v41 = vsel %vm569_vm2, %v1956_v37, %v1957_v46  ;;  %v2255_v37 = vrot.slane %v14207_v12, 1  ;;  %v2268_v45 = vmul.f32 %v13681_v48, %v14320_v23  ;;  %v2565_v46 = vld [vmem:[%s17125_s3 + $0x88] sm:$0xff]  ;;  %v2269_v48 = vmul.f32 %v13696_v56, %v14330_v6 }
 0x2bb   : > { %12164 = vmatprep.subr.bf16.mxu0 %v12163_v35  ;;  %v1974_v16 = vmul.f32 %v14281_v41, %v13621_v14  ;;  %v14305_v14 = vsel %vm869_vm3, %v2250_v59, %v2251_v24 }
 0x2bc   : > { %v2267_v30 = vmul.f32 %v13668_v42, %v14305_v14  ;;  %v2256_v42 = vrot.slane %v14198_v27, 1 }
 0x2bd   : > { %11096 = vmatmul.mubr.msk.f32.gmra.mrb[18].mxu0 %vm602_vm1, %v1971_v50  ;;  %v14342_v50 = vsel %vm869_vm3, %v2253_v40, %v2254_v39  ;;  %v2714_v40 = vld [vmem:[%s17125_s3 + $0xa8] sm:$0xff] }
 0x2be   : > { %11098 = vmatprep.mubr.msk.f32.mxu0 %vm602_vm1, %v1972_v28  ;;  %12166 = vmatpush3.bf16.msra.mxu0 %v12163_v35  ;;  %v12171_v35 = vpack.c.bf16 %v2426_v18, %v2425_v4  ;;  %v12175_v28 = vpack.c.bf16 %v2565_v46, %v2564_v10  ;;  %v2270_v59 = vmul.f32 %v13713_v63, %v14342_v50  ;;  %v17299_v18 = vld [vmem:[#allocation17_spill] sm:$0xff]  ;;  %v2716_v10 = vld [vmem:[%s17125_s3 + $0xb8] sm:$0xff] }
 0x2bf   : > { %12168 = vmatprep.subr.bf16.mxu0 %v12167_v36  ;;  %v14356_v24 = vsel %vm869_vm3, %v2255_v37, %v2256_v42 }
 0x2c0   : > { %v2272_v63 = vmul.f32 %v13738_v5, %v14356_v24  ;;  %v2567_v5 = vld [vmem:[%s17125_s3 + $0x98] sm:$0xff] }
 0x2c1   : > { %11099 = vmatmul.mubr.msk.f32.gmra.mrb[20].mxu0 %vm602_vm1, %v1973_v0  ;;  %v14351_v0 = vsel %vm869_vm3, %v2254_v39, %v2255_v37  ;;  %v2420_v39 = vmul.f32 %v17299_v18, %v14281_v41 }
 0x2c2   : > { %11101 = vmatprep.mubr.msk.f32.mxu0 %vm602_vm1, %v1974_v16  ;;  %v2271_v56 = vmul.f32 %v13728_v22, %v14351_v0  ;;  %v2566_v22 = vld [vmem:[%s17125_s3 + $0x90] sm:$0xff] }
 0x2c5   : > { %11102 = vmatmul.mubr.msk.f32.gmra.mrb[22].mxu0 %vm602_vm1, %v1975_v11  ;;  %v12179_v11 = vpack.c.bf16 %v2567_v5, %v2566_v22 }
 0x2c6   : > { %11112 = vmatprep.mubr.msk.f32.mxu0 %vm602_vm1, %v2266_v49  ;;  %v12183_v49 = vpack.c.bf16 %v2714_v40, %v2713_v47  ;;  %v3012_v47 = vld [vmem:[%s17125_s3 + $0xe8] sm:$0xff]  ;;  %v2708_v40 = vmul.f32 %v13898_v55, %v14342_v50  ;;  %v17308_v55 = vld [vmem:[#allocation26_spill] sm:$0xff] }
 0x2c9   : > { %11113 = vmatmul.mubr.msk.f32.vlgmr.msra.gmra.mrb[16].mxu0 %vm602_vm1, %v2267_v30  ;;  %v17300_v30 = vld [vmem:[#allocation18_spill] sm:$0xff] }
 0x2ca   : > { %12170 = vmatpush3.bf16.msra.mxu0 %v12167_v36  ;;  %11115 = vmatprep.mubr.msk.f32.mxu0 %vm602_vm1, %v2268_v45  ;;  %v14365_v36 = vsel %vm869_vm3, %v2256_v42, %v2257_v26  ;;  %v2416_v26 = vmul.f32 %v13770_v53, %v14244_v38  ;;  %v2418_v53 = vmul.f32 %v13794_v9, %v14266_v13  ;;  %v17301_v9 = vld [vmem:[#allocation19_spill] sm:$0xff]  ;;  %v2715_v45 = vld [vmem:[%s17125_s3 + $0xb0] sm:$0xff]  ;;  %v2862_v42 = vld [vmem:[%s17125_s3 + $0xc0] sm:$0xff] }
 0x2cb   : > { %12172 = vmatprep.subr.bf16.mxu0 %v12171_v35  ;;  %v2273_v16 = vmul.f32 %v13752_v43, %v14365_v36  ;;  %v2417_v43 = vmul.f32 %v13784_v58, %v14254_v29  ;;  %v17298_v58 = vld [vmem:[#allocation16_spill] sm:$0xff]  ;;  %v2422_v37 = vmul.f32 %v17301_v9, %v14222_v8  ;;  %v12187_v46 = vpack.c.bf16 %v2716_v10, %v2715_v45  ;;  %v17309_v9 = vld [vmem:[#allocation27_spill] sm:$0xff]  ;;  %v3013_v45 = vld [vmem:[%s17125_s3 + $0xf0] sm:$0xff] }
 0x2cc   : > { %v2419_v4 = vmul.f32 %v17298_v58, %v14275_v20  ;;  %v3014_v10 = vld [vmem:[%s17125_s3 + $0xf8] sm:$0xff] }
 0x2cd   : > { %11116 = vmatmul.mubr.msk.f32.gmra.mrb[18].mxu0 %vm602_vm1, %v2269_v48  ;;  %v2863_v48 = vld [vmem:[%s17125_s3 + $0xc8] sm:$0xff] }
 0x2ce   : > { %11118 = vmatprep.mubr.msk.f32.mxu0 %vm602_vm1, %v2270_v59  ;;  %12174 = vmatpush3.bf16.msra.mxu0 %v12171_v35  ;;  %v2421_v35 = vmul.f32 %v17300_v30, %v14292_v2  ;;  %v17302_v59 = vld [vmem:[#allocation20_spill] sm:$0xff] }
 0x2cf   : > { %12176 = vmatprep.subr.bf16.mxu0 %v12175_v28 }
 0x2d1   : > { %11119 = vmatmul.mubr.msk.f32.gmra.mrb[20].mxu0 %vm602_vm1, %v2271_v56  ;;  %v2705_v56 = vmul.f32 %v17302_v59, %v14305_v14  ;;  %v2860_v59 = vmul.f32 %v14002_v3, %v14222_v8  ;;  %v3004_v3 = vmul.f32 %v14028_v61, %v14184_v25  ;;  %v17312_v61 = vld [vmem:[#allocation30_spill] sm:$0xff] }
 0x2d2   : > { %11121 = vmatprep.mubr.msk.f32.mxu0 %vm602_vm1, %v2272_v63  ;;  %v2864_v63 = vld [vmem:[%s17125_s3 + $0xd0] sm:$0xff] }
 0x2d5   : > { %11122 = vmatmul.mubr.msk.f32.gmra.mrb[22].mxu0 %vm602_vm1, %v2273_v16  ;;  %v2865_v16 = vld [vmem:[%s17125_s3 + $0xd8] sm:$0xff] }
 0x2d6   : > { %11132 = vmatprep.mubr.msk.f32.mxu0 %vm602_vm1, %v2415_v31  ;;  %v17303_v31 = vld [vmem:[#allocation21_spill] sm:$0xff]  ;;  %v12195_v5 = vpack.c.bf16 %v2865_v16, %v2864_v63  ;;  %v17316_v63 = vld [vmem:[#allocation34_spill] sm:$0xff]  ;;  %v17317_v16 = vld [vmem:[#allocation35_spill] sm:$0xff] }
 0x2d7   : > { %v2706_v22 = vmul.f32 %v17303_v31, %v14320_v23  ;;  %v17318_v31 = vld [vmem:[#allocation36_spill] sm:$0xff] }
 0x2d9   : > { %11133 = vmatmul.mubr.msk.f32.vlgmr.msra.gmra.mrb[16].mxu0 %vm602_vm1, %v2416_v26  ;;  %v17304_v26 = vld [vmem:[#allocation22_spill] sm:$0xff] }
 0x2da   : > { %12178 = vmatpush3.bf16.msra.mxu0 %v12175_v28  ;;  %11135 = vmatprep.mubr.msk.f32.mxu0 %vm602_vm1, %v2417_v43  ;;  %v12191_v28 = vpack.c.bf16 %v2863_v48, %v2862_v42  ;;  %v3011_v43 = vld [vmem:[%s17125_s3 + $0xe0] sm:$0xff]  ;;  %v12203_v42 = vpack.c.bf16 %v3014_v10, %v3013_v45  ;;  %v2856_v48 = vmul.f32 %v13964_v19, %v14266_v13 }
 0x2db   : > { %12180 = vmatprep.subr.bf16.mxu0 %v12179_v11  ;;  %v2858_v19 = vmul.f32 %v13986_v60, %v14281_v41  ;;  %v2859_v13 = vmul.f32 %v13996_v51, %v14292_v2  ;;  %v3003_v60 = vmul.f32 %v14018_v21, %v14168_v17  ;;  %v3163_v51 = vld [vmem:[%s17125_s3 + $0x118] sm:$0xff]  ;;  %v17310_v21 = vld [vmem:[#allocation28_spill] sm:$0xff] }
 0x2dc   : > { %v17323_v45 = vld [vmem:[#allocation8_spill] sm:$0xff] }
 0x2dd   : > { %11136 = vmatmul.mubr.msk.f32.gmra.mrb[18].mxu0 %vm602_vm1, %v2418_v53  ;;  %v12199_v53 = vpack.c.bf16 %v3012_v47, %v3011_v43 }
 0x2de   : > { %11138 = vmatprep.mubr.msk.f32.mxu0 %vm602_vm1, %v2419_v4  ;;  %12182 = vmatpush3.bf16.msra.mxu0 %v12179_v11  ;;  %v2707_v11 = vmul.f32 %v17304_v26, %v14330_v6  ;;  %v17306_v4 = vld [vmem:[#allocation24_spill] sm:$0xff]  ;;  %v17321_v26 = vld [vmem:[#allocation39_spill] sm:$0xff] }
 0x2df   : > { %12184 = vmatprep.subr.bf16.mxu0 %v12183_v49  ;;  %v2710_v18 = vmul.f32 %v17306_v4, %v14356_v24 }
 0x2e1   : > { %11139 = vmatmul.mubr.msk.f32.gmra.mrb[20].mxu0 %vm602_vm1, %v2420_v39  ;;  %v17307_v39 = vld [vmem:[#allocation25_spill] sm:$0xff] }
 0x2e2   : > { %11141 = vmatprep.mubr.msk.f32.mxu0 %vm602_vm1, %v2421_v35  ;;  %v2711_v30 = vmul.f32 %v17307_v39, %v14365_v36  ;;  %v2712_v35 = vmul.f32 %v17308_v55, %v14298_v15  ;;  %v9709_v39 = vld [vmem:[%s17127_s5 + $0x2] ss:$0 sm:$0xff] }
 0x2e5   : > { %11142 = vmatmul.mubr.msk.f32.gmra.mrb[22].mxu0 %vm602_vm1, %v2422_v37  ;;  %v2854_v37 = vmul.f32 %v17309_v9, %v14244_v38  ;;  %v3160_v38 = vld [vmem:[%s17125_s3 + $0x100] sm:$0xff] }
 0x2e6   : > { %11152 = vmatprep.mubr.msk.f32.mxu0 %vm602_vm1, %v14170_v1 }
 0x2e9   : > { %11153 = vmatmul.mubr.msk.f32.vlgmr.msra.gmra.mrb[16].mxu0 %vm602_vm1, %v14168_v17  ;;  %v3006_v17 = vmul.f32 %v17310_v21, %v14203_v57 }
 0x2ea   : > { %12186 = vmatpush3.bf16.msra.mxu0 %v12183_v49  ;;  %11155 = vmatprep.mubr.msk.f32.mxu0 %vm602_vm1, %v14184_v25  ;;  %v17305_v49 = vld [vmem:[#allocation23_spill] sm:$0xff] }
 0x2eb   : > { %12188 = vmatprep.subr.bf16.mxu0 %v12187_v46  ;;  %v2709_v58 = vmul.f32 %v17305_v49, %v14351_v0  ;;  %v17313_v25 = vld [vmem:[#allocation31_spill] sm:$0xff] }
 0x2ed   : > { %11156 = vmatmul.mubr.msk.f32.gmra.mrb[18].mxu0 %vm602_vm1, %v14195_v34 }
 0x2ee   : > { %11158 = vmatprep.mubr.msk.f32.mxu0 %vm602_vm1, %v14203_v57  ;;  %12190 = vmatpush3.bf16.msra.mxu0 %v12187_v46  ;;  %v2855_v46 = vmul.f32 %v13950_v62, %v14254_v29  ;;  %v2857_v62 = vmul.f32 %v13974_v54, %v14275_v20  ;;  %v2861_v54 = vmul.f32 %v14012_v52, %v14230_v33  ;;  %v3162_v20 = vld [vmem:[%s17125_s3 + $0x110] sm:$0xff]  ;;  %v17311_v33 = vld [vmem:[#allocation29_spill] sm:$0xff]  ;;  %v17314_v57 = vld [vmem:[#allocation32_spill] sm:$0xff] }
 0x2ef   : > { %12192 = vmatprep.subr.bf16.mxu0 %v12191_v28  ;;  %v12211_v8 = vpack.c.bf16 %v3163_v51, %v3162_v20  ;;  %v3005_v52 = vmul.f32 %v14040_v44, %v14195_v34  ;;  %v3007_v41 = vmul.f32 %v17311_v33, %v14207_v12  ;;  %v3008_v44 = vmul.f32 %v17312_v61, %v14198_v27  ;;  %v9712_v33 = vld [vmem:[%s17124_s2 + $0x130] sm:$0xff] }
 0x2f0   : > { %v3009_v34 = vmul.f32 %v17313_v25, %v14178_v7  ;;  %v3010_v2 = vmul.f32 %v17314_v57, %v14170_v1  ;;  %v3155_v1 = vmul.f32 %v17318_v31, %v14351_v0  ;;  %v17336_v61 = vld [vmem:[#allocation14_spill] sm:$0xff]  ;;  %v14622_v25 = vld [vmem:[%s17128_s6 + $0x40] sm:$0xff] }
 0x2f1   : > { %11159 = vmatmul.mubr.msk.f32.gmra.mrb[20].mxu0 %vm602_vm1, %v14207_v12  ;;  %v17315_v12 = vld [vmem:[#allocation33_spill] sm:$0xff] }
 0x2f2   : > { %11161 = vmatprep.mubr.msk.f32.mxu0 %vm602_vm1, %v14198_v27  ;;  %v3153_v27 = vmul.f32 %v17316_v63, %v14330_v6 }
 0x2f5   : > { %11162 = vmatmul.mubr.msk.f32.gmra.mrb[22].mxu0 %vm602_vm1, %v14178_v7  ;;  %v3154_v7 = vmul.f32 %v17317_v16, %v14342_v50  ;;  %v3158_v50 = vmul.f32 %v17321_v26, %v14298_v15  ;;  %v9716_v15 = vld [vmem:[%s17124_s2 + $0x150] sm:$0xff] }
 0x2f6   : > { %11172 = vmatprep.mubr.msk.f32.mxu0 %vm602_vm1, %v2705_v56  ;;  %v3152_v56 = vmul.f32 %v17315_v12, %v14320_v23 }
 0x2f9   : > { %11173 = vmatmul.mubr.msk.f32.vlgmr.msra.gmra.mrb[16].mxu0 %vm602_vm1, %v2706_v22  ;;  %v17319_v22 = vld [vmem:[#allocation37_spill] sm:$0xff] }
 0x2fa   : > { %12194 = vmatpush3.bf16.msra.mxu0 %v12191_v28  ;;  %11175 = vmatprep.mubr.msk.f32.mxu0 %vm602_vm1, %v2707_v11  ;;  %v3161_v28 = vld [vmem:[%s17125_s3 + $0x108] sm:$0xff]  ;;  %v3156_v23 = vmul.f32 %v17319_v22, %v14356_v24  ;;  %v17322_v11 = vld [vmem:[#allocation40_spill] sm:$0xff] }
 0x2fb   : > { %12196 = vmatprep.subr.bf16.mxu0 %v12195_v5  ;;  %v12207_v29 = vpack.c.bf16 %v3161_v28, %v3160_v38  ;;  %v3159_v0 = vmul.f32 %v17322_v11, %v14305_v14  ;;  %v9714_v24 = vld [vmem:[%s17124_s2 + $0x140] sm:$0xff]  ;;  %v9717_v14 = vld [vmem:[%s17124_s2 + $0x158] sm:$0xff] }
 0x2fc   : > { %v12219_v47 = vpack.c.bf16 %v9717_v14, %v9716_v15 }
 0x2fd   : > { %11176 = vmatmul.mubr.msk.f32.gmra.mrb[18].mxu0 %vm602_vm1, %v2708_v40  ;;  %v9710_v40 = vld [vmem:[%s17124_s2 + $0x120] sm:$0xff] }
 0x2fe   : > { %11178 = vmatprep.mubr.msk.f32.mxu0 %vm602_vm1, %v2709_v58  ;;  %12198 = vmatpush3.bf16.msra.mxu0 %v12195_v5  ;;  %v17320_v5 = vld [vmem:[#allocation38_spill] sm:$0xff] }
 0x2ff   : > { %12200 = vmatprep.subr.bf16.mxu0 %v12199_v53  ;;  %v3157_v6 = vmul.f32 %v17320_v5, %v14365_v36  ;;  %v9715_v36 = vld [vmem:[%s17124_s2 + $0x148] sm:$0xff] }
 0x300   : > { %v12215_v43 = vpack.c.bf16 %v9715_v36, %v9714_v24  ;;  %v9735_v5 = vld [vmem:[%s17124_s2 + $0x168] sm:$0xff]  ;;  %v14685_v36 = vld [vmem:[%s17128_s6 + $0x60] sm:$0xff] }
 0x301   : > { %11179 = vmatmul.mubr.msk.f32.gmra.mrb[20].mxu0 %vm602_vm1, %v2710_v18 }
 0x302   : > { %11181 = vmatprep.mubr.msk.f32.mxu0 %vm602_vm1, %v2711_v30  ;;  %12216 = vmatprep.subr.bf16.mxu1 %v12215_v43 }
 0x303   : > { %12218 = vmatpush3.bf16.msra.mxu1 %v12215_v43 }
 0x304   : > { %12220 = vmatprep.subr.bf16.mxu1 %v12219_v47 }
 0x305   : > { %11182 = vmatmul.mubr.msk.f32.gmra.mrb[22].mxu0 %vm602_vm1, %v2712_v35 }
 0x306   : > { %11192 = vmatprep.mubr.msk.f32.mxu0 %vm602_vm1, %v2854_v37 }
 0x307   : > { %12222 = vmatpush3.bf16.msra.mxu1 %v12219_v47  ;;  %v14696_v47 = vld [vmem:[%s17128_s6 + $0x68] sm:$0xff] }
 0x309   : > { %11193 = vmatmul.mubr.msk.f32.vlgmr.msra.gmra.mrb[16].mxu0 %vm602_vm1, %v2855_v46 }
 0x30a   : > { %12202 = vmatpush3.bf16.msra.mxu0 %v12199_v53  ;;  %11195 = vmatprep.mubr.msk.f32.mxu0 %vm602_vm1, %v2856_v48  ;;  %v9711_v53 = vld [vmem:[%s17124_s2 + $0x128] sm:$0xff] }
 0x30b   : > { %12204 = vmatprep.subr.bf16.mxu0 %v12203_v42  ;;  %v12223_v49 = vpack.c.bf16 %v9711_v53, %v9710_v40  ;;  %v17325_v48 = vld [vmem:[#allocation9_spill] sm:$0xff]  ;;  %v14703_v53 = vld [vmem:[%s17128_s6 + $0x70] sm:$0xff] }
 0x30d   : > { %11196 = vmatmul.mubr.msk.f32.gmra.mrb[18].mxu0 %vm602_vm1, %v2857_v62  ;;  %12224 = vmatprep.subr.bf16.mxu1 %v12223_v49 }
 0x30e   : > { %11198 = vmatprep.mubr.msk.f32.mxu0 %vm602_vm1, %v2858_v19  ;;  %12206 = vmatpush3.bf16.msra.mxu0 %v12203_v42 }
 0x30f   : > { %12208 = vmatprep.subr.bf16.mxu0 %v12207_v29 }
 0x311   : > { %11199 = vmatmul.mubr.msk.f32.gmra.mrb[20].mxu0 %vm602_vm1, %v2859_v13  ;;  %v17327_v13 = vld [vmem:[#allocation10_spill] sm:$0xff] }
 0x312   : > { %11201 = vmatprep.mubr.msk.f32.mxu0 %vm602_vm1, %v2860_v59 }
 0x315   : > { %11202 = vmatmul.mubr.msk.f32.gmra.mrb[22].mxu0 %vm602_vm1, %v2861_v54 }
 0x316   : > { %11212 = vmatprep.mubr.msk.f32.mxu0 %vm602_vm1, %v3003_v60  ;;  %v17330_v60 = vld [vmem:[#allocation11_spill] sm:$0xff] }
 0x319   : > { %11213 = vmatmul.mubr.msk.f32.vlgmr.msra.gmra.mrb[16].mxu0 %vm602_vm1, %v3004_v3 }
 0x31a   : > { %12210 = vmatpush3.bf16.msra.mxu0 %v12207_v29  ;;  %11215 = vmatprep.mubr.msk.f32.mxu0 %vm602_vm1, %v3005_v52 }
 0x31b   : > { %12212 = vmatprep.subr.bf16.mxu0 %v12211_v8 }
 0x31d   : > { %11216 = vmatmul.mubr.msk.f32.gmra.mrb[18].mxu0 %vm602_vm1, %v3006_v17 }
 0x31e   : > { %11218 = vmatprep.mubr.msk.f32.mxu0 %vm602_vm1, %v3007_v41  ;;  %12214 = vmatpush3.bf16.msra.mxu0 %v12211_v8  ;;  %v17333_v8 = vld [vmem:[#allocation12_spill] sm:$0xff]  ;;  %v9713_v41 = vld [vmem:[%s17124_s2 + $0x138] sm:$0xff] }
 0x321   : > { %11219 = vmatmul.mubr.msk.f32.gmra.mrb[20].mxu0 %vm602_vm1, %v3008_v44 }
 0x322   : > { %11221 = vmatprep.mubr.msk.f32.mxu0 %vm602_vm1, %v3009_v34 }
 0x325   : > { %11222 = vmatmul.mubr.msk.f32.gmra.mrb[22].mxu0 %vm602_vm1, %v3010_v2  ;;  %v17339_v2 = vld [vmem:[#allocation13_spill] sm:$0xff] }
 0x326   : > { %11232 = vmatprep.mubr.msk.f32.mxu0 %vm602_vm1, %v3152_v56  ;;  %v14636_v56 = vld [vmem:[%s17128_s6 + $0x48] sm:$0xff] }
 0x329   : > { %11233 = vmatmul.mubr.msk.f32.vlgmr.msra.gmra.mrb[16].mxu0 %vm602_vm1, %v3153_v27  ;;  %v12227_v27 = vpack.c.bf16 %v9713_v41, %v9712_v33 }
 0x32a   : > { %11235 = vmatprep.mubr.msk.f32.mxu0 %vm602_vm1, %v3154_v7  ;;  %v17342_v7 = vld [vmem:[#allocation15_spill] sm:$0xff] }
 0x32d   : > { %11236 = vmatmul.mubr.msk.f32.gmra.mrb[18].mxu0 %vm602_vm1, %v3155_v1  ;;  %v14651_v1 = vld [vmem:[%s17128_s6 + $0x50] sm:$0xff] }
 0x32e   : > { %11238 = vmatprep.mubr.msk.f32.mxu0 %vm602_vm1, %v3156_v23  ;;  %v9734_v23 = vld [vmem:[%s17124_s2 + $0x160] sm:$0xff] }
 0x331   : > { %11239 = vmatmul.mubr.msk.f32.gmra.mrb[20].mxu0 %vm602_vm1, %v3157_v6 }
 0x332   : > { %11241 = vmatprep.mubr.msk.f32.mxu0 %vm602_vm1, %v3158_v50  ;;  %v14674_v50 = vld [vmem:[%s17128_s6 + $0x58] sm:$0xff] }
 0x335   : > { %11242 = vmatmul.mubr.msk.f32.gmra.mrb[22].mxu0 %vm602_vm1, %v3159_v0  ;;  %v12231_v0 = vpack.c.bf16 %v9735_v5, %v9734_v23  ;;  %v14782_v5 = vld [vmem:[%s17128_s6 + $0x18] sm:$0xff] }
 0x3fc   : > { %v11234_v58 = vpop.f32.mrb[16].mxu0 }
 0x3fd   : > { %v3254_v4 = vpop.f32.mrb[17].mxu0  ;;  %v3306_v9 = vadd.f32 %v11234_v58, %v9709_v39 }
 0x3fe   : > { %v3305_v55 = vadd.f32 %v9709_v39, %v3254_v4 }
 0x3ff   : > { %v14587_v38 = vadd.f32 %v3306_v9, %v17325_v48 }
 0x400   : > { %v11237_v18 = vpop.f32.mrb[18].mxu0  ;;  %v14584_v10 = vadd.f32 %v3305_v55, %v17323_v45 }
 0x401   : > { %v3264_v30 = vpop.f32.mrb[19].mxu0  ;;  %17326 = vst [vmem:[#allocation17_spill] sm:$0xff] %v14587_v38  ;;  %v3308_v28 = vadd.f32 %v11237_v18, %v9709_v39  ;;  %v14601_v3 = vadd.f32 %v14587_v38, %v17325_v48  ;;  %v9773_v38 = vld [vmem:[%s17124_s2 + $0x1d8] sm:$0xff] }
 0x402   : > { %17324 = vst [vmem:[#allocation16_spill] sm:$0xff] %v14584_v10  ;;  %v3307_v46 = vadd.f32 %v9709_v39, %v3264_v30  ;;  %v14594_v54 = vadd.f32 %v14584_v10, %v17323_v45  ;;  %v14949_v45 = vld [vmem:[%s17128_s6 + $0xc0] sm:$0xff]  ;;  %v9783_v10 = vld [vmem:[%s17124_s2 + $0x1e8] sm:$0xff] }
 0x403   : > { %17332 = vst [vmem:[#allocation21_spill] sm:$0xff] %v14601_v3  ;;  %v14604_v52 = vadd.f32 %v3308_v28, %v17333_v8  ;;  %v3361_v22 = vmul.f32 %v14651_v1, %v14601_v3  ;;  %v3331_v18 = vrot.slane %v14601_v3, 7 }
 0x404   : > { %v11240_v35 = vpop.f32.mrb[20].mxu0  ;;  %17329 = vst [vmem:[#allocation19_spill] sm:$0xff] %v14594_v54  ;;  %v14597_v20 = vadd.f32 %v3307_v46, %v17330_v60  ;;  %v3360_v63 = vmul.f32 %v14636_v56, %v14594_v54  ;;  %v3330_v58 = vrot.slane %v14594_v54, 7  ;;  %v9736_v46 = vld [vmem:[%s17124_s2 + $0x170] sm:$0xff] }
 0x405   : > { %v3274_v37 = vpop.f32.mrb[21].mxu0  ;;  %17334 = vst [vmem:[#allocation22_spill] sm:$0xff] %v14604_v52  ;;  %v3310_v21 = vadd.f32 %v11240_v35, %v9709_v39  ;;  %v14642_v16 = vadd.f32 %v14604_v52, %v17333_v8  ;;  %v14729_v35 = vld [vmem:[%s17128_s6] sm:$0xff] }
 0x406   : > { %17331 = vst [vmem:[#allocation20_spill] sm:$0xff] %v14597_v20  ;;  %v3309_v51 = vadd.f32 %v9709_v39, %v3274_v37  ;;  %v14628_v57 = vadd.f32 %v14597_v20, %v17330_v60  ;;  %v14743_v28 = vsel %vm569_vm2, %v3330_v58, %v3331_v18  ;;  %v14993_v20 = vld [vmem:[%s17128_s6 + $0xe0] sm:$0xff] }
 0x407   : > { %17341 = vst [vmem:[#allocation27_spill] sm:$0xff] %v14642_v16  ;;  %v14645_v31 = vadd.f32 %v3310_v21, %v17342_v7  ;;  %v3363_v43 = vmul.f32 %v14685_v36, %v14642_v16  ;;  %v14757_v21 = vld [vmem:[%s17128_s6 + $0x10] sm:$0xff] }
 0x408   : > { %v11243_v42 = vpop.f32.mrb[22].mxu0  ;;  %17338 = vst [vmem:[#allocation25_spill] sm:$0xff] %v14628_v57  ;;  %v14631_v12 = vadd.f32 %v3309_v51, %v17339_v2  ;;  %v3362_v11 = vmul.f32 %v14674_v50, %v14628_v57  ;;  %v3332_v37 = vrot.slane %v14628_v57, 7  ;;  %v3348_v33 = vmul.f32 %v14757_v21, %v14743_v28 }
 0x409   : > { %v3312_v62 = vadd.f32 %v11243_v42, %v9709_v39  ;;  %v3284_v29 = vpop.f32.mrb[23].mxu0  ;;  %17343 = vst [vmem:[#allocation28_spill] sm:$0xff] %v14645_v31  ;;  %v14680_v24 = vadd.f32 %v14645_v31, %v17342_v7  ;;  %v9737_v42 = vld [vmem:[%s17124_s2 + $0x178] sm:$0xff]  ;;  %v14971_v31 = vld [vmem:[%s17128_s6 + $0xd0] sm:$0xff] }
 0x40a   : > { %v3311_v19 = vadd.f32 %v9709_v39, %v3284_v29  ;;  %17340 = vst [vmem:[#allocation26_spill] sm:$0xff] %v14631_v12  ;;  %v14669_v26 = vadd.f32 %v14631_v12, %v17339_v2  ;;  %v14718_v39 = vld [vmem:[%s17128_s6 + $0x78] sm:$0xff]  ;;  %v14750_v29 = vld [vmem:[%s17128_s6 + $0x8] sm:$0xff]  ;;  %v12235_v51 = vpack.c.bf16 %v9737_v42, %v9736_v46  ;;  %v14763_v41 = vsel %vm569_vm2, %v3331_v18, %v3332_v37  ;;  %v9758_v2 = vld [vmem:[%s17124_s2 + $0x1a0] sm:$0xff] }
 0x40b   : > { %v14590_v59 = vadd.f32 %v3312_v62, %v17327_v13  ;;  %17346 = vst [vmem:[#allocation31_spill] sm:$0xff] %v14680_v24  ;;  %v3333_v62 = vrot.slane %v14642_v16, 7  ;;  %v3335_v23 = vrot.slane %v14680_v24, 7  ;;  %v14807_v18 = vld [vmem:[%s17128_s6 + $0x28] sm:$0xff]  ;;  %v3634_v7 = vrot.slane %v14680_v24, 1 }
 0x40c   : > { %v14617_v44 = vadd.f32 %v3311_v19, %v17336_v61  ;;  %17345 = vst [vmem:[#allocation30_spill] sm:$0xff] %v14669_v26  ;;  %v3364_v40 = vmul.f32 %v14696_v47, %v14669_v26  ;;  %v3796_v12 = vmul.f32 %v14971_v31, %v14763_v41 }
 0x40d   : > { %17328 = vst [vmem:[#allocation18_spill] sm:$0xff] %v14590_v59  ;;  %v14608_v17 = vadd.f32 %v14590_v59, %v17327_v13 }
 0x40e   : > { %17337 = vst [vmem:[#allocation24_spill] sm:$0xff] %v14617_v44  ;;  %v14663_v6 = vadd.f32 %v14617_v44, %v17336_v61 }
 0x40f   : > { %17335 = vst [vmem:[#allocation23_spill] sm:$0xff] %v14608_v17  ;;  %v3359_v34 = vmul.f32 %v14622_v25, %v14608_v17  ;;  %v3337_v14 = vrot.slane %v14608_v17, 7 }
 0x410   : > { %17344 = vst [vmem:[#allocation29_spill] sm:$0xff] %v14663_v6  ;;  %v3336_v15 = vrot.slane %v14663_v6, 7  ;;  %v3366_v30 = vmul.f32 %v14718_v39, %v14663_v6  ;;  %v3635_v8 = vrot.slane %v14663_v6, 1 }
 0x411   : > { %11252 = vmatprep.mubr.msk.f32.mxu1 %vm602_vm1, %v3359_v34  ;;  %v14724_v55 = vsel %vm569_vm2, %v3337_v14, %v3330_v58  ;;  %v3334_v34 = vrot.slane %v14669_v26, 7  ;;  %v3636_v58 = vrot.slane %v14608_v17, 1 }
 0x412   : > { %11253 = vmatmul.mubr.msk.f32.vlgmr.msra.gmra.mrb[8].mxu1 %vm602_vm1, %v3360_v63  ;;  %v14711_v4 = vsel %vm569_vm2, %v3336_v15, %v3337_v14  ;;  %v3347_v19 = vmul.f32 %v14750_v29, %v14724_v55  ;;  %v9746_v63 = vld [vmem:[%s17124_s2 + $0x180] sm:$0xff]  ;;  %v14821_v42 = vsel %vm569_vm2, %v3335_v23, %v3336_v15 }
 0x413   : > { %12226 = vmatpush3.bf16.msra.mxu1 %v12223_v49  ;;  %11255 = vmatprep.mubr.msk.f32.mxu1 %vm602_vm1, %v3361_v22  ;;  %v3365_v49 = vmul.f32 %v14703_v53, %v14680_v24  ;;  %v3346_v9 = vmul.f32 %v14729_v35, %v14711_v4  ;;  %v14775_v22 = vsel %vm569_vm2, %v3332_v37, %v3333_v62  ;;  %v14789_v14 = vld [vmem:[%s17128_s6 + $0x20] sm:$0xff]  ;;  %v14815_v37 = vld [vmem:[%s17128_s6 + $0x30] sm:$0xff] }
 0x414   : > { %12228 = vmatprep.subr.bf16.mxu1 %v12227_v27 }
 0x416   : > { %11256 = vmatmul.mubr.msk.f32.gmra.mrb[10].mxu1 %vm602_vm1, %v3362_v11  ;;  %v3349_v11 = vmul.f32 %v14782_v5, %v14763_v41 }
 0x417   : > { %11258 = vmatprep.mubr.msk.f32.mxu1 %vm602_vm1, %v3363_v43  ;;  %12230 = vmatpush3.bf16.msra.mxu1 %v12227_v27  ;;  %v9747_v27 = vld [vmem:[%s17124_s2 + $0x188] sm:$0xff] }
 0x418   : > { %12232 = vmatprep.subr.bf16.mxu1 %v12231_v0  ;;  %v12239_v43 = vpack.c.bf16 %v9747_v27, %v9746_v63  ;;  %v14845_v63 = vld [vmem:[%s17128_s6 + $0x80] sm:$0xff] }
 0x41a   : > { %11259 = vmatmul.mubr.msk.f32.gmra.mrb[12].mxu1 %vm602_vm1, %v3364_v40  ;;  %v14795_v40 = vsel %vm569_vm2, %v3333_v62, %v3334_v34  ;;  %v3630_v62 = vrot.slane %v14601_v3, 1 }
 0x41b   : > { %11261 = vmatprep.mubr.msk.f32.mxu1 %vm602_vm1, %v3365_v49  ;;  %v14800_v49 = vsel %vm569_vm2, %v3334_v34, %v3335_v23  ;;  %v3632_v23 = vrot.slane %v14642_v16, 1 }
 0x41c   : > { %v3352_v46 = vmul.f32 %v14815_v37, %v14800_v49 }
 0x41e   : > { %11262 = vmatmul.mubr.msk.f32.gmra.mrb[14].mxu1 %vm602_vm1, %v3366_v30  ;;  %v3351_v30 = vmul.f32 %v14807_v18, %v14795_v40 }
 0x41f   : > { %11272 = vmatprep.mubr.msk.f32.mxu1 %vm602_vm1, %v3346_v9  ;;  %v3629_v9 = vrot.slane %v14594_v54, 1 }
 0x421   : > { %v14840_v34 = vsel %vm869_vm3, %v3629_v9, %v3630_v62 }
 0x422   : > { %11273 = vmatmul.mubr.msk.f32.vlgmr.msra.gmra.mrb[8].mxu1 %vm602_vm1, %v3347_v19  ;;  %v14827_v19 = vsel %vm869_vm3, %v3636_v58, %v3629_v9  ;;  %v3633_v9 = vrot.slane %v14669_v26, 1 }
 0x423   : > { %12234 = vmatpush3.bf16.msra.mxu1 %v12231_v0  ;;  %11275 = vmatprep.mubr.msk.f32.mxu1 %vm602_vm1, %v3348_v33  ;;  %v3350_v0 = vmul.f32 %v14789_v14, %v14775_v22  ;;  %v14834_v33 = vld [vmem:[%s17128_s6 + $0x38] sm:$0xff]  ;;  %v3645_v27 = vmul.f32 %v14845_v63, %v14827_v19 }
 0x424   : > { %12236 = vmatprep.subr.bf16.mxu1 %v12235_v51  ;;  %v3353_v15 = vmul.f32 %v14834_v33, %v14821_v42 }
 0x426   : > { %11276 = vmatmul.mubr.msk.f32.gmra.mrb[10].mxu1 %vm602_vm1, %v3349_v11  ;;  %v9748_v11 = vld [vmem:[%s17124_s2 + $0x190] sm:$0xff] }
 0x427   : > { %11278 = vmatprep.mubr.msk.f32.mxu1 %vm602_vm1, %v3350_v0  ;;  %12238 = vmatpush3.bf16.msra.mxu1 %v12235_v51  ;;  %v3631_v51 = vrot.slane %v14628_v57, 1  ;;  %v9749_v0 = vld [vmem:[%s17124_s2 + $0x198] sm:$0xff] }
 0x428   : > { %12240 = vmatprep.subr.bf16.mxu1 %v12239_v43  ;;  %v12243_v61 = vpack.c.bf16 %v9749_v0, %v9748_v11  ;;  %v9759_v11 = vld [vmem:[%s17124_s2 + $0x1a8] sm:$0xff]  ;;  %v14891_v0 = vsel %vm869_vm3, %v3632_v23, %v3633_v9 }
 0x429   : > { %v12247_v48 = vpack.c.bf16 %v9759_v11, %v9758_v2  ;;  %v14922_v2 = vld [vmem:[%s17128_s6 + $0xa8] sm:$0xff] }
 0x42a   : > { %11279 = vmatmul.mubr.msk.f32.gmra.mrb[12].mxu1 %vm602_vm1, %v3351_v30  ;;  %v14859_v30 = vsel %vm869_vm3, %v3630_v62, %v3631_v51 }
 0x42b   : > { %11281 = vmatprep.mubr.msk.f32.mxu1 %vm602_vm1, %v3352_v46  ;;  %v14866_v46 = vld [vmem:[%s17128_s6 + $0x88] sm:$0xff] }
 0x42c   : > { %v3646_v13 = vmul.f32 %v14866_v46, %v14840_v34 }
 0x42e   : > { %11282 = vmatmul.mubr.msk.f32.gmra.mrb[14].mxu1 %vm602_vm1, %v3353_v15  ;;  %v14873_v15 = vld [vmem:[%s17128_s6 + $0x90] sm:$0xff] }
 0x42f   : > { %11292 = vmatprep.mubr.msk.f32.mxu1 %vm602_vm1, %v3645_v27  ;;  %v3647_v62 = vmul.f32 %v14873_v15, %v14859_v30  ;;  %v14879_v27 = vsel %vm869_vm3, %v3631_v51, %v3632_v23  ;;  %v14898_v51 = vld [vmem:[%s17128_s6 + $0x98] sm:$0xff]  ;;  %v14911_v23 = vsel %vm869_vm3, %v3633_v9, %v3634_v7 }
 0x430   : > { %v3648_v60 = vmul.f32 %v14898_v51, %v14879_v27  ;;  %v3650_v11 = vmul.f32 %v14922_v2, %v14911_v23  ;;  %v14942_v9 = vld [vmem:[%s17128_s6 + $0xb8] sm:$0xff] }
 0x432   : > { %11293 = vmatmul.mubr.msk.f32.vlgmr.msra.gmra.mrb[8].mxu1 %vm602_vm1, %v3646_v13  ;;  %v14905_v13 = vld [vmem:[%s17128_s6 + $0xa0] sm:$0xff] }
 0x433   : > { %12242 = vmatpush3.bf16.msra.mxu1 %v12239_v43  ;;  %11295 = vmatprep.mubr.msk.f32.mxu1 %vm602_vm1, %v3647_v62  ;;  %v3649_v43 = vmul.f32 %v14905_v13, %v14891_v0  ;;  %v14916_v62 = vsel %vm869_vm3, %v3634_v7, %v3635_v8 }
 0x434   : > { %12244 = vmatprep.subr.bf16.mxu1 %v12243_v61 }
 0x436   : > { %11296 = vmatmul.mubr.msk.f32.gmra.mrb[10].mxu1 %vm602_vm1, %v3648_v60  ;;  %v14929_v60 = vld [vmem:[%s17128_s6 + $0xb0] sm:$0xff] }
 0x437   : > { %11298 = vmatprep.mubr.msk.f32.mxu1 %vm602_vm1, %v3649_v43  ;;  %12246 = vmatpush3.bf16.msra.mxu1 %v12243_v61  ;;  %v3651_v7 = vmul.f32 %v14929_v60, %v14916_v62  ;;  %v14935_v61 = vsel %vm869_vm3, %v3635_v8, %v3636_v58  ;;  %v3794_v8 = vmul.f32 %v14949_v45, %v14724_v55  ;;  %v9760_v58 = vld [vmem:[%s17124_s2 + $0x1b0] sm:$0xff] }
 0x438   : > { %12248 = vmatprep.subr.bf16.mxu1 %v12247_v48  ;;  %v3652_v43 = vmul.f32 %v14942_v9, %v14935_v61 }
 0x43a   : > { %11299 = vmatmul.mubr.msk.f32.gmra.mrb[12].mxu1 %vm602_vm1, %v3650_v11  ;;  %v9761_v11 = vld [vmem:[%s17124_s2 + $0x1b8] sm:$0xff] }
 0x43b   : > { %11301 = vmatprep.mubr.msk.f32.mxu1 %vm602_vm1, %v3651_v7  ;;  %v14964_v7 = vld [vmem:[%s17128_s6 + $0xc8] sm:$0xff]  ;;  %v12251_v44 = vpack.c.bf16 %v9761_v11, %v9760_v58  ;;  %v14986_v58 = vld [vmem:[%s17128_s6 + $0xd8] sm:$0xff] }
 0x43c   : > { %v3795_v59 = vmul.f32 %v14964_v7, %v14743_v28  ;;  %v3797_v11 = vmul.f32 %v14986_v58, %v14775_v22 }
 0x43e   : > { %11302 = vmatmul.mubr.msk.f32.gmra.mrb[14].mxu1 %vm602_vm1, %v3652_v43  ;;  %v9770_v43 = vld [vmem:[%s17124_s2 + $0x1c0] sm:$0xff] }
 0x43f   : > { %11312 = vmatprep.mubr.msk.f32.mxu1 %vm602_vm1, %v3794_v8  ;;  %v9771_v8 = vld [vmem:[%s17124_s2 + $0x1c8] sm:$0xff] }
 0x440   : > { %v12255_v52 = vpack.c.bf16 %v9771_v8, %v9770_v43  ;;  %v15009_v43 = vld [vmem:[%s17128_s6 + $0xf0] sm:$0xff] }
 0x441   : > { %17348 = vst [vmem:[#allocation33_spill] sm:$0xff] %v15009_v43  ;;  %v3800_v8 = vmul.f32 %v15009_v43, %v14821_v42 }
 0x442   : > { %11313 = vmatmul.mubr.msk.f32.vlgmr.msra.gmra.mrb[8].mxu1 %vm602_vm1, %v3795_v59  ;;  %v15002_v59 = vld [vmem:[%s17128_s6 + $0xe8] sm:$0xff] }
 0x443   : > { %12250 = vmatpush3.bf16.msra.mxu1 %v12247_v48  ;;  %11315 = vmatprep.mubr.msk.f32.mxu1 %vm602_vm1, %v3796_v12  ;;  %v3798_v48 = vmul.f32 %v14993_v20, %v14795_v40  ;;  %17347 = vst [vmem:[#allocation32_spill] sm:$0xff] %v15002_v59  ;;  %v3799_v12 = vmul.f32 %v15002_v59, %v14800_v49  ;;  %v9795_v59 = vld [vmem:[%s17124_s2 + $0x208] sm:$0xff] }
 0x444   : > { %12252 = vmatprep.subr.bf16.mxu1 %v12251_v44 }
 0x446   : > { %11316 = vmatmul.mubr.msk.f32.gmra.mrb[10].mxu1 %vm602_vm1, %v3797_v11 }
 0x447   : > { %11318 = vmatprep.mubr.msk.f32.mxu1 %vm602_vm1, %v3798_v48  ;;  %12254 = vmatpush3.bf16.msra.mxu1 %v12251_v44  ;;  %v15018_v44 = vld [vmem:[%s17128_s6 + $0xf8] sm:$0xff]  ;;  %v9772_v48 = vld [vmem:[%s17124_s2 + $0x1d0] sm:$0xff] }
 0x448   : > { %12256 = vmatprep.subr.bf16.mxu1 %v12255_v52  ;;  %17349 = vst [vmem:[#allocation34_spill] sm:$0xff] %v15018_v44  ;;  %v3801_v11 = vmul.f32 %v15018_v44, %v14711_v4  ;;  %v15075_v44 = vld [vmem:[%s17128_s6 + $0x150] sm:$0xff] }
 0x449   : > { %17352 = vst [vmem:[#allocation37_spill] sm:$0xff] %v15075_v44  ;;  %v4086_v43 = vmul.f32 %v15075_v44, %v14879_v27 }
 0x44a   : > { %11319 = vmatmul.mubr.msk.f32.gmra.mrb[12].mxu1 %vm602_vm1, %v3799_v12  ;;  %v12259_v12 = vpack.c.bf16 %v9773_v38, %v9772_v48  ;;  %v15052_v38 = vld [vmem:[%s17128_s6 + $0x140] sm:$0xff]  ;;  %v9785_v48 = vld [vmem:[%s17124_s2 + $0x1f8] sm:$0xff] }
 0x44b   : > { %11321 = vmatprep.mubr.msk.f32.mxu1 %vm602_vm1, %v3800_v8  ;;  %v9782_v8 = vld [vmem:[%s17124_s2 + $0x1e0] sm:$0xff]  ;;  %17350 = vst [vmem:[#allocation35_spill] sm:$0xff] %v15052_v38 }
 0x44e   : > { %11322 = vmatmul.mubr.msk.f32.gmra.mrb[14].mxu1 %vm602_vm1, %v3801_v11  ;;  %v12263_v11 = vpack.c.bf16 %v9783_v10, %v9782_v8  ;;  %v4084_v10 = vmul.f32 %v15052_v38, %v14840_v34 }
 0x44f   : > { %11332 = vmatprep.mubr.msk.f32.mxu1 %vm602_vm1, %v14594_v54 }
 0x452   : > { %11333 = vmatmul.mubr.msk.f32.vlgmr.msra.gmra.mrb[8].mxu1 %vm602_vm1, %v14601_v3 }
 0x453   : > { %12258 = vmatpush3.bf16.msra.mxu1 %v12255_v52  ;;  %11335 = vmatprep.mubr.msk.f32.mxu1 %vm602_vm1, %v14628_v57  ;;  %v9784_v52 = vld [vmem:[%s17124_s2 + $0x1f0] sm:$0xff] }
 0x454   : > { %12260 = vmatprep.subr.bf16.mxu1 %v12259_v12  ;;  %v12267_v38 = vpack.c.bf16 %v9785_v48, %v9784_v52  ;;  %v15090_v52 = vld [vmem:[%s17128_s6 + $0x158] sm:$0xff] }
 0x455   : > { %v4087_v48 = vmul.f32 %v15090_v52, %v14891_v0 }
 0x456   : > { %11336 = vmatmul.mubr.msk.f32.gmra.mrb[10].mxu1 %vm602_vm1, %v14642_v16 }
 0x457   : > { %11338 = vmatprep.mubr.msk.f32.mxu1 %vm602_vm1, %v14669_v26  ;;  %12262 = vmatpush3.bf16.msra.mxu1 %v12259_v12  ;;  %v15068_v12 = vld [vmem:[%s17128_s6 + $0x148] sm:$0xff] }
 0x458   : > { %12264 = vmatprep.subr.bf16.mxu1 %v12263_v11  ;;  %17351 = vst [vmem:[#allocation36_spill] sm:$0xff] %v15068_v12  ;;  %v4085_v8 = vmul.f32 %v15068_v12, %v14859_v30  ;;  %v15097_v12 = vld [vmem:[%s17128_s6 + $0x160] sm:$0xff] }
 0x459   : > { %17353 = vst [vmem:[#allocation38_spill] sm:$0xff] %v15097_v12 }
 0x45a   : > { %11339 = vmatmul.mubr.msk.f32.gmra.mrb[12].mxu1 %vm602_vm1, %v14680_v24 }
 0x45b   : > { %11341 = vmatprep.mubr.msk.f32.mxu1 %vm602_vm1, %v14663_v6 }
 0x45e   : > { %11342 = vmatmul.mubr.msk.f32.gmra.mrb[14].mxu1 %vm602_vm1, %v14608_v17 }
 0x45f   : > { %11352 = vmatprep.mubr.msk.f32.mxu1 %vm602_vm1, %v4084_v10  ;;  %v9794_v10 = vld [vmem:[%s17124_s2 + $0x200] sm:$0xff] }
 0x460   : > { %v12271_v44 = vpack.c.bf16 %v9795_v59, %v9794_v10 }
 0x462   : > { %11353 = vmatmul.mubr.msk.f32.vlgmr.msra.gmra.mrb[8].mxu1 %vm602_vm1, %v4085_v8  ;;  %v15113_v8 = vld [vmem:[%s17128_s6 + $0x170] sm:$0xff] }
 0x463   : > { %12266 = vmatpush3.bf16.msra.mxu1 %v12263_v11  ;;  %11355 = vmatprep.mubr.msk.f32.mxu1 %vm602_vm1, %v4086_v43  ;;  %v4088_v11 = vmul.f32 %v15097_v12, %v14911_v23  ;;  %v15106_v43 = vld [vmem:[%s17128_s6 + $0x168] sm:$0xff]  ;;  %17355 = vst [vmem:[#allocation40_spill] sm:$0xff] %v15113_v8  ;;  %v4090_v10 = vmul.f32 %v15113_v8, %v14935_v61 }
 0x464   : > { %12268 = vmatprep.subr.bf16.mxu1 %v12267_v38  ;;  %17354 = vst [vmem:[#allocation39_spill] sm:$0xff] %v15106_v43  ;;  %v4089_v59 = vmul.f32 %v15106_v43, %v14916_v62  ;;  %v15151_v43 = vld [vmem:[%s17128_s6 + $0x190] sm:$0xff] }
 0x465   : > { %v4235_v12 = vmul.f32 %v15151_v43, %v14775_v22 }
 0x466   : > { %11356 = vmatmul.mubr.msk.f32.gmra.mrb[10].mxu1 %vm602_vm1, %v4087_v48 }
 0x467   : > { %11358 = vmatprep.mubr.msk.f32.mxu1 %vm602_vm1, %v4088_v11  ;;  %12270 = vmatpush3.bf16.msra.mxu1 %v12267_v38  ;;  %v15122_v38 = vld [vmem:[%s17128_s6 + $0x178] sm:$0xff]  ;;  %v15129_v11 = vld [vmem:[%s17128_s6 + $0x180] sm:$0xff] }
 0x468   : > { %12272 = vmatprep.subr.bf16.mxu1 %v12271_v44  ;;  %17356 = vst [vmem:[#allocation41_spill] sm:$0xff] %v15122_v38  ;;  %v4091_v48 = vmul.f32 %v15122_v38, %v14827_v19  ;;  %17357 = vst [vmem:[#allocation42_spill] sm:$0xff] %v15129_v11  ;;  %v4233_v8 = vmul.f32 %v15129_v11, %v14743_v28  ;;  %v15144_v38 = vld [vmem:[%s17128_s6 + $0x188] sm:$0xff] }
 0x469   : > { %v4234_v28 = vmul.f32 %v15144_v38, %v14763_v41  ;;  %v15166_v41 = vld [vmem:[%s17128_s6 + $0x198] sm:$0xff] }
 0x46a   : > { %11359 = vmatmul.mubr.msk.f32.gmra.mrb[12].mxu1 %vm602_vm1, %v4089_v59  ;;  %v9796_v59 = vld [vmem:[%s17124_s2 + $0x210] sm:$0xff]  ;;  %v4236_v22 = vmul.f32 %v15166_v41, %v14795_v40 }
 0x46b   : > { %11361 = vmatprep.mubr.msk.f32.mxu1 %vm602_vm1, %v4090_v10  ;;  %v9797_v10 = vld [vmem:[%s17124_s2 + $0x218] sm:$0xff] }
 0x46c   : > { %v12275_v11 = vpack.c.bf16 %v9797_v10, %v9796_v59  ;;  %v15173_v10 = vld [vmem:[%s17128_s6 + $0x1a0] sm:$0xff] }
 0x46e   : > { %11362 = vmatmul.mubr.msk.f32.gmra.mrb[14].mxu1 %vm602_vm1, %v4091_v48  ;;  %v9807_v48 = vld [vmem:[%s17124_s2 + $0x228] sm:$0xff] }
 0x46f   : > { %11372 = vmatprep.mubr.msk.f32.mxu1 %vm602_vm1, %v4233_v8  ;;  %v9806_v8 = vld [vmem:[%s17124_s2 + $0x220] sm:$0xff] }
 0x470   : > { %v12279_v59 = vpack.c.bf16 %v9807_v48, %v9806_v8  ;;  %v15205_v8 = vld [vmem:[%s17128_s6 + $0x1c0] sm:$0xff]  ;;  %v9808_v48 = vld [vmem:[%s17124_s2 + $0x230] sm:$0xff] }
 0x472   : > { %11373 = vmatmul.mubr.msk.f32.vlgmr.msra.gmra.mrb[8].mxu1 %vm602_vm1, %v4234_v28  ;;  %v15189_v28 = vld [vmem:[%s17128_s6 + $0x1b0] sm:$0xff] }
 0x473   : > { %12274 = vmatpush3.bf16.msra.mxu1 %v12271_v44  ;;  %11375 = vmatprep.mubr.msk.f32.mxu1 %vm602_vm1, %v4235_v12  ;;  %v4237_v44 = vmul.f32 %v15173_v10, %v14800_v49  ;;  %v15182_v12 = vld [vmem:[%s17128_s6 + $0x1a8] sm:$0xff]  ;;  %v4239_v49 = vmul.f32 %v15189_v28, %v14711_v4  ;;  %v4382_v4 = vmul.f32 %v15205_v8, %v14601_v3 }
 0x474   : > { %12276 = vmatprep.subr.bf16.mxu1 %v12275_v11  ;;  %v4238_v40 = vmul.f32 %v15182_v12, %v14821_v42 }
 0x476   : > { %11376 = vmatmul.mubr.msk.f32.gmra.mrb[10].mxu1 %vm602_vm1, %v4236_v22  ;;  %v9809_v22 = vld [vmem:[%s17124_s2 + $0x238] sm:$0xff] }
 0x477   : > { %11378 = vmatprep.mubr.msk.f32.mxu1 %vm602_vm1, %v4237_v44  ;;  %12278 = vmatpush3.bf16.msra.mxu1 %v12275_v11  ;;  %v15198_v11 = vld [vmem:[%s17128_s6 + $0x1b8] sm:$0xff] }
 0x478   : > { %12280 = vmatprep.subr.bf16.mxu1 %v12279_v59  ;;  %v4240_v42 = vmul.f32 %v15198_v11, %v14724_v55  ;;  %v15220_v55 = vld [vmem:[%s17128_s6 + $0x1c8] sm:$0xff] }
 0x479   : > { %v4383_v44 = vmul.f32 %v15220_v55, %v14628_v57  ;;  %v9821_v57 = vld [vmem:[%s17125_s3 + $0x128] sm:$0xff] }
 0x47a   : > { %11379 = vmatmul.mubr.msk.f32.gmra.mrb[12].mxu1 %vm602_vm1, %v4238_v40  ;;  %v12283_v40 = vpack.c.bf16 %v9809_v22, %v9808_v48  ;;  %v15243_v48 = vld [vmem:[%s17128_s6 + $0x1e0] sm:$0xff] }
 0x47b   : > { %11381 = vmatprep.mubr.msk.f32.mxu1 %vm602_vm1, %v4239_v49  ;;  %v15227_v49 = vld [vmem:[%s17128_s6 + $0x1d0] sm:$0xff]  ;;  %17360 = vst [vmem:[#allocation45_spill] sm:$0xff] %v15243_v48  ;;  %v4386_v22 = vmul.f32 %v15243_v48, %v14680_v24 }
 0x47c   : > { %17358 = vst [vmem:[#allocation43_spill] sm:$0xff] %v15227_v49  ;;  %v4384_v3 = vmul.f32 %v15227_v49, %v14642_v16 }
 0x47e   : > { %11382 = vmatmul.mubr.msk.f32.gmra.mrb[14].mxu1 %vm602_vm1, %v4240_v42  ;;  %v15236_v42 = vld [vmem:[%s17128_s6 + $0x1d8] sm:$0xff] }
 0x47f   : > { %11392 = vmatprep.mubr.msk.f32.mxu1 %vm602_vm1, %v4382_v4  ;;  %17359 = vst [vmem:[#allocation44_spill] sm:$0xff] %v15236_v42  ;;  %v4385_v4 = vmul.f32 %v15236_v42, %v14669_v26  ;;  %v9822_v42 = vld [vmem:[%s17125_s3 + $0x130] sm:$0xff] }
 0x482   : > { %11393 = vmatmul.mubr.msk.f32.vlgmr.msra.gmra.mrb[8].mxu1 %vm602_vm1, %v4383_v44  ;;  %v15259_v44 = vld [vmem:[%s17128_s6 + $0x1f0] sm:$0xff] }
 0x483   : > { %12282 = vmatpush3.bf16.msra.mxu1 %v12279_v59  ;;  %11395 = vmatprep.mubr.msk.f32.mxu1 %vm602_vm1, %v4384_v3  ;;  %v15252_v3 = vld [vmem:[%s17128_s6 + $0x1e8] sm:$0xff]  ;;  %17362 = vst [vmem:[#allocation47_spill] sm:$0xff] %v15259_v44  ;;  %v4388_v24 = vmul.f32 %v15259_v44, %v14608_v17 }
 0x484   : > { %12284 = vmatprep.subr.bf16.mxu1 %v12283_v40  ;;  %17361 = vst [vmem:[#allocation46_spill] sm:$0xff] %v15252_v3  ;;  %v4387_v59 = vmul.f32 %v15252_v3, %v14663_v6  ;;  %v15291_v6 = vld [vmem:[%s17128_s6 + $0x210] sm:$0xff] }
 0x485   : > { %17366 = vst [vmem:[#allocation51_spill] sm:$0xff] %v15291_v6 }
 0x486   : > { %11396 = vmatmul.mubr.msk.f32.gmra.mrb[10].mxu1 %vm602_vm1, %v4385_v4 }
 0x487   : > { %11398 = vmatprep.mubr.msk.f32.mxu1 %vm602_vm1, %v4386_v22  ;;  %12286 = vmatpush3.bf16.msra.mxu1 %v12283_v40  ;;  %v15268_v40 = vld [vmem:[%s17128_s6 + $0x1f8] sm:$0xff]  ;;  %v15275_v22 = vld [vmem:[%s17128_s6 + $0x200] sm:$0xff] }
 0x488   : > { %17363 = vst [vmem:[#allocation48_spill] sm:$0xff] %v15268_v40  ;;  %v4389_v4 = vmul.f32 %v15268_v40, %v14594_v54  ;;  %17364 = vst [vmem:[#allocation49_spill] sm:$0xff] %v15275_v22  ;;  %v4531_v26 = vmul.f32 %v15275_v22, %v14859_v30  ;;  %v4533_v30 = vmul.f32 %v15291_v6, %v14891_v0 }
 0x48a   : > { %11399 = vmatmul.mubr.msk.f32.gmra.mrb[12].mxu1 %vm602_vm1, %v4387_v59 }
 0x48b   : > { %11401 = vmatprep.mubr.msk.f32.mxu1 %vm602_vm1, %v4388_v24  ;;  %v15284_v24 = vld [vmem:[%s17128_s6 + $0x208] sm:$0xff] }
 0x48c   : > { %17365 = vst [vmem:[#allocation50_spill] sm:$0xff] %v15284_v24  ;;  %v4532_v59 = vmul.f32 %v15284_v24, %v14879_v27 }
 0x48e   : > { %11402 = vmatmul.mubr.msk.f32.gmra.mrb[14].mxu1 %vm602_vm1, %v4389_v4  ;;  %v15307_v4 = vld [vmem:[%s17128_s6 + $0x220] sm:$0xff] }
 0x48f   : > { %11412 = vmatprep.mubr.msk.f32.mxu1 %vm602_vm1, %v4531_v26  ;;  %v15300_v26 = vld [vmem:[%s17128_s6 + $0x218] sm:$0xff]  ;;  %17368 = vst [vmem:[#allocation53_spill] sm:$0xff] %v15307_v4  ;;  %v4535_v0 = vmul.f32 %v15307_v4, %v14916_v62  ;;  %v4701_v4 = vstv %s9819_s23 }
 0x490   : > { %17367 = vst [vmem:[#allocation52_spill] sm:$0xff] %v15300_v26  ;;  %v4534_v27 = vmul.f32 %v15300_v26, %v14911_v23 }
 0x492   : > { %11413 = vmatmul.mubr.msk.f32.vlgmr.msra.gmra.mrb[8].mxu1 %vm602_vm1, %v4532_v59  ;;  %v15316_v59 = vld [vmem:[%s17128_s6 + $0x228] sm:$0xff] }
 0x493   : > { %11415 = vmatprep.mubr.msk.f32.mxu1 %vm602_vm1, %v4533_v30  ;;  %17369 = vst [vmem:[#allocation54_spill] sm:$0xff] %v15316_v59  ;;  %v4536_v23 = vmul.f32 %v15316_v59, %v14935_v61  ;;  %v15323_v30 = vld [vmem:[%s17128_s6 + $0x230] sm:$0xff] }
 0x494   : > { %17370 = vst [vmem:[#allocation55_spill] sm:$0xff] %v15323_v30  ;;  %v4537_v62 = vmul.f32 %v15323_v30, %v14827_v19  ;;  %v9825_v19 = vld [vmem:[%s17125_s3 + $0x148] sm:$0xff] }
 0x496   : > { %11416 = vmatmul.mubr.msk.f32.gmra.mrb[10].mxu1 %vm602_vm1, %v4534_v27  ;;  %v15332_v27 = vld [vmem:[%s17128_s6 + $0x238] sm:$0xff] }
 0x497   : > { %11418 = vmatprep.mubr.msk.f32.mxu1 %vm602_vm1, %v4535_v0  ;;  %17371 = vst [vmem:[#allocation56_spill] sm:$0xff] %v15332_v27  ;;  %v4538_v61 = vmul.f32 %v15332_v27, %v14840_v34  ;;  %v9824_v0 = vld [vmem:[%s17125_s3 + $0x140] sm:$0xff]  ;;  %v9827_v34 = vld [vmem:[%s17125_s3 + $0x158] sm:$0xff] }
 0x498   : > { %v9818_v27 = vld [vmem:[%s17127_s5 + $0x3] ss:$0 sm:$0xff] }
 0x49a   : > { %11419 = vmatmul.mubr.msk.f32.gmra.mrb[12].mxu1 %vm602_vm1, %v4536_v23  ;;  %v12287_v23 = vpack.c.bf16 %v9825_v19, %v9824_v0 }
 0x49b   : > { %11421 = vmatprep.mubr.msk.f32.mxu1 %vm602_vm1, %v4537_v62  ;;  %v9826_v62 = vld [vmem:[%s17125_s3 + $0x150] sm:$0xff] }
 0x49c   : > { %12288 = vmatprep.subr.bf16.mxu0 %v12287_v23  ;;  %v12291_v16 = vpack.c.bf16 %v9827_v34, %v9826_v62 }
 0x49d   : > { %12290 = vmatpush3.bf16.msra.mxu0 %v12287_v23 }
 0x49e   : > { %11422 = vmatmul.mubr.msk.f32.gmra.mrb[14].mxu1 %vm602_vm1, %v4538_v61  ;;  %v9820_v61 = vld [vmem:[%s17125_s3 + $0x120] sm:$0xff]  ;;  %12292 = vmatprep.subr.bf16.mxu0 %v12291_v16 }
 0x49f   : > { %v12295_v0 = vpack.c.bf16 %v9821_v57, %v9820_v61 }
 0x4a1   : > { %12294 = vmatpush3.bf16.msra.mxu0 %v12291_v16 }
 0x4a2   : > { %12296 = vmatprep.subr.bf16.mxu0 %v12295_v0 }
 0x565   : > { %v11414_v19 = vpop.f32.mrb[8].mxu1 }
 0x566   : > { %v4633_v23 = vpop.f32.mrb[9].mxu1  ;;  %v4685_v59 = vadd.f32 %v11414_v19, %v9818_v27 }
 0x567   : > { %v4684_v62 = vadd.f32 %v9818_v27, %v4633_v23 }
 0x568   : > { %v4703_v6 = vmul.f32 %v4701_v4, %v4685_v59  ;;  %vm4694_vm12 = vcmp.gt.f32.partialorder %v4685_v59, 0.0 }
 0x569   : > { %v11417_v17 = vpop.f32.mrb[10].mxu1  ;;  %v4702_v57 = vmul.f32 %v4701_v4, %v4684_v62  ;;  %vm4693_vm13 = vcmp.gt.f32.partialorder %v4684_v62, 0.0 }
 0x56a   : > { %v4643_v54 = vpop.f32.mrb[11].mxu1  ;;  %v4687_v22 = vadd.f32 %v11417_v17, %v9818_v27  ;;  %v15358_v3 = vsel %vm4694_vm12, %v4685_v59, %v4703_v6 }
 0x56b   : > { %v4686_v61 = vadd.f32 %v9818_v27, %v4643_v54  ;;  %v15360_v48 = vsel %vm4693_vm13, %v4684_v62, %v4702_v57  ;;  %v9823_v54 = vld [vmem:[%s17125_s3 + $0x138] sm:$0xff] }
 0x56c   : > { %vm4696_vm0 = vcmp.gt.f32.partialorder %v4687_v22, 0.0  ;;  %v4749_v59 = vmul.f32 %v14636_v56, %v15360_v48  ;;  %v12299_v62 = vpack.c.bf16 %v9823_v54, %v9822_v42 }
 0x56d   : > { %v11420_v30 = vpop.f32.mrb[12].mxu1  ;;  %v4704_v19 = vmul.f32 %v4701_v4, %v4686_v61  ;;  %vm4695_vm15 = vcmp.gt.f32.partialorder %v4686_v61, 0.0 }
 0x56e   : > { %v4653_v34 = vpop.f32.mrb[13].mxu1  ;;  %v4689_v17 = vadd.f32 %v11420_v30, %v9818_v27  ;;  %v4750_v30 = vmul.f32 %v14651_v1, %v15358_v3 }
 0x56f   : > { %v4688_v23 = vadd.f32 %v9818_v27, %v4653_v34  ;;  %v15374_v34 = vsel %vm4695_vm15, %v4686_v61, %v4704_v19 }
 0x570   : > { %v4707_v56 = vmul.f32 %v4701_v4, %v4689_v17  ;;  %vm4698_vm6 = vcmp.gt.f32.partialorder %v4689_v17, 0.0  ;;  %v4751_v1 = vmul.f32 %v14674_v50, %v15374_v34 }
 0x571   : > { %v11423_v26 = vpop.f32.mrb[14].mxu1  ;;  %v4706_v57 = vmul.f32 %v4701_v4, %v4688_v23  ;;  %vm4697_vm5 = vcmp.gt.f32.partialorder %v4688_v23, 0.0 }
 0x572   : > { %v4691_v16 = vadd.f32 %v11423_v26, %v9818_v27  ;;  %v4663_v24 = vpop.f32.mrb[15].mxu1  ;;  %v4705_v26 = vmul.f32 %v4701_v4, %v4687_v22 }
 0x573   : > { %v4690_v40 = vadd.f32 %v9818_v27, %v4663_v24 }
 0x574   : > { %vm4700_vm14 = vcmp.gt.f32.partialorder %v4691_v16, 0.0  ;;  %v4709_v44 = vmul.f32 %v4701_v4, %v4691_v16  ;;  %v15385_v27 = vsel %vm4696_vm0, %v4687_v22, %v4705_v26 }
 0x575   : > { %v4708_v6 = vmul.f32 %v4701_v4, %v4690_v40  ;;  %vm4699_vm4 = vcmp.gt.f32.partialorder %v4690_v40, 0.0  ;;  %v4752_v22 = vmul.f32 %v14685_v36, %v15385_v27  ;;  %v15397_v4 = vsel %vm4698_vm6, %v4689_v17, %v4707_v56  ;;  %v9857_v56 = vld [vmem:[%s17125_s3 + $0x188] sm:$0xff] }
 0x576   : > { %v15368_v49 = vsel %vm4700_vm14, %v4691_v16, %v4709_v44  ;;  %v9844_v44 = vld [vmem:[%s17125_s3 + $0x160] sm:$0xff]  ;;  %v15393_v16 = vsel %vm4697_vm5, %v4688_v23, %v4706_v57  ;;  %v4720_v36 = vrot.slane %v15358_v3, 7  ;;  %v4719_v23 = vrot.slane %v15360_v48, 7 }
 0x577   : > { %v4748_v24 = vmul.f32 %v14622_v25, %v15368_v49  ;;  %v9845_v25 = vld [vmem:[%s17125_s3 + $0x168] sm:$0xff]  ;;  %v15388_v42 = vsel %vm4699_vm4, %v4690_v40, %v4708_v6  ;;  %v4726_v19 = vrot.slane %v15368_v49, 7  ;;  %v4753_v50 = vmul.f32 %v14696_v47, %v15393_v16  ;;  %v9846_v6 = vld [vmem:[%s17125_s3 + $0x170] sm:$0xff] }
 0x578   : > { %v12303_v61 = vpack.c.bf16 %v9845_v25, %v9844_v44  ;;  %v4725_v40 = vrot.slane %v15388_v42, 7  ;;  %v4755_v26 = vmul.f32 %v14718_v39, %v15388_v42  ;;  %v4721_v47 = vrot.slane %v15374_v34, 7  ;;  %v9856_v25 = vld [vmem:[%s17125_s3 + $0x180] sm:$0xff] }
 0x579   : > { %11432 = vmatprep.mubr.msk.f32.mxu0 %vm602_vm1, %v4748_v24  ;;  %v9847_v24 = vld [vmem:[%s17125_s3 + $0x178] sm:$0xff]  ;;  %v15434_v39 = vsel %vm569_vm2, %v4719_v23, %v4720_v36  ;;  %v4723_v57 = vrot.slane %v15393_v16, 7 }
 0x57a   : > { %11433 = vmatmul.mubr.msk.f32.vlgmr.msra.gmra.mrb[24].mxu0 %vm602_vm1, %v4749_v59  ;;  %v15412_v54 = vsel %vm569_vm2, %v4725_v40, %v4726_v19  ;;  %v4722_v59 = vrot.slane %v15385_v27, 7  ;;  %v15444_v44 = vsel %vm569_vm2, %v4720_v36, %v4721_v47  ;;  %v5019_v36 = vrot.slane %v15358_v3, 1 }
 0x57b   : > { %12298 = vmatpush3.bf16.msra.mxu0 %v12295_v0  ;;  %11435 = vmatprep.mubr.msk.f32.mxu0 %vm602_vm1, %v4750_v30  ;;  %v4754_v0 = vmul.f32 %v14703_v53, %v15397_v4  ;;  %v15420_v53 = vsel %vm569_vm2, %v4726_v19, %v4719_v23  ;;  %v4735_v17 = vmul.f32 %v14729_v35, %v15412_v54 }
 0x57c   : > { %12300 = vmatprep.subr.bf16.mxu0 %v12299_v62  ;;  %v4736_v35 = vmul.f32 %v14750_v29, %v15420_v53  ;;  %v4737_v30 = vmul.f32 %v14757_v21, %v15434_v39  ;;  %v4724_v29 = vrot.slane %v15397_v4, 7  ;;  %v4738_v21 = vmul.f32 %v14782_v5, %v15444_v44 }
 0x57d   : > { %v5018_v5 = vrot.slane %v15360_v48, 1 }
 0x57e   : > { %11436 = vmatmul.mubr.msk.f32.gmra.mrb[26].mxu0 %vm602_vm1, %v4751_v1  ;;  %v15456_v1 = vsel %vm569_vm2, %v4721_v47, %v4722_v59  ;;  %v5020_v47 = vrot.slane %v15374_v34, 1 }
 0x57f   : > { %11438 = vmatprep.mubr.msk.f32.mxu0 %vm602_vm1, %v4752_v22  ;;  %12302 = vmatpush3.bf16.msra.mxu0 %v12299_v62  ;;  %v12307_v62 = vpack.c.bf16 %v9847_v24, %v9846_v6  ;;  %v12311_v22 = vpack.c.bf16 %v9857_v56, %v9856_v25  ;;  %v4739_v19 = vmul.f32 %v14789_v14, %v15456_v1  ;;  %v9858_v24 = vld [vmem:[%s17125_s3 + $0x190] sm:$0xff]  ;;  %v9868_v56 = vld [vmem:[%s17125_s3 + $0x1a0] sm:$0xff] }
 0x580   : > { %12304 = vmatprep.subr.bf16.mxu0 %v12303_v61 }
 0x582   : > { %11439 = vmatmul.mubr.msk.f32.gmra.mrb[28].mxu0 %vm602_vm1, %v4753_v50  ;;  %v15465_v50 = vsel %vm569_vm2, %v4722_v59, %v4723_v57  ;;  %v9859_v59 = vld [vmem:[%s17125_s3 + $0x198] sm:$0xff] }
 0x583   : > { %11441 = vmatprep.mubr.msk.f32.mxu0 %vm602_vm1, %v4754_v0  ;;  %v5025_v0 = vrot.slane %v15368_v49, 1  ;;  %v4740_v14 = vmul.f32 %v14807_v18, %v15465_v50 }
 0x586   : > { %11442 = vmatmul.mubr.msk.f32.gmra.mrb[30].mxu0 %vm602_vm1, %v4755_v26  ;;  %v15482_v26 = vsel %vm569_vm2, %v4724_v29, %v4725_v40  ;;  %v5021_v40 = vrot.slane %v15385_v27, 1 }
 0x587   : > { %11452 = vmatprep.mubr.msk.f32.mxu0 %vm602_vm1, %v4735_v17  ;;  %v15488_v17 = vsel %vm869_vm3, %v5025_v0, %v5018_v5  ;;  %v4742_v18 = vmul.f32 %v14834_v33, %v15482_v26  ;;  %v15510_v33 = vsel %vm869_vm3, %v5019_v36, %v5020_v47 }
 0x588   : > { %v5034_v6 = vmul.f32 %v14845_v63, %v15488_v17  ;;  %v15520_v25 = vsel %vm869_vm3, %v5020_v47, %v5021_v40  ;;  %v5183_v47 = vmul.f32 %v14949_v45, %v15420_v53  ;;  %v9880_v45 = vld [vmem:[%s17125_s3 + $0x1c0] sm:$0xff] }
 0x58a   : > { %11453 = vmatmul.mubr.msk.f32.vlgmr.msra.gmra.mrb[24].mxu0 %vm602_vm1, %v4736_v35  ;;  %v5022_v35 = vrot.slane %v15393_v16, 1 }
 0x58b   : > { %12306 = vmatpush3.bf16.msra.mxu0 %v12303_v61  ;;  %11455 = vmatprep.mubr.msk.f32.mxu0 %vm602_vm1, %v4737_v30  ;;  %v15471_v61 = vsel %vm569_vm2, %v4723_v57, %v4724_v29  ;;  %v5023_v57 = vrot.slane %v15397_v4, 1  ;;  %v5036_v30 = vmul.f32 %v14873_v15, %v15510_v33  ;;  %v9869_v29 = vld [vmem:[%s17125_s3 + $0x1a8] sm:$0xff]  ;;  %v5037_v15 = vmul.f32 %v14898_v51, %v15520_v25 }
 0x58c   : > { %12308 = vmatprep.subr.bf16.mxu0 %v12307_v62  ;;  %v4741_v23 = vmul.f32 %v14815_v37, %v15471_v61  ;;  %v15495_v37 = vsel %vm869_vm3, %v5018_v5, %v5019_v36 }
 0x58d   : > { %v5035_v63 = vmul.f32 %v14866_v46, %v15495_v37  ;;  %v5024_v46 = vrot.slane %v15388_v42, 1 }
 0x58e   : > { %11456 = vmatmul.mubr.msk.f32.gmra.mrb[26].mxu0 %vm602_vm1, %v4738_v21  ;;  %v15532_v21 = vsel %vm869_vm3, %v5021_v40, %v5022_v35  ;;  %v9881_v40 = vld [vmem:[%s17125_s3 + $0x1c8] sm:$0xff] }
 0x58f   : > { %11458 = vmatprep.mubr.msk.f32.mxu0 %vm602_vm1, %v4739_v19  ;;  %12310 = vmatpush3.bf16.msra.mxu0 %v12307_v62  ;;  %v12315_v62 = vpack.c.bf16 %v9859_v59, %v9858_v24  ;;  %v12319_v19 = vpack.c.bf16 %v9869_v29, %v9868_v56  ;;  %v5038_v5 = vmul.f32 %v14905_v13, %v15532_v21  ;;  %v17372_v24 = vld [vmem:[#allocation32_spill] sm:$0xff]  ;;  %v9893_v29 = vld [vmem:[%s17125_s3 + $0x1e8] sm:$0xff] }
 0x590   : > { %12312 = vmatprep.subr.bf16.mxu0 %v12311_v22  ;;  %v15546_v36 = vsel %vm869_vm3, %v5023_v57, %v5024_v46  ;;  %v5188_v59 = vmul.f32 %v17372_v24, %v15471_v61  ;;  %v9892_v56 = vld [vmem:[%s17125_s3 + $0x1e0] sm:$0xff] }
 0x591   : > { %v5040_v13 = vmul.f32 %v14929_v60, %v15546_v36  ;;  %v9871_v60 = vld [vmem:[%s17125_s3 + $0x1b8] sm:$0xff]  ;;  %v17380_v24 = vld [vmem:[#allocation40_spill] sm:$0xff] }
 0x592   : > { %11459 = vmatmul.mubr.msk.f32.gmra.mrb[28].mxu0 %vm602_vm1, %v4740_v14  ;;  %v15541_v14 = vsel %vm869_vm3, %v5022_v35, %v5023_v57  ;;  %v17373_v35 = vld [vmem:[#allocation33_spill] sm:$0xff]  ;;  %v9883_v57 = vld [vmem:[%s17125_s3 + $0x1d8] sm:$0xff] }
 0x593   : > { %11461 = vmatprep.mubr.msk.f32.mxu0 %vm602_vm1, %v4741_v23  ;;  %v5039_v51 = vmul.f32 %v14922_v2, %v15541_v14  ;;  %v9870_v2 = vld [vmem:[%s17125_s3 + $0x1b0] sm:$0xff] }
 0x596   : > { %11462 = vmatmul.mubr.msk.f32.gmra.mrb[30].mxu0 %vm602_vm1, %v4742_v18  ;;  %v12323_v18 = vpack.c.bf16 %v9871_v60, %v9870_v2  ;;  %v17377_v2 = vld [vmem:[#allocation37_spill] sm:$0xff] }
 0x597   : > { %11472 = vmatprep.mubr.msk.f32.mxu0 %vm602_vm1, %v5034_v6  ;;  %v12327_v6 = vpack.c.bf16 %v9881_v40, %v9880_v45  ;;  %v5475_v60 = vmul.f32 %v17377_v2, %v15520_v25  ;;  %v17378_v40 = vld [vmem:[#allocation38_spill] sm:$0xff] }
 0x598   : > { %v17394_v2 = vld [vmem:[#allocation54_spill] sm:$0xff] }
 0x59a   : > { %11473 = vmatmul.mubr.msk.f32.vlgmr.msra.gmra.mrb[24].mxu0 %vm602_vm1, %v5035_v63  ;;  %v5189_v63 = vmul.f32 %v17373_v35, %v15482_v26 }
 0x59b   : > { %12314 = vmatpush3.bf16.msra.mxu0 %v12311_v22  ;;  %11475 = vmatprep.mubr.msk.f32.mxu0 %vm602_vm1, %v5036_v30  ;;  %v15555_v22 = vsel %vm869_vm3, %v5024_v46, %v5025_v0  ;;  %v5184_v0 = vmul.f32 %v14964_v7, %v15434_v39  ;;  %v5186_v7 = vmul.f32 %v14986_v58, %v15456_v1  ;;  %v17374_v58 = vld [vmem:[#allocation34_spill] sm:$0xff] }
 0x59c   : > { %12316 = vmatprep.subr.bf16.mxu0 %v12315_v62  ;;  %v5041_v23 = vmul.f32 %v14942_v9, %v15555_v22  ;;  %v5185_v9 = vmul.f32 %v14971_v31, %v15444_v44  ;;  %v5187_v31 = vmul.f32 %v14993_v20, %v15465_v50  ;;  %v9882_v20 = vld [vmem:[%s17125_s3 + $0x1d0] sm:$0xff]  ;;  %v12335_v46 = vpack.c.bf16 %v9893_v29, %v9892_v56  ;;  %v9917_v29 = vld [vmem:[%s17125_s3 + $0x228] sm:$0xff] }
 0x59d   : > { %v12331_v30 = vpack.c.bf16 %v9883_v57, %v9882_v20  ;;  %v9907_v20 = vld [vmem:[%s17125_s3 + $0x218] sm:$0xff]  ;;  %v5623_v57 = vmul.f32 %v15144_v38, %v15444_v44  ;;  %v5624_v56 = vmul.f32 %v15151_v43, %v15456_v1  ;;  %v5625_v38 = vmul.f32 %v15166_v41, %v15465_v50  ;;  %v9918_v50 = vld [vmem:[%s17125_s3 + $0x230] sm:$0xff] }
 0x59e   : > { %11476 = vmatmul.mubr.msk.f32.gmra.mrb[26].mxu0 %vm602_vm1, %v5037_v15  ;;  %v17375_v15 = vld [vmem:[#allocation35_spill] sm:$0xff]  ;;  %v5626_v43 = vmul.f32 %v15173_v10, %v15471_v61  ;;  %v5627_v1 = vmul.f32 %v15182_v12, %v15482_v26  ;;  %v5629_v41 = vmul.f32 %v15198_v11, %v15420_v53  ;;  %v5771_v10 = vmul.f32 %v15205_v8, %v15358_v3  ;;  %v17384_v8 = vld [vmem:[#allocation44_spill] sm:$0xff]  ;;  %v17385_v61 = vld [vmem:[#allocation45_spill] sm:$0xff] }
 0x59f   : > { %11478 = vmatprep.mubr.msk.f32.mxu0 %vm602_vm1, %v5038_v5  ;;  %12318 = vmatpush3.bf16.msra.mxu0 %v12315_v62  ;;  %v5190_v62 = vmul.f32 %v17374_v58, %v15412_v54  ;;  %v9894_v5 = vld [vmem:[%s17125_s3 + $0x1f0] sm:$0xff]  ;;  %v9919_v12 = vld [vmem:[%s17125_s3 + $0x238] sm:$0xff]  ;;  %v5775_v26 = vmul.f32 %v17385_v61, %v15397_v4 }
 0x5a0   : > { %12320 = vmatprep.subr.bf16.mxu0 %v12319_v19  ;;  %v17383_v11 = vld [vmem:[#allocation43_spill] sm:$0xff]  ;;  %v9931_v61 = vld [vmem:[%s17124_s2 + $0x250] sm:$0xff] }
 0x5a1   : > { %v5773_v53 = vmul.f32 %v17383_v11, %v15385_v27  ;;  %v17403_v11 = vld [vmem:[#allocation27_spill] sm:$0xff] }
 0x5a2   : > { %11479 = vmatmul.mubr.msk.f32.gmra.mrb[28].mxu0 %vm602_vm1, %v5039_v51  ;;  %v9895_v51 = vld [vmem:[%s17125_s3 + $0x1f8] sm:$0xff] }
 0x5a3   : > { %11481 = vmatprep.mubr.msk.f32.mxu0 %vm602_vm1, %v5040_v13  ;;  %v17376_v13 = vld [vmem:[#allocation36_spill] sm:$0xff] }
 0x5a6   : > { %11482 = vmatmul.mubr.msk.f32.gmra.mrb[30].mxu0 %vm602_vm1, %v5041_v23  ;;  %v5474_v23 = vmul.f32 %v17376_v13, %v15510_v33  ;;  %v17391_v13 = vld [vmem:[#allocation51_spill] sm:$0xff] }
 0x5a7   : > { %11492 = vmatprep.mubr.msk.f32.mxu0 %vm602_vm1, %v5183_v47  ;;  %v12339_v47 = vpack.c.bf16 %v9895_v51, %v9894_v5  ;;  %v17390_v51 = vld [vmem:[#allocation50_spill] sm:$0xff] }
 0x5aa   : > { %11493 = vmatmul.mubr.msk.f32.vlgmr.msra.gmra.mrb[24].mxu0 %vm602_vm1, %v5184_v0  ;;  %v9904_v0 = vld [vmem:[%s17125_s3 + $0x200] sm:$0xff] }
 0x5ab   : > { %12322 = vmatpush3.bf16.msra.mxu0 %v12319_v19  ;;  %11495 = vmatprep.mubr.msk.f32.mxu0 %vm602_vm1, %v5185_v9  ;;  %v5473_v19 = vmul.f32 %v17375_v15, %v15495_v37  ;;  %v5476_v9 = vmul.f32 %v15090_v52, %v15532_v21  ;;  %v17381_v52 = vld [vmem:[#allocation41_spill] sm:$0xff] }
 0x5ac   : > { %12324 = vmatprep.subr.bf16.mxu0 %v12323_v18  ;;  %v5480_v35 = vmul.f32 %v17381_v52, %v15488_v17 }
 0x5ae   : > { %11496 = vmatmul.mubr.msk.f32.gmra.mrb[26].mxu0 %vm602_vm1, %v5186_v7  ;;  %v5477_v7 = vmul.f32 %v17378_v40, %v15541_v14  ;;  %v9930_v40 = vld [vmem:[%s17124_s2 + $0x248] sm:$0xff] }
 0x5af   : > { %11498 = vmatprep.mubr.msk.f32.mxu0 %vm602_vm1, %v5187_v31  ;;  %12326 = vmatpush3.bf16.msra.mxu0 %v12323_v18  ;;  %v9905_v18 = vld [vmem:[%s17125_s3 + $0x208] sm:$0xff] }
 0x5b0   : > { %12328 = vmatprep.subr.bf16.mxu0 %v12327_v6  ;;  %v12343_v45 = vpack.c.bf16 %v9905_v18, %v9904_v0  ;;  %v17396_v0 = vld [vmem:[#allocation56_spill] sm:$0xff] }
 0x5b2   : > { %11499 = vmatmul.mubr.msk.f32.gmra.mrb[28].mxu0 %vm602_vm1, %v5188_v59  ;;  %v5479_v59 = vmul.f32 %v17380_v24, %v15555_v22 }
 0x5b3   : > { %11501 = vmatprep.mubr.msk.f32.mxu0 %vm602_vm1, %v5189_v63  ;;  %v17382_v63 = vld [vmem:[#allocation42_spill] sm:$0xff] }
 0x5b4   : > { %v5622_v58 = vmul.f32 %v17382_v63, %v15434_v39  ;;  %v9916_v39 = vld [vmem:[%s17125_s3 + $0x220] sm:$0xff] }
 0x5b5   : > { %v12351_v44 = vpack.c.bf16 %v9917_v29, %v9916_v39  ;;  %v17398_v39 = vld [vmem:[#allocation21_spill] sm:$0xff] }
 0x5b6   : > { %11502 = vmatmul.mubr.msk.f32.gmra.mrb[30].mxu0 %vm602_vm1, %v5190_v62  ;;  %v9906_v62 = vld [vmem:[%s17125_s3 + $0x210] sm:$0xff] }
 0x5b7   : > { %11512 = vmatprep.mubr.msk.f32.mxu0 %vm602_vm1, %v15360_v48 }
 0x5ba   : > { %11513 = vmatmul.mubr.msk.f32.vlgmr.msra.gmra.mrb[24].mxu0 %vm602_vm1, %v15358_v3  ;;  %v5774_v3 = vmul.f32 %v17384_v8, %v15393_v16 }
 0x5bb   : > { %12330 = vmatpush3.bf16.msra.mxu0 %v12327_v6  ;;  %11515 = vmatprep.mubr.msk.f32.mxu0 %vm602_vm1, %v15374_v34  ;;  %v17379_v6 = vld [vmem:[#allocation39_spill] sm:$0xff] }
 0x5bc   : > { %12332 = vmatprep.subr.bf16.mxu0 %v12331_v30  ;;  %v5478_v31 = vmul.f32 %v17379_v6, %v15546_v36 }
 0x5be   : > { %11516 = vmatmul.mubr.msk.f32.gmra.mrb[26].mxu0 %vm602_vm1, %v15385_v27  ;;  %v17387_v27 = vld [vmem:[#allocation47_spill] sm:$0xff] }
 0x5bf   : > { %11518 = vmatprep.mubr.msk.f32.mxu0 %vm602_vm1, %v15393_v16  ;;  %12334 = vmatpush3.bf16.msra.mxu0 %v12331_v30  ;;  %v12347_v30 = vpack.c.bf16 %v9907_v20, %v9906_v62  ;;  %v5777_v15 = vmul.f32 %v17387_v27, %v15368_v49  ;;  %v17388_v16 = vld [vmem:[#allocation48_spill] sm:$0xff]  ;;  %v17397_v20 = vld [vmem:[#allocation19_spill] sm:$0xff] }
 0x5c0   : > { %12336 = vmatprep.subr.bf16.mxu0 %v12335_v46  ;;  %v15812_v27 = vld [vmem:[%s17128_s6 + $0x40] sm:$0xff] }
 0x5c2   : > { %11519 = vmatmul.mubr.msk.f32.gmra.mrb[28].mxu0 %vm602_vm1, %v15397_v4  ;;  %v17389_v4 = vld [vmem:[#allocation49_spill] sm:$0xff] }
 0x5c3   : > { %11521 = vmatprep.mubr.msk.f32.mxu0 %vm602_vm1, %v15388_v42  ;;  %v5920_v5 = vmul.f32 %v17389_v4, %v15510_v33 }
 0x5c6   : > { %11522 = vmatmul.mubr.msk.f32.gmra.mrb[30].mxu0 %vm602_vm1, %v15368_v49  ;;  %v5922_v49 = vmul.f32 %v17391_v13, %v15532_v21 }
 0x5c7   : > { %11532 = vmatprep.mubr.msk.f32.mxu0 %vm602_vm1, %v5473_v19  ;;  %v5778_v19 = vmul.f32 %v17388_v16, %v15360_v48 }
 0x5ca   : > { %11533 = vmatmul.mubr.msk.f32.vlgmr.msra.gmra.mrb[24].mxu0 %vm602_vm1, %v5474_v23  ;;  %v17392_v23 = vld [vmem:[#allocation52_spill] sm:$0xff] }
 0x5cb   : > { %12338 = vmatpush3.bf16.msra.mxu0 %v12335_v46  ;;  %11535 = vmatprep.mubr.msk.f32.mxu0 %vm602_vm1, %v5475_v60  ;;  %v5628_v46 = vmul.f32 %v15189_v28, %v15412_v54  ;;  %v5772_v28 = vmul.f32 %v15220_v55, %v15374_v34  ;;  %v12355_v54 = vpack.c.bf16 %v9919_v12, %v9918_v50  ;;  %v17386_v55 = vld [vmem:[#allocation46_spill] sm:$0xff]  ;;  %v17395_v60 = vld [vmem:[#allocation55_spill] sm:$0xff]  ;;  %v17401_v50 = vld [vmem:[#allocation25_spill] sm:$0xff] }
 0x5cc   : > { %12340 = vmatprep.subr.bf16.mxu0 %v12339_v47  ;;  %v5776_v34 = vmul.f32 %v17386_v55, %v15388_v42  ;;  %v5921_v42 = vmul.f32 %v17390_v51, %v15520_v25  ;;  %v5923_v48 = vmul.f32 %v17392_v23, %v15541_v14  ;;  %v5925_v25 = vmul.f32 %v17394_v2, %v15555_v22  ;;  %v9934_v22 = vld [vmem:[%s17124_s2 + $0x268] sm:$0xff] }
 0x5cd   : > { %v5926_v21 = vmul.f32 %v17395_v60, %v15488_v17  ;;  %v5927_v14 = vmul.f32 %v17396_v0, %v15495_v37  ;;  %v9935_v17 = vld [vmem:[%s17124_s2 + $0x270] sm:$0xff]  ;;  %v9936_v37 = vld [vmem:[%s17124_s2 + $0x278] sm:$0xff]  ;;  %v17405_v55 = vld [vmem:[#allocation29_spill] sm:$0xff] }
 0x5ce   : > { %11536 = vmatmul.mubr.msk.f32.gmra.mrb[26].mxu0 %vm602_vm1, %v5476_v9  ;;  %v12363_v9 = vpack.c.bf16 %v9936_v37, %v9935_v17  ;;  %v9954_v2 = vld [vmem:[%s17124_s2 + $0x288] sm:$0xff] }
 0x5cf   : > { %11538 = vmatprep.mubr.msk.f32.mxu0 %vm602_vm1, %v5477_v7  ;;  %12342 = vmatpush3.bf16.msra.mxu0 %v12339_v47  ;;  %v17393_v47 = vld [vmem:[#allocation53_spill] sm:$0xff] }
 0x5d0   : > { %12344 = vmatprep.subr.bf16.mxu0 %v12343_v45  ;;  %v5924_v33 = vmul.f32 %v17393_v47, %v15546_v36  ;;  %v9933_v36 = vld [vmem:[%s17124_s2 + $0x260] sm:$0xff] }
 0x5d1   : > { %v12359_v18 = vpack.c.bf16 %v9934_v22, %v9933_v36  ;;  %v15875_v22 = vld [vmem:[%s17128_s6 + $0x60] sm:$0xff] }
 0x5d2   : > { %11539 = vmatmul.mubr.msk.f32.gmra.mrb[28].mxu0 %vm602_vm1, %v5478_v31 }
 0x5d3   : > { %11541 = vmatprep.mubr.msk.f32.mxu0 %vm602_vm1, %v5479_v59  ;;  %12360 = vmatprep.subr.bf16.mxu1 %v12359_v18  ;;  %v9928_v59 = vld [vmem:[%s17127_s5 + $0x4] ss:$0 sm:$0xff] }
 0x5d4   : > { %12362 = vmatpush3.bf16.msra.mxu1 %v12359_v18 }
 0x5d5   : > { %12364 = vmatprep.subr.bf16.mxu1 %v12363_v9 }
 0x5d6   : > { %11542 = vmatmul.mubr.msk.f32.gmra.mrb[30].mxu0 %vm602_vm1, %v5480_v35 }
 0x5d7   : > { %11552 = vmatprep.mubr.msk.f32.mxu0 %vm602_vm1, %v5622_v58 }
 0x5d8   : > { %12366 = vmatpush3.bf16.msra.mxu1 %v12363_v9  ;;  %v15886_v9 = vld [vmem:[%s17128_s6 + $0x68] sm:$0xff] }
 0x5da   : > { %11553 = vmatmul.mubr.msk.f32.vlgmr.msra.gmra.mrb[24].mxu0 %vm602_vm1, %v5623_v57 }
 0x5db   : > { %12346 = vmatpush3.bf16.msra.mxu0 %v12343_v45  ;;  %11555 = vmatprep.mubr.msk.f32.mxu0 %vm602_vm1, %v5624_v56  ;;  %v9929_v45 = vld [vmem:[%s17124_s2 + $0x240] sm:$0xff] }
 0x5dc   : > { %12348 = vmatprep.subr.bf16.mxu0 %v12347_v30  ;;  %v12367_v7 = vpack.c.bf16 %v9930_v40, %v9929_v45  ;;  %v15893_v40 = vld [vmem:[%s17128_s6 + $0x70] sm:$0xff] }
 0x5de   : > { %11556 = vmatmul.mubr.msk.f32.gmra.mrb[26].mxu0 %vm602_vm1, %v5625_v38  ;;  %12368 = vmatprep.subr.bf16.mxu1 %v12367_v7 }
 0x5df   : > { %11558 = vmatprep.mubr.msk.f32.mxu0 %vm602_vm1, %v5626_v43  ;;  %12350 = vmatpush3.bf16.msra.mxu0 %v12347_v30 }
 0x5e0   : > { %12352 = vmatprep.subr.bf16.mxu0 %v12351_v44 }
 0x5e2   : > { %11559 = vmatmul.mubr.msk.f32.gmra.mrb[28].mxu0 %vm602_vm1, %v5627_v1 }
 0x5e3   : > { %11561 = vmatprep.mubr.msk.f32.mxu0 %vm602_vm1, %v5628_v46  ;;  %v17399_v46 = vld [vmem:[#allocation23_spill] sm:$0xff] }
 0x5e6   : > { %11562 = vmatmul.mubr.msk.f32.gmra.mrb[30].mxu0 %vm602_vm1, %v5629_v41 }
 0x5e7   : > { %11572 = vmatprep.mubr.msk.f32.mxu0 %vm602_vm1, %v5771_v10 }
 0x5ea   : > { %11573 = vmatmul.mubr.msk.f32.vlgmr.msra.gmra.mrb[24].mxu0 %vm602_vm1, %v5772_v28 }
 0x5eb   : > { %12354 = vmatpush3.bf16.msra.mxu0 %v12351_v44  ;;  %11575 = vmatprep.mubr.msk.f32.mxu0 %vm602_vm1, %v5773_v53 }
 0x5ec   : > { %12356 = vmatprep.subr.bf16.mxu0 %v12355_v54 }
 0x5ee   : > { %11576 = vmatmul.mubr.msk.f32.gmra.mrb[26].mxu0 %vm602_vm1, %v5774_v3 }
 0x5ef   : > { %11578 = vmatprep.mubr.msk.f32.mxu0 %vm602_vm1, %v5775_v26  ;;  %12358 = vmatpush3.bf16.msra.mxu0 %v12355_v54  ;;  %v9932_v26 = vld [vmem:[%s17124_s2 + $0x258] sm:$0xff] }
 0x5f2   : > { %11579 = vmatmul.mubr.msk.f32.gmra.mrb[28].mxu0 %vm602_vm1, %v5776_v34 }
 0x5f3   : > { %11581 = vmatprep.mubr.msk.f32.mxu0 %vm602_vm1, %v5777_v15 }
 0x5f6   : > { %11582 = vmatmul.mubr.msk.f32.gmra.mrb[30].mxu0 %vm602_vm1, %v5778_v19  ;;  %v17407_v19 = vld [vmem:[#allocation30_spill] sm:$0xff] }
 0x5f7   : > { %11592 = vmatprep.mubr.msk.f32.mxu0 %vm602_vm1, %v5920_v5  ;;  %v15826_v5 = vld [vmem:[%s17128_s6 + $0x48] sm:$0xff] }
 0x5fa   : > { %11593 = vmatmul.mubr.msk.f32.vlgmr.msra.gmra.mrb[24].mxu0 %vm602_vm1, %v5921_v42  ;;  %v12371_v42 = vpack.c.bf16 %v9932_v26, %v9931_v61 }
 0x5fb   : > { %11595 = vmatprep.mubr.msk.f32.mxu0 %vm602_vm1, %v5922_v49  ;;  %v17409_v49 = vld [vmem:[#allocation31_spill] sm:$0xff] }
 0x5fe   : > { %11596 = vmatmul.mubr.msk.f32.gmra.mrb[26].mxu0 %vm602_vm1, %v5923_v48  ;;  %v15841_v48 = vld [vmem:[%s17128_s6 + $0x50] sm:$0xff] }
 0x5ff   : > { %11598 = vmatprep.mubr.msk.f32.mxu0 %vm602_vm1, %v5924_v33  ;;  %v9953_v33 = vld [vmem:[%s17124_s2 + $0x280] sm:$0xff] }
 0x602   : > { %11599 = vmatmul.mubr.msk.f32.gmra.mrb[28].mxu0 %vm602_vm1, %v5925_v25 }
 0x603   : > { %11601 = vmatprep.mubr.msk.f32.mxu0 %vm602_vm1, %v5926_v21  ;;  %v15864_v21 = vld [vmem:[%s17128_s6 + $0x58] sm:$0xff] }
 0x606   : > { %11602 = vmatmul.mubr.msk.f32.gmra.mrb[30].mxu0 %vm602_vm1, %v5927_v14  ;;  %v12375_v14 = vpack.c.bf16 %v9954_v2, %v9953_v33  ;;  %v15997_v2 = vld [vmem:[%s17128_s6 + $0x28] sm:$0xff] }
 0x6cd   : > { %v11594_v6 = vpop.f32.mrb[24].mxu0 }
 0x6ce   : > { %v6022_v31 = vpop.f32.mrb[25].mxu0  ;;  %v6074_v58 = vadd.f32 %v11594_v6, %v9928_v59 }
 0x6cf   : > { %v6073_v35 = vadd.f32 %v9928_v59, %v6022_v31 }
 0x6d0   : > { %v15777_v29 = vadd.f32 %v6074_v58, %v17398_v39 }
 0x6d1   : > { %v11597_v24 = vpop.f32.mrb[26].mxu0  ;;  %v15774_v57 = vadd.f32 %v6073_v35, %v17397_v20 }
 0x6d2   : > { %v6032_v52 = vpop.f32.mrb[27].mxu0  ;;  %v6076_v38 = vadd.f32 %v11597_v24, %v9928_v59  ;;  %v15791_v54 = vadd.f32 %v15777_v29, %v17398_v39 }
 0x6d3   : > { %v6075_v30 = vadd.f32 %v9928_v59, %v6032_v52  ;;  %v15784_v10 = vadd.f32 %v15774_v57, %v17397_v20  ;;  %v9955_v20 = vld [vmem:[%s17124_s2 + $0x290] sm:$0xff] }
 0x6d4   : > { %17402 = vst [vmem:[#allocation33_spill] sm:$0xff] %v15791_v54  ;;  %v15794_v53 = vadd.f32 %v6076_v38, %v17403_v11  ;;  %v6129_v47 = vmul.f32 %v15841_v48, %v15791_v54  ;;  %v6099_v24 = vrot.slane %v15791_v54, 7  ;;  %v15940_v38 = vld [vmem:[%s17128_s6 + $0x8] sm:$0xff] }
 0x6d5   : > { %v11600_v63 = vpop.f32.mrb[28].mxu0  ;;  %17400 = vst [vmem:[#allocation32_spill] sm:$0xff] %v15784_v10  ;;  %v15787_v12 = vadd.f32 %v6075_v30, %v17401_v50  ;;  %v6128_v51 = vmul.f32 %v15826_v5, %v15784_v10  ;;  %v6098_v6 = vrot.slane %v15784_v10, 7  ;;  %v9956_v30 = vld [vmem:[%s17124_s2 + $0x298] sm:$0xff] }
 0x6d6   : > { %v6042_v62 = vpop.f32.mrb[29].mxu0  ;;  %v6078_v8 = vadd.f32 %v11600_v63, %v9928_v59  ;;  %v15832_v13 = vadd.f32 %v15794_v53, %v17403_v11  ;;  %v15919_v63 = vld [vmem:[%s17128_s6] sm:$0xff] }
 0x6d7   : > { %v6077_v28 = vadd.f32 %v9928_v59, %v6042_v62  ;;  %v15818_v16 = vadd.f32 %v15787_v12, %v17401_v50  ;;  %v9965_v11 = vld [vmem:[%s17124_s2 + $0x2a0] sm:$0xff] }
 0x6d8   : > { %17408 = vst [vmem:[#allocation36_spill] sm:$0xff] %v15832_v13  ;;  %v15835_v23 = vadd.f32 %v6078_v8, %v17409_v49  ;;  %v6131_v18 = vmul.f32 %v15875_v22, %v15832_v13  ;;  %v6101_v39 = vrot.slane %v15832_v13, 7  ;;  %v9966_v8 = vld [vmem:[%s17124_s2 + $0x2a8] sm:$0xff] }
 0x6d9   : > { %v11603_v56 = vpop.f32.mrb[30].mxu0  ;;  %17406 = vst [vmem:[#allocation35_spill] sm:$0xff] %v15818_v16  ;;  %v15821_v4 = vadd.f32 %v6077_v28, %v17407_v19  ;;  %v6130_v0 = vmul.f32 %v15864_v21, %v15818_v16  ;;  %v6100_v62 = vrot.slane %v15818_v16, 7 }
 0x6da   : > { %v6080_v44 = vadd.f32 %v11603_v56, %v9928_v59  ;;  %v6052_v43 = vpop.f32.mrb[31].mxu0  ;;  %v15870_v36 = vadd.f32 %v15835_v23, %v17409_v49  ;;  %v15933_v56 = vsel %vm569_vm2, %v6098_v6, %v6099_v24 }
 0x6db   : > { %v6079_v1 = vadd.f32 %v9928_v59, %v6052_v43  ;;  %v15859_v60 = vadd.f32 %v15821_v4, %v17407_v19  ;;  %v15908_v59 = vld [vmem:[%s17128_s6 + $0x78] sm:$0xff]  ;;  %v12379_v43 = vpack.c.bf16 %v9956_v30, %v9955_v20  ;;  %v15953_v50 = vsel %vm569_vm2, %v6099_v24, %v6100_v62 }
 0x6dc   : > { %v15780_v41 = vadd.f32 %v6080_v44, %v17399_v46  ;;  %17412 = vst [vmem:[#allocation39_spill] sm:$0xff] %v15870_v36  ;;  %v15965_v61 = vsel %vm569_vm2, %v6100_v62, %v6101_v39  ;;  %v6103_v26 = vrot.slane %v15870_v36, 7  ;;  %v12383_v19 = vpack.c.bf16 %v9966_v8, %v9965_v11  ;;  %v16035_v62 = vld [vmem:[%s17128_s6 + $0x80] sm:$0xff] }
 0x6dd   : > { %v15807_v34 = vadd.f32 %v6079_v1, %v17405_v55  ;;  %17411 = vst [vmem:[#allocation38_spill] sm:$0xff] %v15859_v60  ;;  %v6132_v45 = vmul.f32 %v15886_v9, %v15859_v60  ;;  %v15947_v1 = vld [vmem:[%s17128_s6 + $0x10] sm:$0xff]  ;;  %v6102_v28 = vrot.slane %v15859_v60, 7  ;;  %v6399_v24 = vrot.slane %v15818_v16, 1 }
 0x6de   : > { %v15798_v3 = vadd.f32 %v15780_v41, %v17399_v46  ;;  %v6116_v46 = vmul.f32 %v15947_v1, %v15933_v56  ;;  %v6400_v30 = vrot.slane %v15832_v13, 1 }
 0x6df   : > { %v15853_v25 = vadd.f32 %v15807_v34, %v17405_v55  ;;  %v15972_v55 = vld [vmem:[%s17128_s6 + $0x18] sm:$0xff]  ;;  %v15985_v49 = vsel %vm569_vm2, %v6101_v39, %v6102_v28  ;;  %v9967_v39 = vld [vmem:[%s17124_s2 + $0x2b0] sm:$0xff] }
 0x6e0   : > { %17404 = vst [vmem:[#allocation34_spill] sm:$0xff] %v15798_v3  ;;  %v6127_v15 = vmul.f32 %v15812_v27, %v15798_v3  ;;  %v6105_v37 = vrot.slane %v15798_v3, 7  ;;  %v6404_v33 = vrot.slane %v15798_v3, 1 }
 0x6e1   : > { %17410 = vst [vmem:[#allocation37_spill] sm:$0xff] %v15853_v25  ;;  %v6104_v17 = vrot.slane %v15853_v25, 7  ;;  %v6134_v52 = vmul.f32 %v15908_v59, %v15853_v25 }
 0x6e2   : > { %11612 = vmatprep.mubr.msk.f32.mxu1 %vm602_vm1, %v6127_v15  ;;  %v15914_v35 = vsel %vm569_vm2, %v6105_v37, %v6098_v6  ;;  %v6117_v15 = vmul.f32 %v15972_v55, %v15953_v50 }
 0x6e3   : > { %11613 = vmatmul.mubr.msk.f32.vlgmr.msra.gmra.mrb[16].mxu1 %vm602_vm1, %v6128_v51  ;;  %v15901_v31 = vsel %vm569_vm2, %v6104_v17, %v6105_v37  ;;  %v6115_v44 = vmul.f32 %v15940_v38, %v15914_v35  ;;  %v15979_v51 = vld [vmem:[%s17128_s6 + $0x20] sm:$0xff]  ;;  %v16006_v37 = vld [vmem:[%s17128_s6 + $0x30] sm:$0xff] }
 0x6e4   : > { %12370 = vmatpush3.bf16.msra.mxu1 %v12367_v7  ;;  %11615 = vmatprep.mubr.msk.f32.mxu1 %vm602_vm1, %v6129_v47  ;;  %v6133_v7 = vmul.f32 %v15893_v40, %v15870_v36  ;;  %v6114_v58 = vmul.f32 %v15919_v63, %v15901_v31  ;;  %v15990_v47 = vsel %vm569_vm2, %v6102_v28, %v6103_v26  ;;  %v16056_v28 = vld [vmem:[%s17128_s6 + $0x88] sm:$0xff] }
 0x6e5   : > { %12372 = vmatprep.subr.bf16.mxu1 %v12371_v42 }
 0x6e7   : > { %11616 = vmatmul.mubr.msk.f32.gmra.mrb[18].mxu1 %vm602_vm1, %v6130_v0  ;;  %v6119_v0 = vmul.f32 %v15997_v2, %v15985_v49 }
 0x6e8   : > { %11618 = vmatprep.mubr.msk.f32.mxu1 %vm602_vm1, %v6131_v18  ;;  %12374 = vmatpush3.bf16.msra.mxu1 %v12371_v42  ;;  %v6118_v42 = vmul.f32 %v15979_v51, %v15965_v61  ;;  %v6398_v18 = vrot.slane %v15791_v54, 1 }
 0x6e9   : > { %12376 = vmatprep.subr.bf16.mxu1 %v12375_v14 }
 0x6eb   : > { %11619 = vmatmul.mubr.msk.f32.gmra.mrb[20].mxu1 %vm602_vm1, %v6132_v45  ;;  %v6120_v45 = vmul.f32 %v16006_v37, %v15990_v47 }
 0x6ec   : > { %11621 = vmatprep.mubr.msk.f32.mxu1 %vm602_vm1, %v6133_v7  ;;  %v16012_v7 = vsel %vm569_vm2, %v6103_v26, %v6104_v17  ;;  %v16063_v26 = vld [vmem:[%s17128_s6 + $0x90] sm:$0xff] }
 0x6ef   : > { %11622 = vmatmul.mubr.msk.f32.gmra.mrb[22].mxu1 %vm602_vm1, %v6134_v52  ;;  %v16024_v52 = vld [vmem:[%s17128_s6 + $0x38] sm:$0xff] }
 0x6f0   : > { %11632 = vmatprep.mubr.msk.f32.mxu1 %vm602_vm1, %v6114_v58  ;;  %v6121_v58 = vmul.f32 %v16024_v52, %v16012_v7 }
 0x6f3   : > { %11633 = vmatmul.mubr.msk.f32.vlgmr.msra.gmra.mrb[16].mxu1 %vm602_vm1, %v6115_v44  ;;  %v9968_v44 = vld [vmem:[%s17124_s2 + $0x2b8] sm:$0xff] }
 0x6f4   : > { %12378 = vmatpush3.bf16.msra.mxu1 %v12375_v14  ;;  %11635 = vmatprep.mubr.msk.f32.mxu1 %vm602_vm1, %v6116_v46  ;;  %v6397_v14 = vrot.slane %v15784_v10, 1  ;;  %v6401_v46 = vrot.slane %v15859_v60, 1  ;;  %v12387_v8 = vpack.c.bf16 %v9968_v44, %v9967_v39 }
 0x6f5   : > { %12380 = vmatprep.subr.bf16.mxu1 %v12379_v43 }
 0x6f6   : > { %v16017_v6 = vsel %vm869_vm3, %v6404_v33, %v6397_v14  ;;  %v16030_v17 = vsel %vm869_vm3, %v6397_v14, %v6398_v18  ;;  %v9977_v14 = vld [vmem:[%s17124_s2 + $0x2c0] sm:$0xff] }
 0x6f7   : > { %11636 = vmatmul.mubr.msk.f32.gmra.mrb[18].mxu1 %vm602_vm1, %v6117_v15  ;;  %v6413_v20 = vmul.f32 %v16035_v62, %v16017_v6  ;;  %v6414_v11 = vmul.f32 %v16056_v28, %v16030_v17 }
 0x6f8   : > { %11638 = vmatprep.mubr.msk.f32.mxu1 %vm602_vm1, %v6118_v42  ;;  %12382 = vmatpush3.bf16.msra.mxu1 %v12379_v43  ;;  %v16049_v43 = vsel %vm869_vm3, %v6398_v18, %v6399_v24  ;;  %v16069_v42 = vsel %vm869_vm3, %v6399_v24, %v6400_v30  ;;  %v9978_v18 = vld [vmem:[%s17124_s2 + $0x2c8] sm:$0xff]  ;;  %v16088_v24 = vld [vmem:[%s17128_s6 + $0x98] sm:$0xff] }
 0x6f9   : > { %12384 = vmatprep.subr.bf16.mxu1 %v12383_v19  ;;  %v6415_v15 = vmul.f32 %v16063_v26, %v16049_v43  ;;  %v12391_v39 = vpack.c.bf16 %v9978_v18, %v9977_v14  ;;  %v16132_v18 = vld [vmem:[%s17128_s6 + $0xb8] sm:$0xff] }
 0x6fa   : > { %17415 = vst [vmem:[#allocation42_spill] sm:$0xff] %v16132_v18 }
 0x6fb   : > { %11639 = vmatmul.mubr.msk.f32.gmra.mrb[20].mxu1 %vm602_vm1, %v6119_v0  ;;  %v6402_v0 = vrot.slane %v15870_v36, 1 }
 0x6fc   : > { %11641 = vmatprep.mubr.msk.f32.mxu1 %vm602_vm1, %v6120_v45  ;;  %v16081_v45 = vsel %vm869_vm3, %v6400_v30, %v6401_v46  ;;  %v16095_v30 = vld [vmem:[%s17128_s6 + $0xa0] sm:$0xff] }
 0x6fd   : > { %v16101_v44 = vsel %vm869_vm3, %v6401_v46, %v6402_v0  ;;  %v16119_v46 = vld [vmem:[%s17128_s6 + $0xb0] sm:$0xff] }
 0x6fe   : > { %17414 = vst [vmem:[#allocation41_spill] sm:$0xff] %v16119_v46 }
 0x6ff   : > { %11642 = vmatmul.mubr.msk.f32.gmra.mrb[22].mxu1 %vm602_vm1, %v6121_v58  ;;  %v6403_v58 = vrot.slane %v15853_v25, 1 }
 0x700   : > { %11652 = vmatprep.mubr.msk.f32.mxu1 %vm602_vm1, %v6413_v20  ;;  %v6416_v20 = vmul.f32 %v16088_v24, %v16069_v42 }
 0x703   : > { %11653 = vmatmul.mubr.msk.f32.vlgmr.msra.gmra.mrb[16].mxu1 %vm602_vm1, %v6414_v11  ;;  %v16106_v11 = vsel %vm869_vm3, %v6402_v0, %v6403_v58 }
 0x704   : > { %12386 = vmatpush3.bf16.msra.mxu1 %v12383_v19  ;;  %11655 = vmatprep.mubr.msk.f32.mxu1 %vm602_vm1, %v6415_v15  ;;  %v6417_v19 = vmul.f32 %v16095_v30, %v16081_v45  ;;  %v16112_v15 = vld [vmem:[%s17128_s6 + $0xa8] sm:$0xff]  ;;  %v6419_v0 = vmul.f32 %v16119_v46, %v16106_v11  ;;  %v16161_v46 = vld [vmem:[%s17128_s6 + $0xd0] sm:$0xff] }
 0x705   : > { %12388 = vmatprep.subr.bf16.mxu1 %v12387_v8  ;;  %17413 = vst [vmem:[#allocation40_spill] sm:$0xff] %v16112_v15  ;;  %v6418_v14 = vmul.f32 %v16112_v15, %v16101_v44  ;;  %17418 = vst [vmem:[#allocation45_spill] sm:$0xff] %v16161_v46  ;;  %v6564_v15 = vmul.f32 %v16161_v46, %v15953_v50 }
 0x707   : > { %11656 = vmatmul.mubr.msk.f32.gmra.mrb[18].mxu1 %vm602_vm1, %v6416_v20 }
 0x708   : > { %11658 = vmatprep.mubr.msk.f32.mxu1 %vm602_vm1, %v6417_v19  ;;  %12390 = vmatpush3.bf16.msra.mxu1 %v12387_v8  ;;  %v16125_v8 = vsel %vm869_vm3, %v6403_v58, %v6404_v33  ;;  %v16139_v19 = vld [vmem:[%s17128_s6 + $0xc0] sm:$0xff]  ;;  %v9979_v58 = vld [vmem:[%s17124_s2 + $0x2d0] sm:$0xff] }
 0x709   : > { %12392 = vmatprep.subr.bf16.mxu1 %v12391_v39  ;;  %v6420_v20 = vmul.f32 %v16132_v18, %v16125_v8  ;;  %17416 = vst [vmem:[#allocation43_spill] sm:$0xff] %v16139_v19  ;;  %v6562_v33 = vmul.f32 %v16139_v19, %v15914_v35 }
 0x70b   : > { %11659 = vmatmul.mubr.msk.f32.gmra.mrb[20].mxu1 %vm602_vm1, %v6418_v14  ;;  %v9980_v14 = vld [vmem:[%s17124_s2 + $0x2d8] sm:$0xff] }
 0x70c   : > { %11661 = vmatprep.mubr.msk.f32.mxu1 %vm602_vm1, %v6419_v0  ;;  %v16154_v0 = vld [vmem:[%s17128_s6 + $0xc8] sm:$0xff]  ;;  %v12395_v18 = vpack.c.bf16 %v9980_v14, %v9979_v58  ;;  %v16176_v58 = vld [vmem:[%s17128_s6 + $0xd8] sm:$0xff] }
 0x70d   : > { %17417 = vst [vmem:[#allocation44_spill] sm:$0xff] %v16154_v0  ;;  %v6563_v19 = vmul.f32 %v16154_v0, %v15933_v56  ;;  %17419 = vst [vmem:[#allocation46_spill] sm:$0xff] %v16176_v58  ;;  %v6565_v14 = vmul.f32 %v16176_v58, %v15965_v61  ;;  %v16183_v0 = vld [vmem:[%s17128_s6 + $0xe0] sm:$0xff]  ;;  %v10014_v58 = vld [vmem:[%s17124_s2 + $0x328] sm:$0xff] }
 0x70e   : > { %17420 = vst [vmem:[#allocation47_spill] sm:$0xff] %v16183_v0 }
 0x70f   : > { %11662 = vmatmul.mubr.msk.f32.gmra.mrb[22].mxu1 %vm602_vm1, %v6420_v20  ;;  %v9989_v20 = vld [vmem:[%s17124_s2 + $0x2e0] sm:$0xff] }
 0x710   : > { %11672 = vmatprep.mubr.msk.f32.mxu1 %vm602_vm1, %v6562_v33  ;;  %v9990_v33 = vld [vmem:[%s17124_s2 + $0x2e8] sm:$0xff] }
 0x711   : > { %v12399_v46 = vpack.c.bf16 %v9990_v33, %v9989_v20  ;;  %v16199_v20 = vld [vmem:[%s17128_s6 + $0xf0] sm:$0xff] }
 0x712   : > { %17422 = vst [vmem:[#allocation49_spill] sm:$0xff] %v16199_v20  ;;  %v6568_v33 = vmul.f32 %v16199_v20, %v16012_v7  ;;  %v9992_v20 = vld [vmem:[%s17124_s2 + $0x2f8] sm:$0xff] }
 0x713   : > { %11673 = vmatmul.mubr.msk.f32.vlgmr.msra.gmra.mrb[16].mxu1 %vm602_vm1, %v6563_v19 }
 0x714   : > { %12394 = vmatpush3.bf16.msra.mxu1 %v12391_v39  ;;  %11675 = vmatprep.mubr.msk.f32.mxu1 %vm602_vm1, %v6564_v15  ;;  %v6566_v39 = vmul.f32 %v16183_v0, %v15985_v49  ;;  %v16192_v15 = vld [vmem:[%s17128_s6 + $0xe8] sm:$0xff] }
 0x715   : > { %12396 = vmatprep.subr.bf16.mxu1 %v12395_v18  ;;  %17421 = vst [vmem:[#allocation48_spill] sm:$0xff] %v16192_v15  ;;  %v6567_v19 = vmul.f32 %v16192_v15, %v15990_v47  ;;  %v16265_v15 = vld [vmem:[%s17128_s6 + $0x150] sm:$0xff] }
 0x716   : > { %17426 = vst [vmem:[#allocation53_spill] sm:$0xff] %v16265_v15  ;;  %v6854_v0 = vmul.f32 %v16265_v15, %v16069_v42 }
 0x717   : > { %11676 = vmatmul.mubr.msk.f32.gmra.mrb[18].mxu1 %vm602_vm1, %v6565_v14 }
 0x718   : > { %11678 = vmatprep.mubr.msk.f32.mxu1 %vm602_vm1, %v6566_v39  ;;  %12398 = vmatpush3.bf16.msra.mxu1 %v12395_v18  ;;  %v16208_v18 = vld [vmem:[%s17128_s6 + $0xf8] sm:$0xff]  ;;  %v9991_v39 = vld [vmem:[%s17124_s2 + $0x2f0] sm:$0xff] }
 0x719   : > { %12400 = vmatprep.subr.bf16.mxu1 %v12399_v46  ;;  %17423 = vst [vmem:[#allocation50_spill] sm:$0xff] %v16208_v18  ;;  %v6569_v14 = vmul.f32 %v16208_v18, %v15901_v31  ;;  %v10002_v18 = vld [vmem:[%s17124_s2 + $0x308] sm:$0xff] }
 0x71b   : > { %11679 = vmatmul.mubr.msk.f32.gmra.mrb[20].mxu1 %vm602_vm1, %v6567_v19  ;;  %v12403_v19 = vpack.c.bf16 %v9992_v20, %v9991_v39  ;;  %v10004_v39 = vld [vmem:[%s17124_s2 + $0x318] sm:$0xff] }
 0x71c   : > { %11681 = vmatprep.mubr.msk.f32.mxu1 %vm602_vm1, %v6568_v33  ;;  %v10001_v33 = vld [vmem:[%s17124_s2 + $0x300] sm:$0xff] }
 0x71f   : > { %11682 = vmatmul.mubr.msk.f32.gmra.mrb[22].mxu1 %vm602_vm1, %v6569_v14  ;;  %v12407_v14 = vpack.c.bf16 %v10002_v18, %v10001_v33  ;;  %v10003_v18 = vld [vmem:[%s17124_s2 + $0x310] sm:$0xff] }
 0x720   : > { %11692 = vmatprep.mubr.msk.f32.mxu1 %vm602_vm1, %v15784_v10 }
 0x723   : > { %11693 = vmatmul.mubr.msk.f32.vlgmr.msra.gmra.mrb[16].mxu1 %vm602_vm1, %v15791_v54 }
 0x724   : > { %12402 = vmatpush3.bf16.msra.mxu1 %v12399_v46  ;;  %11695 = vmatprep.mubr.msk.f32.mxu1 %vm602_vm1, %v15818_v16  ;;  %v16242_v46 = vld [vmem:[%s17128_s6 + $0x140] sm:$0xff] }
 0x725   : > { %12404 = vmatprep.subr.bf16.mxu1 %v12403_v19  ;;  %17424 = vst [vmem:[#allocation51_spill] sm:$0xff] %v16242_v46  ;;  %v6852_v20 = vmul.f32 %v16242_v46, %v16030_v17  ;;  %v12411_v46 = vpack.c.bf16 %v10004_v39, %v10003_v18  ;;  %v16280_v18 = vld [vmem:[%s17128_s6 + $0x158] sm:$0xff] }
 0x726   : > { %v6855_v39 = vmul.f32 %v16280_v18, %v16081_v45 }
 0x727   : > { %11696 = vmatmul.mubr.msk.f32.gmra.mrb[18].mxu1 %vm602_vm1, %v15832_v13 }
 0x728   : > { %11698 = vmatprep.mubr.msk.f32.mxu1 %vm602_vm1, %v15859_v60  ;;  %12406 = vmatpush3.bf16.msra.mxu1 %v12403_v19  ;;  %v16258_v19 = vld [vmem:[%s17128_s6 + $0x148] sm:$0xff] }
 0x729   : > { %12408 = vmatprep.subr.bf16.mxu1 %v12407_v14  ;;  %17425 = vst [vmem:[#allocation52_spill] sm:$0xff] %v16258_v19  ;;  %v6853_v33 = vmul.f32 %v16258_v19, %v16049_v43  ;;  %v16287_v19 = vld [vmem:[%s17128_s6 + $0x160] sm:$0xff] }
 0x72a   : > { %17427 = vst [vmem:[#allocation54_spill] sm:$0xff] %v16287_v19 }
 0x72b   : > { %11699 = vmatmul.mubr.msk.f32.gmra.mrb[20].mxu1 %vm602_vm1, %v15870_v36 }
 0x72c   : > { %11701 = vmatprep.mubr.msk.f32.mxu1 %vm602_vm1, %v15853_v25 }
 0x72f   : > { %11702 = vmatmul.mubr.msk.f32.gmra.mrb[22].mxu1 %vm602_vm1, %v15798_v3 }
 0x730   : > { %11712 = vmatprep.mubr.msk.f32.mxu1 %vm602_vm1, %v6852_v20  ;;  %v10013_v20 = vld [vmem:[%s17124_s2 + $0x320] sm:$0xff] }
 0x731   : > { %v12415_v15 = vpack.c.bf16 %v10014_v58, %v10013_v20 }
 0x733   : > { %11713 = vmatmul.mubr.msk.f32.vlgmr.msra.gmra.mrb[16].mxu1 %vm602_vm1, %v6853_v33  ;;  %v16303_v33 = vld [vmem:[%s17128_s6 + $0x170] sm:$0xff] }
 0x734   : > { %12410 = vmatpush3.bf16.msra.mxu1 %v12407_v14  ;;  %11715 = vmatprep.mubr.msk.f32.mxu1 %vm602_vm1, %v6854_v0  ;;  %v6856_v14 = vmul.f32 %v16287_v19, %v16101_v44  ;;  %v16296_v0 = vld [vmem:[%s17128_s6 + $0x168] sm:$0xff]  ;;  %17429 = vst [vmem:[#allocation56_spill] sm:$0xff] %v16303_v33  ;;  %v6858_v20 = vmul.f32 %v16303_v33, %v16125_v8 }
 0x735   : > { %12412 = vmatprep.subr.bf16.mxu1 %v12411_v46  ;;  %17428 = vst [vmem:[#allocation55_spill] sm:$0xff] %v16296_v0  ;;  %v6857_v58 = vmul.f32 %v16296_v0, %v16106_v11  ;;  %v16341_v0 = vld [vmem:[%s17128_s6 + $0x190] sm:$0xff] }
 0x736   : > { %v7003_v19 = vmul.f32 %v16341_v0, %v15965_v61 }
 0x737   : > { %11716 = vmatmul.mubr.msk.f32.gmra.mrb[18].mxu1 %vm602_vm1, %v6855_v39 }
 0x738   : > { %11718 = vmatprep.mubr.msk.f32.mxu1 %vm602_vm1, %v6856_v14  ;;  %12414 = vmatpush3.bf16.msra.mxu1 %v12411_v46  ;;  %v16312_v46 = vld [vmem:[%s17128_s6 + $0x178] sm:$0xff]  ;;  %v16319_v14 = vld [vmem:[%s17128_s6 + $0x180] sm:$0xff] }
 0x739   : > { %12416 = vmatprep.subr.bf16.mxu1 %v12415_v15  ;;  %17430 = vst [vmem:[#allocation19_spill] sm:$0xff] %v16312_v46  ;;  %v6859_v39 = vmul.f32 %v16312_v46, %v16017_v6  ;;  %17431 = vst [vmem:[#allocation21_spill] sm:$0xff] %v16319_v14  ;;  %v7001_v33 = vmul.f32 %v16319_v14, %v15933_v56  ;;  %v16334_v46 = vld [vmem:[%s17128_s6 + $0x188] sm:$0xff] }
 0x73a   : > { %v7002_v56 = vmul.f32 %v16334_v46, %v15953_v50  ;;  %v16356_v50 = vld [vmem:[%s17128_s6 + $0x198] sm:$0xff] }
 0x73b   : > { %11719 = vmatmul.mubr.msk.f32.gmra.mrb[20].mxu1 %vm602_vm1, %v6857_v58  ;;  %v10015_v58 = vld [vmem:[%s17124_s2 + $0x330] sm:$0xff]  ;;  %v7004_v61 = vmul.f32 %v16356_v50, %v15985_v49 }
 0x73c   : > { %11721 = vmatprep.mubr.msk.f32.mxu1 %vm602_vm1, %v6858_v20  ;;  %v10016_v20 = vld [vmem:[%s17124_s2 + $0x338] sm:$0xff] }
 0x73d   : > { %v12419_v14 = vpack.c.bf16 %v10016_v20, %v10015_v58  ;;  %v16363_v20 = vld [vmem:[%s17128_s6 + $0x1a0] sm:$0xff] }
 0x73f   : > { %11722 = vmatmul.mubr.msk.f32.gmra.mrb[22].mxu1 %vm602_vm1, %v6859_v39  ;;  %v10026_v39 = vld [vmem:[%s17124_s2 + $0x348] sm:$0xff] }
 0x740   : > { %11732 = vmatprep.mubr.msk.f32.mxu1 %vm602_vm1, %v7001_v33  ;;  %v10025_v33 = vld [vmem:[%s17124_s2 + $0x340] sm:$0xff] }
 0x741   : > { %v12423_v58 = vpack.c.bf16 %v10026_v39, %v10025_v33  ;;  %v16395_v33 = vld [vmem:[%s17128_s6 + $0x1c0] sm:$0xff]  ;;  %v10027_v39 = vld [vmem:[%s17124_s2 + $0x350] sm:$0xff] }
 0x743   : > { %11733 = vmatmul.mubr.msk.f32.vlgmr.msra.gmra.mrb[16].mxu1 %vm602_vm1, %v7002_v56  ;;  %v16379_v56 = vld [vmem:[%s17128_s6 + $0x1b0] sm:$0xff] }
 0x744   : > { %12418 = vmatpush3.bf16.msra.mxu1 %v12415_v15  ;;  %11735 = vmatprep.mubr.msk.f32.mxu1 %vm602_vm1, %v7003_v19  ;;  %v7005_v15 = vmul.f32 %v16363_v20, %v15990_v47  ;;  %v16372_v19 = vld [vmem:[%s17128_s6 + $0x1a8] sm:$0xff]  ;;  %v7007_v47 = vmul.f32 %v16379_v56, %v15901_v31  ;;  %v7150_v31 = vmul.f32 %v16395_v33, %v15791_v54 }
 0x745   : > { %12420 = vmatprep.subr.bf16.mxu1 %v12419_v14  ;;  %v7006_v49 = vmul.f32 %v16372_v19, %v16012_v7 }
 0x747   : > { %11736 = vmatmul.mubr.msk.f32.gmra.mrb[18].mxu1 %vm602_vm1, %v7004_v61  ;;  %v10028_v61 = vld [vmem:[%s17124_s2 + $0x358] sm:$0xff] }
 0x748   : > { %11738 = vmatprep.mubr.msk.f32.mxu1 %vm602_vm1, %v7005_v15  ;;  %12422 = vmatpush3.bf16.msra.mxu1 %v12419_v14  ;;  %v16388_v14 = vld [vmem:[%s17128_s6 + $0x1b8] sm:$0xff] }
 0x749   : > { %12424 = vmatprep.subr.bf16.mxu1 %v12423_v58  ;;  %v7008_v7 = vmul.f32 %v16388_v14, %v15914_v35  ;;  %v16410_v35 = vld [vmem:[%s17128_s6 + $0x1c8] sm:$0xff] }
 0x74a   : > { %v7151_v15 = vmul.f32 %v16410_v35, %v15818_v16  ;;  %v16439_v16 = vld [vmem:[%s17128_s6 + $0x1e0] sm:$0xff] }
 0x74b   : > { %11739 = vmatmul.mubr.msk.f32.gmra.mrb[20].mxu1 %vm602_vm1, %v7006_v49  ;;  %v12427_v49 = vpack.c.bf16 %v10028_v61, %v10027_v39  ;;  %v16432_v39 = vld [vmem:[%s17128_s6 + $0x1d8] sm:$0xff] }
 0x74c   : > { %11741 = vmatprep.mubr.msk.f32.mxu1 %vm602_vm1, %v7007_v47  ;;  %v16417_v47 = vld [vmem:[%s17128_s6 + $0x1d0] sm:$0xff]  ;;  %v7153_v61 = vmul.f32 %v16432_v39, %v15859_v60 }
 0x74d   : > { %v7152_v54 = vmul.f32 %v16417_v47, %v15832_v13  ;;  %v16493_v60 = vld [vmem:[%s17128_s6 + $0x210] sm:$0xff] }
 0x74e   : > { %17432 = vst [vmem:[#allocation23_spill] sm:$0xff] %v16493_v60 }
 0x74f   : > { %11742 = vmatmul.mubr.msk.f32.gmra.mrb[22].mxu1 %vm602_vm1, %v7008_v7  ;;  %v8861_v7 = vld [vmem:[%s17126_s4 + $0x20] sm:$0xff] }
 0x750   : > { %11752 = vmatprep.mubr.msk.f32.mxu1 %vm602_vm1, %v7150_v31  ;;  %v8862_v31 = vld [vmem:[%s17126_s4 + $0x28] sm:$0xff] }
 0x751   : > { %v12503_v13 = vpack.c.bf16 %v8862_v31, %v8861_v7  ;;  %v16455_v7 = vld [vmem:[%s17128_s6 + $0x1f0] sm:$0xff] }
 0x752   : > { %v7156_v31 = vmul.f32 %v16455_v7, %v15798_v3 }
 0x753   : > { %11753 = vmatmul.mubr.msk.f32.vlgmr.msra.gmra.mrb[16].mxu1 %vm602_vm1, %v7151_v15 }
 0x754   : > { %12426 = vmatpush3.bf16.msra.mxu1 %v12423_v58  ;;  %11755 = vmatprep.mubr.msk.f32.mxu1 %vm602_vm1, %v7152_v54  ;;  %v7154_v58 = vmul.f32 %v16439_v16, %v15870_v36  ;;  %v16448_v54 = vld [vmem:[%s17128_s6 + $0x1e8] sm:$0xff] }
 0x755   : > { %12428 = vmatprep.subr.bf16.mxu1 %v12427_v49  ;;  %v7155_v15 = vmul.f32 %v16448_v54, %v15853_v25  ;;  %v16486_v25 = vld [vmem:[%s17128_s6 + $0x208] sm:$0xff] }
 0x757   : > { %11756 = vmatmul.mubr.msk.f32.gmra.mrb[18].mxu1 %vm602_vm1, %v7153_v61 }
 0x758   : > { %11758 = vmatprep.mubr.msk.f32.mxu1 %vm602_vm1, %v7154_v58  ;;  %12430 = vmatpush3.bf16.msra.mxu1 %v12427_v49  ;;  %v16464_v49 = vld [vmem:[%s17128_s6 + $0x1f8] sm:$0xff]  ;;  %v16471_v58 = vld [vmem:[%s17128_s6 + $0x200] sm:$0xff] }
 0x759   : > { %12504 = vmatprep.subr.bf16.mxu1 %v12503_v13  ;;  %v7157_v61 = vmul.f32 %v16464_v49, %v15784_v10  ;;  %v7299_v3 = vmul.f32 %v16471_v58, %v16049_v43  ;;  %v7300_v43 = vmul.f32 %v16486_v25, %v16069_v42  ;;  %v7301_v10 = vmul.f32 %v16493_v60, %v16081_v45  ;;  %v16508_v42 = vld [vmem:[%s17128_s6 + $0x218] sm:$0xff] }
 0x75a   : > { %17433 = vst [vmem:[#allocation25_spill] sm:$0xff] %v16508_v42  ;;  %v7302_v45 = vmul.f32 %v16508_v42, %v16101_v44  ;;  %v16531_v44 = vld [vmem:[%s17128_s6 + $0x230] sm:$0xff] }
 0x75b   : > { %11759 = vmatmul.mubr.msk.f32.gmra.mrb[20].mxu1 %vm602_vm1, %v7155_v15  ;;  %v8863_v15 = vld [vmem:[%s17126_s4 + $0x30] sm:$0xff]  ;;  %17436 = vst [vmem:[#allocation30_spill] sm:$0xff] %v16531_v44 }
 0x75c   : > { %11761 = vmatprep.mubr.msk.f32.mxu1 %vm602_vm1, %v7156_v31  ;;  %v8864_v31 = vld [vmem:[%s17126_s4 + $0x38] sm:$0xff]  ;;  %v10041_v42 = vld [vmem:[%s17125_s3 + $0x250] sm:$0xff] }
 0x75d   : > { %v12507_v36 = vpack.c.bf16 %v8864_v31, %v8863_v15  ;;  %v16515_v31 = vld [vmem:[%s17128_s6 + $0x220] sm:$0xff] }
 0x75e   : > { %17434 = vst [vmem:[#allocation27_spill] sm:$0xff] %v16515_v31 }
 0x75f   : > { %11762 = vmatmul.mubr.msk.f32.gmra.mrb[22].mxu1 %vm602_vm1, %v7157_v61  ;;  %v8858_v61 = vld [vmem:[%s17126_s4 + $0x8] sm:$0xff] }
 0x760   : > { %11772 = vmatprep.mubr.msk.f32.mxu1 %vm602_vm1, %v7299_v3  ;;  %v8857_v3 = vld [vmem:[%s17126_s4] sm:$0xff] }
 0x761   : > { %v12511_v15 = vpack.c.bf16 %v8858_v61, %v8857_v3  ;;  %v8859_v3 = vld [vmem:[%s17126_s4 + $0x10] sm:$0xff]  ;;  %v17438_v61 = vld [vmem:[#allocation16_spill] sm:$0xff] }
 0x763   : > { %11773 = vmatmul.mubr.msk.f32.vlgmr.msra.gmra.mrb[16].mxu1 %vm602_vm1, %v7300_v43  ;;  %v7303_v43 = vmul.f32 %v16515_v31, %v16106_v11  ;;  %v7305_v11 = vmul.f32 %v16531_v44, %v16017_v6  ;;  %v8860_v6 = vld [vmem:[%s17126_s4 + $0x18] sm:$0xff] }
 0x764   : > { %11775 = vmatprep.mubr.msk.f32.mxu1 %vm602_vm1, %v7301_v10  ;;  %12506 = vmatpush3.bf16.msra.mxu1 %v12503_v13  ;;  %v16524_v10 = vld [vmem:[%s17128_s6 + $0x228] sm:$0xff] }
 0x765   : > { %12508 = vmatprep.subr.bf16.mxu1 %v12507_v36  ;;  %17435 = vst [vmem:[#allocation29_spill] sm:$0xff] %v16524_v10  ;;  %v7304_v13 = vmul.f32 %v16524_v10, %v16125_v8 }
 0x767   : > { %11776 = vmatmul.mubr.msk.f32.gmra.mrb[18].mxu1 %vm602_vm1, %v7302_v45  ;;  %v12515_v45 = vpack.c.bf16 %v8860_v6, %v8859_v3  ;;  %v17442_v3 = vld [vmem:[#allocation26_spill] sm:$0xff]  ;;  %v17443_v6 = vld [vmem:[#allocation28_spill] sm:$0xff] }
 0x768   : > { %11778 = vmatprep.mubr.msk.f32.mxu1 %vm602_vm1, %v7303_v43  ;;  %12510 = vmatpush3.bf16.msra.mxu1 %v12507_v36  ;;  %v16540_v36 = vld [vmem:[%s17128_s6 + $0x238] sm:$0xff]  ;;  %v9099_v43 = vld [vmem:[%s17126_s4 + $0x40] sm:$0xff] }
 0x769   : > { %12512 = vmatprep.subr.bf16.mxu1 %v12511_v15  ;;  %17437 = vst [vmem:[#allocation31_spill] sm:$0xff] %v16540_v36  ;;  %v7306_v8 = vmul.f32 %v16540_v36, %v16030_v17  ;;  %v9100_v17 = vld [vmem:[%s17126_s4 + $0x48] sm:$0xff]  ;;  %v17441_v36 = vld [vmem:[#allocation22_spill] sm:$0xff] }
 0x76b   : > { %11779 = vmatmul.mubr.msk.f32.gmra.mrb[20].mxu1 %vm602_vm1, %v7304_v13  ;;  %v17439_v13 = vld [vmem:[#allocation17_spill] sm:$0xff] }
 0x76c   : > { %11781 = vmatprep.mubr.msk.f32.mxu1 %vm602_vm1, %v7305_v11  ;;  %v17440_v11 = vld [vmem:[#allocation20_spill] sm:$0xff] }
 0x76f   : > { %11782 = vmatmul.mubr.msk.f32.gmra.mrb[22].mxu1 %vm602_vm1, %v7306_v8  ;;  %v12519_v8 = vpack.c.bf16 %v9100_v17, %v9099_v43  ;;  %v9102_v43 = vld [vmem:[%s17126_s4 + $0x58] sm:$0xff]  ;;  %v17446_v17 = vld [vmem:[#allocation8_spill] sm:$0xff] }
 0x770   : > { %11972 = vmatprep.mubr.msk.f32.mxu1 %vm602_vm1, %v17438_v61  ;;  %v17444_v61 = vld [vmem:[#allocation24_spill] sm:$0xff] }
 0x773   : > { %11973 = vmatmul.mubr.msk.f32.vlgmr.msra.gmra.mrb[24].mxu1 %vm602_vm1, %v17439_v13  ;;  %v17447_v13 = vld [vmem:[#allocation9_spill] sm:$0xff] }
 0x774   : > { %11975 = vmatprep.mubr.msk.f32.mxu1 %vm602_vm1, %v17440_v11  ;;  %12514 = vmatpush3.bf16.msra.mxu1 %v12511_v15  ;;  %v9101_v15 = vld [vmem:[%s17126_s4 + $0x50] sm:$0xff]  ;;  %v17448_v11 = vld [vmem:[#allocation11_spill] sm:$0xff] }
 0x775   : > { %12516 = vmatprep.subr.bf16.mxu1 %v12515_v45 }
 0x777   : > { %11976 = vmatmul.mubr.msk.f32.gmra.mrb[26].mxu1 %vm602_vm1, %v17441_v36  ;;  %v17445_v36 = vld [vmem:[#allocation18_spill] sm:$0xff] }
 0x778   : > { %11978 = vmatprep.mubr.msk.f32.mxu1 %vm602_vm1, %v17442_v3  ;;  %12518 = vmatpush3.bf16.msra.mxu1 %v12515_v45  ;;  %v12523_v45 = vpack.c.bf16 %v9102_v43, %v9101_v15  ;;  %v17449_v3 = vld [vmem:[#allocation12_spill] sm:$0xff]  ;;  %v17453_v15 = vld [vmem:[#allocation10_spill] sm:$0xff] }
 0x779   : > { %12520 = vmatprep.subr.bf16.mxu1 %v12519_v8 }
 0x77b   : > { %11979 = vmatmul.mubr.msk.f32.gmra.mrb[28].mxu1 %vm602_vm1, %v17443_v6  ;;  %v17450_v6 = vld [vmem:[#allocation13_spill] sm:$0xff] }
 0x77c   : > { %11981 = vmatprep.mubr.msk.f32.mxu1 %vm602_vm1, %v17444_v61  ;;  %v17451_v61 = vld [vmem:[#allocation15_spill] sm:$0xff] }
 0x77f   : > { %11982 = vmatmul.mubr.msk.f32.gmra.mrb[30].mxu1 %vm602_vm1, %v17445_v36  ;;  %v17452_v36 = vld [vmem:[#allocation14_spill] sm:$0xff] }
 0x780   : > { %11992 = vmatprep.mubr.msk.f32.mxu1 %vm602_vm1, %v17446_v17 }
 0x783   : > { %11993 = vmatmul.mubr.msk.f32.vlgmr.msra.gmra.mrb[24].mxu1 %vm602_vm1, %v17447_v13 }
 0x784   : > { %11995 = vmatprep.mubr.msk.f32.mxu1 %vm602_vm1, %v17448_v11  ;;  %12522 = vmatpush3.bf16.msra.mxu1 %v12519_v8  ;;  %v10037_v11 = vld [vmem:[%s17127_s5 + $0x5] ss:$0 sm:$0xff] }
 0x785   : > { %12524 = vmatprep.subr.bf16.mxu1 %v12523_v45 }
 0x787   : > { %11996 = vmatmul.mubr.msk.f32.gmra.mrb[26].mxu1 %vm602_vm1, %v17449_v3 }
 0x788   : > { %11998 = vmatprep.mubr.msk.f32.mxu1 %vm602_vm1, %v17450_v6  ;;  %12526 = vmatpush3.bf16.msra.mxu1 %v12523_v45 }
 0x78b   : > { %11999 = vmatmul.mubr.msk.f32.gmra.mrb[28].mxu1 %vm602_vm1, %v17451_v61 }
 0x78c   : > { %12001 = vmatprep.mubr.msk.f32.mxu1 %vm602_vm1, %v17452_v36 }
 0x78f   : > { %12002 = vmatmul.mubr.msk.f32.gmra.mrb[30].mxu1 %vm602_vm1, %v17453_v15  ;;  %v7469_v15 = vstv %s10038_s25  ;;  %s10187_s25 = sshll.u32 %s13278_s9, 10  ;;  %s17081_s9 = scalar_lea.sflag [#allocation3], %s310_s21 }
 0x790   : > { %12012 = vmatprep.mubr.msk.f32.mxu1 %vm602_vm1, %v15774_v57  ;;  %v10043_v57 = vld [vmem:[%s17125_s3 + $0x260] sm:$0xff]  ;;  %s17073_s17 = scalar_lea.hbm %s17130_s8, %s10187_s25 }
 0x793   : > { %12013 = vmatmul.mubr.msk.f32.vlgmr.msra.gmra.mrb[24].mxu1 %vm602_vm1, %v15777_v29  ;;  %v10044_v29 = vld [vmem:[%s17125_s3 + $0x268] sm:$0xff] }
 0x794   : > { %12015 = vmatprep.mubr.msk.f32.mxu1 %vm602_vm1, %v15787_v12  ;;  %v12431_v12 = vpack.c.bf16 %v10044_v29, %v10043_v57 }
 0x796   : > { %12432 = vmatprep.subr.bf16.mxu0 %v12431_v12 }
 0x797   : > { %12016 = vmatmul.mubr.msk.f32.gmra.mrb[26].mxu1 %vm602_vm1, %v15794_v53  ;;  %12434 = vmatpush3.bf16.msra.mxu0 %v12431_v12  ;;  %v10045_v53 = vld [vmem:[%s17125_s3 + $0x270] sm:$0xff] }
 0x798   : > { %12018 = vmatprep.mubr.msk.f32.mxu1 %vm602_vm1, %v15821_v4 }
 0x79b   : > { %12019 = vmatmul.mubr.msk.f32.gmra.mrb[28].mxu1 %vm602_vm1, %v15835_v23  ;;  %v10040_v23 = vld [vmem:[%s17125_s3 + $0x248] sm:$0xff] }
 0x79c   : > { %12021 = vmatprep.mubr.msk.f32.mxu1 %vm602_vm1, %v15807_v34  ;;  %v10046_v34 = vld [vmem:[%s17125_s3 + $0x278] sm:$0xff] }
 0x79d   : > { %v12435_v4 = vpack.c.bf16 %v10046_v34, %v10045_v53 }
 0x79f   : > { %12022 = vmatmul.mubr.msk.f32.gmra.mrb[30].mxu1 %vm602_vm1, %v15780_v41  ;;  %v10039_v41 = vld [vmem:[%s17125_s3 + $0x240] sm:$0xff]  ;;  %12436 = vmatprep.subr.bf16.mxu0 %v12435_v4 }
 0x7a0   : > { %v12439_v8 = vpack.c.bf16 %v10040_v23, %v10039_v41  ;;  %12438 = vmatpush3.bf16.msra.mxu0 %v12435_v4 }
 0x7a2   : > { %12440 = vmatprep.subr.bf16.mxu0 %v12439_v8 }
 0x836   : > { %v11774_v43 = vpop.f32.mrb[16].mxu1 }
 0x837   : > { %v7401_v17 = vpop.f32.mrb[17].mxu1  ;;  %v7453_v6 = vadd.f32 %v11774_v43, %v10037_v11 }
 0x838   : > { %v7452_v61 = vadd.f32 %v10037_v11, %v7401_v17 }
 0x839   : > { %v7471_v29 = vmul.f32 %v7469_v15, %v7453_v6  ;;  %vm7462_vm7 = vcmp.gt.f32.partialorder %v7453_v6, 0.0 }
 0x83a   : > { %v11777_v45 = vpop.f32.mrb[18].mxu1  ;;  %v7470_v12 = vmul.f32 %v7469_v15, %v7452_v61  ;;  %vm7461_vm8 = vcmp.gt.f32.partialorder %v7452_v61, 0.0 }
 0x83b   : > { %v7411_v13 = vpop.f32.mrb[19].mxu1  ;;  %v7455_v4 = vadd.f32 %v11777_v45, %v10037_v11  ;;  %v16632_v10 = vsel %vm7462_vm7, %v7453_v6, %v7471_v29 }
 0x83c   : > { %v7454_v53 = vadd.f32 %v10037_v11, %v7411_v13  ;;  %v16634_v31 = vsel %vm7461_vm8, %v7452_v61, %v7470_v12  ;;  %v10042_v13 = vld [vmem:[%s17125_s3 + $0x258] sm:$0xff] }
 0x83d   : > { %vm7464_vm11 = vcmp.gt.f32.partialorder %v7455_v4, 0.0  ;;  %v12443_v29 = vpack.c.bf16 %v10042_v13, %v10041_v42 }
 0x83e   : > { %v11780_v3 = vpop.f32.mrb[20].mxu1  ;;  %v7472_v43 = vmul.f32 %v7469_v15, %v7454_v53  ;;  %vm7463_vm10 = vcmp.gt.f32.partialorder %v7454_v53, 0.0 }
 0x83f   : > { %v7421_v36 = vpop.f32.mrb[21].mxu1  ;;  %v7457_v45 = vadd.f32 %v11780_v3, %v10037_v11 }
 0x840   : > { %v7456_v17 = vadd.f32 %v10037_v11, %v7421_v36  ;;  %v7517_v36 = vmul.f32 %v15826_v5, %v16634_v31  ;;  %v16648_v12 = vsel %vm7463_vm10, %v7454_v53, %v7472_v43 }
 0x841   : > { %v7475_v5 = vmul.f32 %v7469_v15, %v7457_v45  ;;  %vm7466_vm14 = vcmp.gt.f32.partialorder %v7457_v45, 0.0 }
 0x842   : > { %v11783_v57 = vpop.f32.mrb[22].mxu1  ;;  %vm7465_vm13 = vcmp.gt.f32.partialorder %v7456_v17, 0.0 }
 0x843   : > { %v7459_v34 = vadd.f32 %v11783_v57, %v10037_v11  ;;  %v7431_v41 = vpop.f32.mrb[23].mxu1  ;;  %v7473_v57 = vmul.f32 %v7469_v15, %v7455_v4 }
 0x844   : > { %v7458_v23 = vadd.f32 %v10037_v11, %v7431_v41  ;;  %v7474_v41 = vmul.f32 %v7469_v15, %v7456_v17  ;;  %v7518_v11 = vmul.f32 %v15841_v48, %v16632_v10  ;;  %v7519_v48 = vmul.f32 %v15864_v21, %v16648_v12 }
 0x845   : > { %vm7468_vm9 = vcmp.gt.f32.partialorder %v7459_v34, 0.0  ;;  %v7477_v44 = vmul.f32 %v7469_v15, %v7459_v34  ;;  %v16659_v3 = vsel %vm7464_vm11, %v7455_v4, %v7473_v57 }
 0x846   : > { %v7476_v6 = vmul.f32 %v7469_v15, %v7458_v23  ;;  %vm7467_vm12 = vcmp.gt.f32.partialorder %v7458_v23, 0.0  ;;  %v7520_v4 = vmul.f32 %v15875_v22, %v16659_v3  ;;  %v16671_v15 = vsel %vm7466_vm14, %v7457_v45, %v7475_v5 }
 0x847   : > { %v16642_v60 = vsel %vm7468_vm9, %v7459_v34, %v7477_v44  ;;  %v10063_v44 = vld [vmem:[%s17125_s3 + $0x280] sm:$0xff]  ;;  %v16667_v34 = vsel %vm7465_vm13, %v7456_v17, %v7474_v41  ;;  %v7488_v22 = vrot.slane %v16632_v10, 7  ;;  %v7487_v17 = vrot.slane %v16634_v31, 7  ;;  %v9242_v41 = vld [vmem:[%s17126_s4 + $0x70] sm:$0xff] }
 0x848   : > { %v7516_v61 = vmul.f32 %v15812_v27, %v16642_v60  ;;  %v10064_v27 = vld [vmem:[%s17125_s3 + $0x288] sm:$0xff]  ;;  %v16662_v42 = vsel %vm7467_vm12, %v7458_v23, %v7476_v6  ;;  %v7494_v43 = vrot.slane %v16642_v60, 7  ;;  %v7521_v21 = vmul.f32 %v15886_v9, %v16667_v34  ;;  %v10065_v6 = vld [vmem:[%s17125_s3 + $0x290] sm:$0xff] }
 0x849   : > { %v12447_v53 = vpack.c.bf16 %v10064_v27, %v10063_v44  ;;  %v7493_v23 = vrot.slane %v16662_v42, 7  ;;  %v7523_v57 = vmul.f32 %v15908_v59, %v16662_v42  ;;  %v7489_v9 = vrot.slane %v16648_v12, 7 }
 0x84a   : > { %11792 = vmatprep.mubr.msk.f32.mxu0 %vm602_vm1, %v7516_v61  ;;  %v10066_v61 = vld [vmem:[%s17125_s3 + $0x298] sm:$0xff]  ;;  %v16708_v59 = vsel %vm569_vm2, %v7487_v17, %v7488_v22 }
 0x84b   : > { %11793 = vmatmul.mubr.msk.f32.vlgmr.msra.gmra.mrb[32].mxu0 %vm602_vm1, %v7517_v36  ;;  %v16686_v13 = vsel %vm569_vm2, %v7493_v23, %v7494_v43  ;;  %v7490_v36 = vrot.slane %v16659_v3, 7  ;;  %v12451_v27 = vpack.c.bf16 %v10066_v61, %v10065_v6  ;;  %v7787_v61 = vrot.slane %v16632_v10, 1 }
 0x84c   : > { %12442 = vmatpush3.bf16.msra.mxu0 %v12439_v8  ;;  %11795 = vmatprep.mubr.msk.f32.mxu0 %vm602_vm1, %v7518_v11  ;;  %v7522_v8 = vmul.f32 %v15893_v40, %v16671_v15  ;;  %v16694_v40 = vsel %vm569_vm2, %v7494_v43, %v7487_v17  ;;  %v7503_v45 = vmul.f32 %v15919_v63, %v16686_v13  ;;  %v9240_v63 = vld [vmem:[%s17126_s4 + $0x60] sm:$0xff]  ;;  %v9243_v11 = vld [vmem:[%s17126_s4 + $0x78] sm:$0xff]  ;;  %v7492_v17 = vrot.slane %v16671_v15, 7 }
 0x84d   : > { %12444 = vmatprep.subr.bf16.mxu0 %v12443_v29  ;;  %v7504_v44 = vmul.f32 %v15940_v38, %v16694_v40  ;;  %v16730_v43 = vsel %vm569_vm2, %v7488_v22, %v7489_v9  ;;  %v12531_v38 = vpack.c.bf16 %v9243_v11, %v9242_v41 }
 0x84e   : > { %v7506_v22 = vmul.f32 %v15972_v55, %v16730_v43  ;;  %v7786_v55 = vrot.slane %v16634_v31, 1 }
 0x84f   : > { %11796 = vmatmul.mubr.msk.f32.gmra.mrb[34].mxu0 %vm602_vm1, %v7519_v48  ;;  %v7491_v48 = vrot.slane %v16667_v34, 7 }
 0x850   : > { %11798 = vmatprep.mubr.msk.f32.mxu0 %vm602_vm1, %v7520_v4  ;;  %12446 = vmatpush3.bf16.msra.mxu0 %v12443_v29  ;;  %v9241_v29 = vld [vmem:[%s17126_s4 + $0x68] sm:$0xff]  ;;  %v7505_v4 = vmul.f32 %v15947_v1, %v16708_v59  ;;  %v16742_v1 = vsel %vm569_vm2, %v7489_v9, %v7490_v36  ;;  %v7793_v9 = vrot.slane %v16642_v60, 1 }
 0x851   : > { %12448 = vmatprep.subr.bf16.mxu0 %v12447_v53  ;;  %v12527_v5 = vpack.c.bf16 %v9241_v29, %v9240_v63  ;;  %v16751_v6 = vsel %vm569_vm2, %v7490_v36, %v7491_v48  ;;  %v16768_v63 = vsel %vm569_vm2, %v7492_v17, %v7493_v23  ;;  %v7788_v29 = vrot.slane %v16648_v12, 1 }
 0x852   : > { %v16774_v41 = vsel %vm869_vm3, %v7793_v9, %v7786_v55  ;;  %v7789_v23 = vrot.slane %v16659_v3, 1 }
 0x853   : > { %11799 = vmatmul.mubr.msk.f32.gmra.mrb[36].mxu0 %vm602_vm1, %v7521_v21  ;;  %v10075_v21 = vld [vmem:[%s17125_s3 + $0x2a0] sm:$0xff]  ;;  %12528 = vmatprep.subr.bf16.mxu1 %v12527_v5  ;;  %v7802_v11 = vmul.f32 %v16035_v62, %v16774_v41 }
 0x854   : > { %11801 = vmatprep.mubr.msk.f32.mxu0 %vm602_vm1, %v7522_v8  ;;  %v10076_v8 = vld [vmem:[%s17125_s3 + $0x2a8] sm:$0xff]  ;;  %12530 = vmatpush3.bf16.msra.mxu1 %v12527_v5  ;;  %v7790_v5 = vrot.slane %v16667_v34, 1 }
 0x855   : > { %12532 = vmatprep.subr.bf16.mxu1 %v12531_v38 }
 0x857   : > { %11802 = vmatmul.mubr.msk.f32.gmra.mrb[38].mxu0 %vm602_vm1, %v7523_v57  ;;  %v12455_v57 = vpack.c.bf16 %v10076_v8, %v10075_v21  ;;  %v16806_v8 = vsel %vm869_vm3, %v7788_v29, %v7789_v23 }
 0x858   : > { %11812 = vmatprep.mubr.msk.f32.mxu0 %vm602_vm1, %v7503_v45  ;;  %v7507_v45 = vmul.f32 %v15979_v51, %v16742_v1  ;;  %v7508_v51 = vmul.f32 %v15997_v2, %v16751_v6  ;;  %12534 = vmatpush3.bf16.msra.mxu1 %v12531_v38  ;;  %v7510_v2 = vmul.f32 %v16024_v52, %v16768_v63  ;;  %v10087_v38 = vld [vmem:[%s17125_s3 + $0x2c0] sm:$0xff] }
 0x859   : > { %v16796_v52 = vsel %vm869_vm3, %v7787_v61, %v7788_v29 }
 0x85a   : > { %v7804_v21 = vmul.f32 %v16063_v26, %v16796_v52  ;;  %v7805_v26 = vmul.f32 %v16088_v24, %v16806_v8  ;;  %v17454_v24 = vld [vmem:[#allocation40_spill] sm:$0xff] }
 0x85b   : > { %11813 = vmatmul.mubr.msk.f32.vlgmr.msra.gmra.mrb[32].mxu0 %vm602_vm1, %v7504_v44  ;;  %v10077_v44 = vld [vmem:[%s17125_s3 + $0x2b0] sm:$0xff] }
 0x85c   : > { %12450 = vmatpush3.bf16.msra.mxu0 %v12447_v53  ;;  %11815 = vmatprep.mubr.msk.f32.mxu0 %vm602_vm1, %v7505_v4  ;;  %v16757_v53 = vsel %vm569_vm2, %v7491_v48, %v7492_v17  ;;  %v7791_v4 = vrot.slane %v16671_v15, 1  ;;  %v10088_v17 = vld [vmem:[%s17125_s3 + $0x2c8] sm:$0xff] }
 0x85d   : > { %12452 = vmatprep.subr.bf16.mxu0 %v12451_v27  ;;  %v7509_v36 = vmul.f32 %v16006_v37, %v16757_v53  ;;  %v16781_v37 = vsel %vm869_vm3, %v7786_v55, %v7787_v61 }
 0x85e   : > { %v7803_v62 = vmul.f32 %v16056_v28, %v16781_v37  ;;  %v7792_v28 = vrot.slane %v16662_v42, 1 }
 0x85f   : > { %11816 = vmatmul.mubr.msk.f32.gmra.mrb[34].mxu0 %vm602_vm1, %v7506_v22  ;;  %v16818_v22 = vsel %vm869_vm3, %v7789_v23, %v7790_v5 }
 0x860   : > { %11818 = vmatprep.mubr.msk.f32.mxu0 %vm602_vm1, %v7507_v45  ;;  %12454 = vmatpush3.bf16.msra.mxu0 %v12451_v27  ;;  %v10078_v27 = vld [vmem:[%s17125_s3 + $0x2b8] sm:$0xff]  ;;  %v12463_v45 = vpack.c.bf16 %v10088_v17, %v10087_v38  ;;  %v7806_v55 = vmul.f32 %v16095_v30, %v16818_v22  ;;  %v16832_v61 = vsel %vm869_vm3, %v7791_v4, %v7792_v28  ;;  %v10100_v38 = vld [vmem:[%s17125_s3 + $0x2e8] sm:$0xff]  ;;  %v17460_v17 = vld [vmem:[#allocation46_spill] sm:$0xff] }
 0x861   : > { %12456 = vmatprep.subr.bf16.mxu0 %v12455_v57  ;;  %v12459_v48 = vpack.c.bf16 %v10078_v27, %v10077_v44  ;;  %v16841_v29 = vsel %vm869_vm3, %v7792_v28, %v7793_v9  ;;  %v10089_v27 = vld [vmem:[%s17125_s3 + $0x2d0] sm:$0xff]  ;;  %v17458_v9 = vld [vmem:[#allocation44_spill] sm:$0xff]  ;;  %v7954_v28 = vmul.f32 %v17460_v17, %v16742_v1 }
 0x863   : > { %11819 = vmatmul.mubr.msk.f32.gmra.mrb[36].mxu0 %vm602_vm1, %v7508_v51  ;;  %v16827_v51 = vsel %vm869_vm3, %v7790_v5, %v7791_v4  ;;  %v7952_v5 = vmul.f32 %v17458_v9, %v16708_v59  ;;  %v10112_v9 = vld [vmem:[%s17125_s3 + $0x308] sm:$0xff] }
 0x864   : > { %11821 = vmatprep.mubr.msk.f32.mxu0 %vm602_vm1, %v7509_v36  ;;  %v17455_v36 = vld [vmem:[#allocation41_spill] sm:$0xff] }
 0x865   : > { %v7808_v30 = vmul.f32 %v17455_v36, %v16832_v61 }
 0x867   : > { %11822 = vmatmul.mubr.msk.f32.gmra.mrb[38].mxu0 %vm602_vm1, %v7510_v2  ;;  %v17456_v2 = vld [vmem:[#allocation42_spill] sm:$0xff] }
 0x868   : > { %11832 = vmatprep.mubr.msk.f32.mxu0 %vm602_vm1, %v7802_v11  ;;  %v7809_v23 = vmul.f32 %v17456_v2, %v16841_v29  ;;  %v17457_v11 = vld [vmem:[#allocation43_spill] sm:$0xff]  ;;  %v17464_v2 = vld [vmem:[#allocation50_spill] sm:$0xff] }
 0x869   : > { %v7951_v44 = vmul.f32 %v17457_v11, %v16694_v40  ;;  %v10101_v11 = vld [vmem:[%s17125_s3 + $0x2f0] sm:$0xff] }
 0x86b   : > { %11833 = vmatmul.mubr.msk.f32.vlgmr.msra.gmra.mrb[32].mxu0 %vm602_vm1, %v7803_v62  ;;  %v12467_v62 = vpack.c.bf16 %v10090_v32, %v10089_v27  ;;  %v10111_v32 = vld [vmem:[%s17125_s3 + $0x300] sm:$0xff] }
 0x86c   : > { %12458 = vmatpush3.bf16.msra.mxu0 %v12455_v57  ;;  %11835 = vmatprep.mubr.msk.f32.mxu0 %vm602_vm1, %v7804_v21  ;;  %v7807_v57 = vmul.f32 %v17454_v24, %v16827_v51  ;;  %v10099_v21 = vld [vmem:[%s17125_s3 + $0x2e0] sm:$0xff] }
 0x86d   : > { %12460 = vmatprep.subr.bf16.mxu0 %v12459_v48 }
 0x86f   : > { %11836 = vmatmul.mubr.msk.f32.gmra.mrb[34].mxu0 %vm602_vm1, %v7805_v26  ;;  %v12471_v26 = vpack.c.bf16 %v10100_v38, %v10099_v21  ;;  %v10114_v21 = vld [vmem:[%s17125_s3 + $0x318] sm:$0xff]  ;;  %v17466_v38 = vld [vmem:[#allocation52_spill] sm:$0xff] }
 0x870   : > { %11838 = vmatprep.mubr.msk.f32.mxu0 %vm602_vm1, %v7806_v55  ;;  %12462 = vmatpush3.bf16.msra.mxu0 %v12459_v48  ;;  %v17459_v48 = vld [vmem:[#allocation45_spill] sm:$0xff]  ;;  %v17461_v55 = vld [vmem:[#allocation47_spill] sm:$0xff]  ;;  %v8242_v17 = vmul.f32 %v17466_v38, %v16796_v52  ;;  %v8392_v38 = vmul.f32 %v16341_v0, %v16742_v1  ;;  %v8394_v0 = vmul.f32 %v16363_v20, %v16757_v53 }
 0x871   : > { %12464 = vmatprep.subr.bf16.mxu0 %v12463_v45  ;;  %v7953_v4 = vmul.f32 %v17459_v48, %v16730_v43  ;;  %v7955_v24 = vmul.f32 %v17461_v55, %v16751_v6  ;;  %v8395_v1 = vmul.f32 %v16372_v19, %v16768_v63  ;;  %v8539_v20 = vmul.f32 %v16395_v33, %v16632_v10  ;;  %v10138_v19 = vld [vmem:[%s17125_s3 + $0x358] sm:$0xff] }
 0x872   : > { %v8542_v33 = vmul.f32 %v16432_v39, %v16667_v34  ;;  %v8546_v39 = vmul.f32 %v16464_v49, %v16634_v31 }
 0x873   : > { %11839 = vmatmul.mubr.msk.f32.gmra.mrb[36].mxu0 %vm602_vm1, %v7807_v57  ;;  %v17462_v57 = vld [vmem:[#allocation48_spill] sm:$0xff] }
 0x874   : > { %11841 = vmatprep.mubr.msk.f32.mxu0 %vm602_vm1, %v7808_v30  ;;  %v7956_v36 = vmul.f32 %v17462_v57, %v16757_v53  ;;  %v10124_v57 = vld [vmem:[%s17125_s3 + $0x328] sm:$0xff]  ;;  %v10147_v53 = vld [vmem:[%s17127_s5 + $0x6] ss:$0 sm:$0xff] }
 0x877   : > { %11842 = vmatmul.mubr.msk.f32.gmra.mrb[38].mxu0 %vm602_vm1, %v7809_v23  ;;  %v7958_v23 = vmul.f32 %v17464_v2, %v16686_v13 }
 0x878   : > { %11852 = vmatprep.mubr.msk.f32.mxu0 %vm602_vm1, %v7951_v44  ;;  %v10102_v44 = vld [vmem:[%s17125_s3 + $0x2f8] sm:$0xff] }
 0x879   : > { %v12475_v27 = vpack.c.bf16 %v10102_v44, %v10101_v11  ;;  %v17470_v44 = vld [vmem:[#allocation56_spill] sm:$0xff] }
 0x87b   : > { %11853 = vmatmul.mubr.msk.f32.vlgmr.msra.gmra.mrb[32].mxu0 %vm602_vm1, %v7952_v5  ;;  %v12479_v5 = vpack.c.bf16 %v10112_v9, %v10111_v32  ;;  %v17472_v9 = vld [vmem:[#allocation21_spill] sm:$0xff] }
 0x87c   : > { %12466 = vmatpush3.bf16.msra.mxu0 %v12463_v45  ;;  %11855 = vmatprep.mubr.msk.f32.mxu0 %vm602_vm1, %v7953_v4  ;;  %v17463_v45 = vld [vmem:[#allocation49_spill] sm:$0xff]  ;;  %v10113_v4 = vld [vmem:[%s17125_s3 + $0x310] sm:$0xff] }
 0x87d   : > { %12468 = vmatprep.subr.bf16.mxu0 %v12467_v62  ;;  %v7957_v30 = vmul.f32 %v17463_v45, %v16768_v63 }
 0x87f   : > { %11856 = vmatmul.mubr.msk.f32.gmra.mrb[34].mxu0 %vm602_vm1, %v7954_v28  ;;  %v12483_v28 = vpack.c.bf16 %v10114_v21, %v10113_v4  ;;  %v8391_v4 = vmul.f32 %v16334_v46, %v16730_v43  ;;  %v8393_v46 = vmul.f32 %v16356_v50, %v16751_v6  ;;  %v8397_v50 = vmul.f32 %v16388_v14, %v16694_v40  ;;  %v10137_v6 = vld [vmem:[%s17125_s3 + $0x350] sm:$0xff] }
 0x880   : > { %11858 = vmatprep.mubr.msk.f32.mxu0 %vm602_vm1, %v7955_v24  ;;  %12470 = vmatpush3.bf16.msra.mxu0 %v12467_v62  ;;  %v17465_v62 = vld [vmem:[#allocation51_spill] sm:$0xff]  ;;  %v10123_v24 = vld [vmem:[%s17125_s3 + $0x320] sm:$0xff]  ;;  %v8541_v14 = vmul.f32 %v16417_v47, %v16659_v3  ;;  %v8545_v47 = vmul.f32 %v16455_v7, %v16642_v60  ;;  %v17474_v7 = vld [vmem:[#allocation25_spill] sm:$0xff] }
 0x881   : > { %12472 = vmatprep.subr.bf16.mxu0 %v12471_v26  ;;  %v8241_v48 = vmul.f32 %v17465_v62, %v16781_v37  ;;  %v12487_v45 = vpack.c.bf16 %v10124_v57, %v10123_v24  ;;  %v10125_v62 = vld [vmem:[%s17125_s3 + $0x330] sm:$0xff]  ;;  %v8691_v49 = vmul.f32 %v17474_v7, %v16827_v51 }
 0x883   : > { %11859 = vmatmul.mubr.msk.f32.gmra.mrb[36].mxu0 %vm602_vm1, %v7956_v36  ;;  %v8244_v36 = vmul.f32 %v16280_v18, %v16818_v22  ;;  %v17471_v18 = vld [vmem:[#allocation19_spill] sm:$0xff] }
 0x884   : > { %11861 = vmatprep.mubr.msk.f32.mxu0 %vm602_vm1, %v7957_v30  ;;  %v17468_v30 = vld [vmem:[#allocation54_spill] sm:$0xff]  ;;  %v8248_v32 = vmul.f32 %v17471_v18, %v16774_v41 }
 0x885   : > { %v8245_v2 = vmul.f32 %v17468_v30, %v16827_v51  ;;  %v17479_v51 = vld [vmem:[#allocation32_spill] sm:$0xff] }
 0x886   : > { %v17482_v30 = vld [vmem:[#allocation36_spill] sm:$0xff] }
 0x887   : > { %11862 = vmatmul.mubr.msk.f32.gmra.mrb[38].mxu0 %vm602_vm1, %v7958_v23  ;;  %v17469_v23 = vld [vmem:[#allocation55_spill] sm:$0xff] }
 0x888   : > { %11872 = vmatprep.mubr.msk.f32.mxu0 %vm602_vm1, %v16634_v31  ;;  %v8246_v11 = vmul.f32 %v17469_v23, %v16832_v61  ;;  %v17475_v31 = vld [vmem:[#allocation27_spill] sm:$0xff] }
 0x88b   : > { %11873 = vmatmul.mubr.msk.f32.vlgmr.msra.gmra.mrb[32].mxu0 %vm602_vm1, %v16632_v10  ;;  %v8543_v10 = vmul.f32 %v16439_v16, %v16671_v15  ;;  %v8688_v16 = vmul.f32 %v16471_v58, %v16796_v52  ;;  %v8692_v58 = vmul.f32 %v17475_v31, %v16832_v61 }
 0x88c   : > { %12474 = vmatpush3.bf16.msra.mxu0 %v12471_v26  ;;  %11875 = vmatprep.mubr.msk.f32.mxu0 %vm602_vm1, %v16648_v12  ;;  %v17467_v26 = vld [vmem:[#allocation53_spill] sm:$0xff] }
 0x88d   : > { %12476 = vmatprep.subr.bf16.mxu0 %v12475_v27  ;;  %v8243_v55 = vmul.f32 %v17467_v26, %v16806_v8 }
 0x88f   : > { %11876 = vmatmul.mubr.msk.f32.gmra.mrb[34].mxu0 %vm602_vm1, %v16659_v3  ;;  %v17476_v3 = vld [vmem:[#allocation29_spill] sm:$0xff] }
 0x890   : > { %11878 = vmatprep.mubr.msk.f32.mxu0 %vm602_vm1, %v16667_v34  ;;  %12478 = vmatpush3.bf16.msra.mxu0 %v12475_v27  ;;  %v8247_v27 = vmul.f32 %v17470_v44, %v16841_v29 }
 0x891   : > { %12480 = vmatprep.subr.bf16.mxu0 %v12479_v5 }
 0x893   : > { %11879 = vmatmul.mubr.msk.f32.gmra.mrb[36].mxu0 %vm602_vm1, %v16671_v15  ;;  %v17478_v15 = vld [vmem:[#allocation31_spill] sm:$0xff] }
 0x894   : > { %11881 = vmatprep.mubr.msk.f32.mxu0 %vm602_vm1, %v16662_v42  ;;  %v8695_v40 = vmul.f32 %v17478_v15, %v16781_v37  ;;  %v17481_v37 = vld [vmem:[#allocation35_spill] sm:$0xff] }
 0x897   : > { %11882 = vmatmul.mubr.msk.f32.gmra.mrb[38].mxu0 %vm602_vm1, %v16642_v60 }
 0x898   : > { %11892 = vmatprep.mubr.msk.f32.mxu0 %vm602_vm1, %v8241_v48  ;;  %v10126_v48 = vld [vmem:[%s17125_s3 + $0x338] sm:$0xff] }
 0x899   : > { %v12491_v21 = vpack.c.bf16 %v10126_v48, %v10125_v62 }
 0x89b   : > { %11893 = vmatmul.mubr.msk.f32.vlgmr.msra.gmra.mrb[32].mxu0 %vm602_vm1, %v8242_v17  ;;  %v10136_v17 = vld [vmem:[%s17125_s3 + $0x348] sm:$0xff] }
 0x89c   : > { %12482 = vmatpush3.bf16.msra.mxu0 %v12479_v5  ;;  %11895 = vmatprep.mubr.msk.f32.mxu0 %vm602_vm1, %v8243_v55  ;;  %v8390_v5 = vmul.f32 %v17472_v9, %v16708_v59  ;;  %v10135_v59 = vld [vmem:[%s17125_s3 + $0x340] sm:$0xff]  ;;  %v17484_v9 = vld [vmem:[#allocation39_spill] sm:$0xff] }
 0x89d   : > { %12484 = vmatprep.subr.bf16.mxu0 %v12483_v28  ;;  %v12495_v43 = vpack.c.bf16 %v10136_v17, %v10135_v59  ;;  %v17486_v59 = vld [vmem:[#allocation34_spill] sm:$0xff] }
 0x89f   : > { %11896 = vmatmul.mubr.msk.f32.gmra.mrb[34].mxu0 %vm602_vm1, %v8244_v36 }
 0x8a0   : > { %11898 = vmatprep.mubr.msk.f32.mxu0 %vm602_vm1, %v8245_v2  ;;  %12486 = vmatpush3.bf16.msra.mxu0 %v12483_v28  ;;  %v8396_v28 = vmul.f32 %v16379_v56, %v16686_v13  ;;  %v8540_v56 = vmul.f32 %v16410_v35, %v16648_v12  ;;  %v12499_v13 = vpack.c.bf16 %v10138_v19, %v10137_v6  ;;  %v17473_v12 = vld [vmem:[#allocation23_spill] sm:$0xff] }
 0x8a1   : > { %12488 = vmatprep.subr.bf16.mxu0 %v12487_v45  ;;  %v8544_v35 = vmul.f32 %v16448_v54, %v16662_v42  ;;  %v8689_v54 = vmul.f32 %v16486_v25, %v16806_v8  ;;  %v8690_v60 = vmul.f32 %v17473_v12, %v16818_v22  ;;  %v8693_v25 = vmul.f32 %v17476_v3, %v16841_v29  ;;  %v17477_v42 = vld [vmem:[#allocation30_spill] sm:$0xff]  ;;  %v17480_v29 = vld [vmem:[#allocation33_spill] sm:$0xff] }
 0x8a2   : > { %v8694_v34 = vmul.f32 %v17477_v42, %v16774_v41 }
 0x8a3   : > { %11899 = vmatmul.mubr.msk.f32.gmra.mrb[36].mxu0 %vm602_vm1, %v8246_v11 }
 0x8a4   : > { %11901 = vmatprep.mubr.msk.f32.mxu0 %vm602_vm1, %v8247_v27  ;;  %v17483_v27 = vld [vmem:[#allocation38_spill] sm:$0xff] }
 0x8a7   : > { %11902 = vmatmul.mubr.msk.f32.gmra.mrb[38].mxu0 %vm602_vm1, %v8248_v32 }
 0x8a8   : > { %11912 = vmatprep.mubr.msk.f32.mxu0 %vm602_vm1, %v8390_v5 }
 0x8ab   : > { %11913 = vmatmul.mubr.msk.f32.vlgmr.msra.gmra.mrb[32].mxu0 %vm602_vm1, %v8391_v4 }
 0x8ac   : > { %12490 = vmatpush3.bf16.msra.mxu0 %v12487_v45  ;;  %11915 = vmatprep.mubr.msk.f32.mxu0 %vm602_vm1, %v8392_v38 }
 0x8ad   : > { %12492 = vmatprep.subr.bf16.mxu0 %v12491_v21 }
 0x8af   : > { %11916 = vmatmul.mubr.msk.f32.gmra.mrb[34].mxu0 %vm602_vm1, %v8393_v46  ;;  %v10180_v46 = vld [vmem:[%s17127_s5 + $0x7] ss:$0 sm:$0xff] }
 0x8b0   : > { %11918 = vmatprep.mubr.msk.f32.mxu0 %vm602_vm1, %v8394_v0  ;;  %12494 = vmatpush3.bf16.msra.mxu0 %v12491_v21  ;;  %v17485_v21 = vld [vmem:[#allocation37_spill] sm:$0xff] }
 0x8b1   : > { %12496 = vmatprep.subr.bf16.mxu0 %v12495_v43 }
 0x8b3   : > { %11919 = vmatmul.mubr.msk.f32.gmra.mrb[36].mxu0 %vm602_vm1, %v8395_v1 }
 0x8b4   : > { %11921 = vmatprep.mubr.msk.f32.mxu0 %vm602_vm1, %v8396_v28 }
 0x8b7   : > { %11922 = vmatmul.mubr.msk.f32.gmra.mrb[38].mxu0 %vm602_vm1, %v8397_v50 }
 0x8b8   : > { %11932 = vmatprep.mubr.msk.f32.mxu0 %vm602_vm1, %v8539_v20 }
 0x8bb   : > { %11933 = vmatmul.mubr.msk.f32.vlgmr.msra.gmra.mrb[32].mxu0 %vm602_vm1, %v8540_v56 }
 0x8bc   : > { %12498 = vmatpush3.bf16.msra.mxu0 %v12495_v43  ;;  %11935 = vmatprep.mubr.msk.f32.mxu0 %vm602_vm1, %v8541_v14 }
 0x8bd   : > { %12500 = vmatprep.subr.bf16.mxu0 %v12499_v13 }
 0x8bf   : > { %11936 = vmatmul.mubr.msk.f32.gmra.mrb[34].mxu0 %vm602_vm1, %v8542_v33 }
 0x8c0   : > { %11938 = vmatprep.mubr.msk.f32.mxu0 %vm602_vm1, %v8543_v10  ;;  %12502 = vmatpush3.bf16.msra.mxu0 %v12499_v13 }
 0x8c3   : > { %11939 = vmatmul.mubr.msk.f32.gmra.mrb[36].mxu0 %vm602_vm1, %v8544_v35 }
 0x8c4   : > { %11941 = vmatprep.mubr.msk.f32.mxu0 %vm602_vm1, %v8545_v47 }
 0x8c7   : > { %11942 = vmatmul.mubr.msk.f32.gmra.mrb[38].mxu0 %vm602_vm1, %v8546_v39 }
 0x8c8   : > { %11952 = vmatprep.mubr.msk.f32.mxu0 %vm602_vm1, %v8688_v16 }
 0x8cb   : > { %11953 = vmatmul.mubr.msk.f32.vlgmr.msra.gmra.mrb[32].mxu0 %vm602_vm1, %v8689_v54 }
 0x8cc   : > { %11955 = vmatprep.mubr.msk.f32.mxu0 %vm602_vm1, %v8690_v60 }
 0x8cf   : > { %11956 = vmatmul.mubr.msk.f32.gmra.mrb[34].mxu0 %vm602_vm1, %v8691_v49 }
 0x8d0   : > { %11958 = vmatprep.mubr.msk.f32.mxu0 %vm602_vm1, %v8692_v58 }
 0x8d3   : > { %11959 = vmatmul.mubr.msk.f32.gmra.mrb[36].mxu0 %vm602_vm1, %v8693_v25 }
 0x8d4   : > { %11961 = vmatprep.mubr.msk.f32.mxu0 %vm602_vm1, %v8694_v34 }
 0x8d7   : > { %11962 = vmatmul.mubr.msk.f32.gmra.mrb[38].mxu0 %vm602_vm1, %v8695_v40 }
 0x99e   : > { %v11954_v63 = vpop.f32.mrb[32].mxu0 }
 0x99f   : > { %v8842_v52 = vadd.f32 %v11954_v63, %v10147_v53  ;;  %v8790_v8 = vpop.f32.mrb[33].mxu0 }
 0x9a0   : > { %v8841_v22 = vadd.f32 %v10147_v53, %v8790_v8 }
 0x9a1   : > { %v8850_v26 = vadd.f32 %v8842_v52, %v17480_v29 }
 0x9a2   : > { %v8849_v61 = vadd.f32 %v8841_v22, %v17479_v51  ;;  %v11957_v41 = vpop.f32.mrb[34].mxu0 }
 0x9a3   : > { %v8844_v55 = vadd.f32 %v11957_v41, %v10147_v53  ;;  %v8800_v24 = vpop.f32.mrb[35].mxu0 }
 0x9a4   : > { %v8843_v57 = vadd.f32 %v10147_v53, %v8800_v24  ;;  %12032 = vmatprep.mubr.msk.f32.mxu1 %vm602_vm1, %v8849_v61 }
 0x9a5   : > { %12033 = vmatmul.mubr.msk.f32.vlgmr.msra.gmra.mrb[24].mxu1 %vm602_vm1, %v8850_v26  ;;  %v8852_v2 = vadd.f32 %v8844_v55, %v17482_v30 }
 0x9a6   : > { %v8851_v36 = vadd.f32 %v8843_v57, %v17481_v37  ;;  %v11960_v45 = vpop.f32.mrb[36].mxu0 }
 0x9a7   : > { %v8846_v23 = vadd.f32 %v11960_v45, %v10147_v53  ;;  %v8810_v11 = vpop.f32.mrb[37].mxu0 }
 0x9a8   : > { %v8845_v44 = vadd.f32 %v10147_v53, %v8810_v11  ;;  %12035 = vmatprep.mubr.msk.f32.mxu1 %vm602_vm1, %v8851_v36 }
 0x9a9   : > { %12036 = vmatmul.mubr.msk.f32.gmra.mrb[26].mxu1 %vm602_vm1, %v8852_v2  ;;  %v8854_v5 = vadd.f32 %v8846_v23, %v17484_v9 }
 0x9aa   : > { %v8853_v18 = vadd.f32 %v8845_v44, %v17483_v27  ;;  %v11963_v32 = vpop.f32.mrb[38].mxu0 }
 0x9ab   : > { %v8848_v62 = vadd.f32 %v11963_v32, %v10147_v53  ;;  %v8820_v48 = vpop.f32.mrb[39].mxu0 }
 0x9ac   : > { %v8847_v4 = vadd.f32 %v10147_v53, %v8820_v48  ;;  %12038 = vmatprep.mubr.msk.f32.mxu1 %vm602_vm1, %v8853_v18 }
 0x9ad   : > { %12039 = vmatmul.mubr.msk.f32.gmra.mrb[28].mxu1 %vm602_vm1, %v8854_v5  ;;  %v8856_v17 = vadd.f32 %v8848_v62, %v17486_v59 }
 0x9ae   : > { %v8855_v38 = vadd.f32 %v8847_v4, %v17485_v21 }
 0x9b0   : > { %12041 = vmatprep.mubr.msk.f32.mxu1 %vm602_vm1, %v8855_v38 }
 0x9b1   : > { %12042 = vmatmul.mubr.msk.f32.gmra.mrb[30].mxu1 %vm602_vm1, %v8856_v17 }
 0xa78   : > { %v12034_v43 = vpop.f32.mrb[24].mxu1 }
 0xa79   : > { %v9387_v0 = vadd.f32 %v12034_v43, %v10180_v46  ;;  %v9334_v1 = vpop.f32.mrb[25].mxu1 }
 0xa7a   : > { %v9386_v28 = vadd.f32 %v10180_v46, %v9334_v1 }
 0xa7b   : > { %9395 = vst.msk [vmem:[%s312_s24 + $0x8] sm:$0xff] %vm602_vm1, %v9387_v0 }
 0xa7c   : > { %9394 = vst.msk [vmem:[%s312_s24] sm:$0xff] %vm602_vm1, %v9386_v28  ;;  %v12037_v50 = vpop.f32.mrb[26].mxu1 }
 0xa7d   : > { %v9389_v20 = vadd.f32 %v12037_v50, %v10180_v46  ;;  %v9344_v6 = vpop.f32.mrb[27].mxu1 }
 0xa7e   : > { %v9388_v19 = vadd.f32 %v10180_v46, %v9344_v6 }
 0xa7f   : > { %9397 = vst.msk [vmem:[%s312_s24 + $0x18] sm:$0xff] %vm602_vm1, %v9389_v20 }
 0xa80   : > { %9396 = vst.msk [vmem:[%s312_s24 + $0x10] sm:$0xff] %vm602_vm1, %v9388_v19  ;;  %v12040_v56 = vpop.f32.mrb[28].mxu1 }
 0xa81   : > { %v9391_v13 = vadd.f32 %v12040_v56, %v10180_v46  ;;  %v9354_v14 = vpop.f32.mrb[29].mxu1 }
 0xa82   : > { %v9390_v33 = vadd.f32 %v10180_v46, %v9354_v14 }
 0xa83   : > { %9399 = vst.msk [vmem:[%s312_s24 + $0x28] sm:$0xff] %vm602_vm1, %v9391_v13 }
 0xa84   : > { %9398 = vst.msk [vmem:[%s312_s24 + $0x20] sm:$0xff] %vm602_vm1, %v9390_v33  ;;  %v12043_v10 = vpop.f32.mrb[30].mxu1 }
 0xa85   : > { %v9393_v35 = vadd.f32 %v12043_v10, %v10180_v46  ;;  %v9364_v47 = vpop.f32.mrb[31].mxu1 }
 0xa86   : > { %v9392_v39 = vadd.f32 %v10180_v46, %v9364_v47 }
 0xa87   : > { %9401 = vst.msk [vmem:[%s312_s24 + $0x38] sm:$0xff] %vm602_vm1, %v9393_v35 }
 0xa88   : > { %9400 = vst.msk [vmem:[%s312_s24 + $0x30] sm:$0xff] %vm602_vm1, %v9392_v39 }
 0xa89   : > { %13152 = shalt.err (!%p13149_p2)
}
 0xa8a   : > { %s13153_s21 = scalar_lea.hbm %s17073_s17, 1024  ;;  %s13157_s24 = scalar_lea.hbm %s17130_s8, 2048 }
 0xa8b   : > { %p13154_p3 = scmp.ne.s32.totalorder %s17073_s17, %s13153_s21  ;;  %p13158_p8 = scmp.lt.u32.totalorder %s17073_s17, %s17130_s8 }
 0xa8c   : > { %p13159_p10 = scmp.lt.u32.totalorder %s13157_s24, %s13153_s21  ;;  %p13161_p11 = scmp.lt.u32.totalorder %s13153_s21, %s17073_s17 }
 0xa8d   : > { %p13155_p4 = pnand %p13154_p3, %p13295_p5 }
 0xa8e   : > { %p13160_p9 = por %p13159_p10, %p13158_p8 }
 0xa8f   : > { %p13156_p7 = pneg %p13155_p4 }
 0xa90   : > { %p13162_p12 = por %p13161_p11, %p13160_p9 }
 0xa92   : > { %p13163_p13 = pnand %p13162_p12, %p13156_p7 }
 0xa94   : > { %13166 = shalt.err (!%p13163_p13)
}
 0xa95   : > { %s13210_s13 = smov 128   ;;  %s13211_s18 = smov 8  }
 0xa96   : > { %12947 = dma.vmem_to_hbm [thread:$0]  (%p13295_p5), %s17075_s10, 1024, %s17073_s17, %s17081_s9, %s13210_s13, %s13210_s13, %s13211_s18  }
 0xa97 PF: > { %p12959_p0 = scmp.ge.s32.totalorder %s13205_s30, 2  ;;  %s9431_s19 = sand.u32 1, %s13193_s27  }
 0xa98   : > { %s9432_s20 = scalar_lea.sflag [#allocation3], %s9431_s19 }
 0xa99   : > { %p12954_p1 = pnand %p12959_p0, %p13299_p6 }
 0xa9b   : > { %13188 = dma.done.wait (!%p12954_p1), %s9432_s20, 1024  }
 0xa9c   : > { %13190 = vsyncadd (!%p12954_p1), %s9432_s20, 4294966272  ;;  %p19_p2 = scmp.ge.s32.totalorder %s13282_s11, 4   ;;  %s17487_s27 = smov %s13197_s28 }
 0xa9d   : > { %s17488_s28 = smov %s13201_s29  ;;  %s17489_s29 = smov %s13293_s14 }
 0xa9e   : > { %s17490_s30 = smov %s13282_s11  ;;  %21 = sbr.rel (!%p19_p2) target bundleno = 4 (0x4), region = 103 }
 0xaa5   :  { %9437 = vsyncpa [#allocation3], 1 }
 0xaa6   :  { %9439 = vsyncpa [#allocation3 + $0x1], 1 }
 0xaa7   :  { %9440 = vsyncpa [#allocation4], 1 }
 0xaa8   :  { %9442 = vsyncpa [#allocation4 + $0x1], 1 }

</bundles_post_ra>
